<compile_context>
chip_gen: v7x
topology: tpu7x:2x2x1
jax: 0.10.0
libtpu: 0.0.40
codegen_flags: <defaults>
</compile_context>

<pallas_src>
import jax
import jax.numpy as jnp
from jax.experimental import pallas as pl
from jax.experimental.pallas import tpu as pltpu


# ------------------------------------------------------------------ kernel ---

def down_fused_kernel(x_ref, w1_ref, w2t_ref, o_ref, p_pad, h_pad):
    # x_ref  : (H, W, Cin)        bf16 NHWC image (one batch element)
    # w1_ref : (9, Cin, Cmid)     bf16, one (Cin, Cmid) slab per 3x3 tap
    # w2t_ref: (9, Cout, Cmid)    bf16, per-tap conv2 weights, pre-transposed
    # o_ref  : (Cout, Ho*Wo)      lane-dense, NCHW-flattened per image
    # p_pad  : (Ho+2, Wo+2, Cin)  bf16 VMEM scratch (pooled, zero halo)
    # h_pad  : (Ho+2, Wo+2, Cmid) bf16 VMEM scratch (mid activation, zero halo)
    H, W, Cin = x_ref.shape
    Ho, Wo = H // 2, W // 2
    Cmid = w1_ref.shape[2]

    # ---- stage 0: zero ONLY the 1-element halo border -----------------------
    # (interior is fully overwritten below; border rewritten every step so the
    #  kernel stays correct under megacore sharding of the "parallel" grid)
    def zero_border(buf, C):
        buf[0:1, :, :] = jnp.zeros((1, Wo + 2, C), buf.dtype)
        buf[Ho + 1:Ho + 2, :, :] = jnp.zeros((1, Wo + 2, C), buf.dtype)
        buf[:, 0:1, :] = jnp.zeros((Ho + 2, 1, C), buf.dtype)
        buf[:, Wo + 1:Wo + 2, :] = jnp.zeros((Ho + 2, 1, C), buf.dtype)

    zero_border(p_pad, Cin)
    zero_border(h_pad, Cmid)

    # ---- stage 1: 2x2 max pool in bf16 (pure VPU work) ----------------------
    x = x_ref[0:2 * Ho, 0:2 * Wo, :]         # floors odd dims like MaxPool2d(2)
    m = jnp.max(x.reshape(2 * Ho, Wo, 2, Cin), axis=2)     # pool width pairs
    p = jnp.max(m.reshape(Ho, 2, Wo, Cin), axis=1)          # pool height pairs
    p_pad[1:Ho + 1, 1:Wo + 1, :] = p                         # bf16, no cast

    taps = [(dy, dx) for dy in range(3) for dx in range(3)]

    # ---- stage 2: conv1 as 9 accumulated tap matmuls + ReLU -----------------
    h_acc = None
    for t, (dy, dx) in enumerate(taps):
        win = p_pad[dy:dy + Ho, dx:dx + Wo, :].reshape(Ho * Wo, Cin)   # bf16
        d = jax.lax.dot_general(
            win, w1_ref[t],
            dimension_numbers=(((1,), (0,)), ((), ())),
            preferred_element_type=jnp.float32)              # (Ho*Wo, Cmid) f32
        h_acc = d if h_acc is None else h_acc + d
    h = jnp.maximum(h_acc, 0.0).astype(h_pad.dtype)          # one bf16 cast
    h_pad[1:Ho + 1, 1:Wo + 1, :] = h.reshape(Ho, Wo, Cmid)

    # ---- stage 3: conv2, accumulated directly in (Cout, Ho*Wo) --------------
    o_acc = None
    for t, (dy, dx) in enumerate(taps):
        win = h_pad[dy:dy + Ho, dx:dx + Wo, :].reshape(Ho * Wo, Cmid)  # bf16
        d = jax.lax.dot_general(
            w2t_ref[t], win,
            dimension_numbers=(((1,), (1,)), ((), ())),      # contract Cmid
            preferred_element_type=jnp.float32)              # (Cout, Ho*Wo) f32
        o_acc = d if o_acc is None else o_acc + d
    o_ref[...] = jnp.maximum(o_acc, 0.0).astype(o_ref.dtype)


# ----------------------------------------------------------------- wrapper ---

def down_forward(x_nchw, w1_hwio, w2_hwio):
    """Down.forward: maxpool(2) -> conv3x3+relu -> conv3x3+relu.
    Input NCHW (PyTorch convention); returns NCHW."""
    N, Cin, H, W = x_nchw.shape
    Cmid = w1_hwio.shape[-1]
    Cout = w2_hwio.shape[-1]
    Ho, Wo = H // 2, W // 2

    # NCHW -> NHWC once, cast to bf16 once (halves HBM->VMEM traffic).
    x_nhwc = jnp.transpose(x_nchw, (0, 2, 3, 1)).astype(jnp.bfloat16)
    # Per-tap weight slabs, bf16 operands with f32 accumulation on the MXU.
    w1r = w1_hwio.reshape(9, Cin, Cmid).astype(jnp.bfloat16)          # (9,Cin,Cmid)
    w2t = jnp.transpose(w2_hwio.reshape(9, Cmid, Cout),
                        (0, 2, 1)).astype(jnp.bfloat16)               # (9,Cout,Cmid)

    out_flat = pl.pallas_call(
        down_fused_kernel,
        out_shape=jax.ShapeDtypeStruct((N, Cout, Ho * Wo), x_nchw.dtype),
        grid=(N,),
        in_specs=[
            pl.BlockSpec((None, H, W, Cin), lambda n: (n, 0, 0, 0)),
            pl.BlockSpec((9, Cin, Cmid), lambda n: (0, 0, 0)),
            pl.BlockSpec((9, Cout, Cmid), lambda n: (0, 0, 0)),
        ],
        out_specs=pl.BlockSpec((None, Cout, Ho * Wo), lambda n: (n, 0, 0)),
        scratch_shapes=[
            pltpu.VMEM((Ho + 2, Wo + 2, Cin), jnp.bfloat16),
            pltpu.VMEM((Ho + 2, Wo + 2, Cmid), jnp.bfloat16),
        ],
        compiler_params=pltpu.CompilerParams(
            dimension_semantics=("parallel",)),
    )(x_nhwc, w1r, w2t)

    # (N, Cout, Ho*Wo) -> (N, Cout, Ho, Wo): pure metadata reshape (no HBM pass)
    return out_flat.reshape(N, Cout, Ho, Wo)


# --------------------------------------------------------------- reference ---

def down_reference(x_nchw, w1, w2):
    x = jnp.transpose(x_nchw, (0, 2, 3, 1))
    p = jax.lax.reduce_window(x, -jnp.inf, jax.lax.max,
                              (1, 2, 2, 1), (1, 2, 2, 1), "VALID")
    dn = ("NHWC", "HWIO", "NHWC")
    h = jnp.maximum(jax.lax.conv_general_dilated(p, w1, (1, 1), "SAME",
                                                 dimension_numbers=dn), 0.0)
    o = jnp.maximum(jax.lax.conv_general_dilated(h, w2, (1, 1), "SAME",
                                                 dimension_numbers=dn), 0.0)
    return jnp.transpose(o, (0, 3, 1, 2))


# -------------------------------------------------------------------- main ---

if __name__ == "__main__":
    N, C_IN, C_OUT, H, W = 2, 4, 8, 16, 16   # mid_channels == out_channels

    key = jax.random.PRNGKey(0)
    kx, kw1, kw2 = jax.random.split(key, 3)

    x = jax.random.normal(kx, (N, C_IN, H, W), dtype=jnp.float32)       # NCHW
    # deterministic synthetic weights, HWIO layout
    w1 = 0.1 * jax.random.normal(kw1, (3, 3, C_IN, C_OUT), dtype=jnp.float32)
    w2 = 0.1 * jax.random.normal(kw2, (3, 3, C_OUT, C_OUT), dtype=jnp.float32)

    out = jax.block_until_ready(down_forward(x, w1, w2))
    ref = jax.block_until_ready(down_reference(x, w1, w2))

    assert out.shape == (N, C_OUT, H // 2, W // 2), out.shape
    # bf16 activations/weights with f32 accumulation -> slightly looser
    # tolerance vs the pure-f32 reference.
    assert jnp.allclose(out, ref, atol=5e-2, rtol=5e-2), "mismatch vs reference"
    print("KERNEL_OK")
</pallas_src>

<mosaic_0001>
module attributes {stable_mosaic.version = 11 : i64} {
  func.func @down_fused_kernel(%arg0: i32, %arg1: memref<1x16x16x4xbf16, #tpu.memory_space<vmem>>, %arg2: memref<9x4x8xbf16, #tpu.memory_space<vmem>>, %arg3: memref<9x8x8xbf16, #tpu.memory_space<vmem>>, %arg4: memref<1x8x64xf32, #tpu.memory_space<vmem>>, %arg5: memref<10x10x4xbf16, #tpu.memory_space<vmem>>, %arg6: memref<10x10x8xbf16, #tpu.memory_space<vmem>>) attributes {dimension_semantics = [#tpu.dimension_semantics<parallel>], iteration_bounds = array<i64: 2>, scalar_prefetch = 0 : i64, scratch_operands = 2 : i64, tpu.core_type = #tpu.core_type<tc>, window_params = [{transform_indices = @transform_0, window_bounds = array<i64: 1, 16, 16, 4>}, {pipeline_mode = #tpu.pipeline_mode<synchronous>, transform_indices = @transform_1, window_bounds = array<i64: 9, 4, 8>}, {pipeline_mode = #tpu.pipeline_mode<synchronous>, transform_indices = @transform_2, window_bounds = array<i64: 9, 8, 8>}, {transform_indices = @transform_3, window_bounds = array<i64: 1, 8, 64>}]} {
    %cst = arith.constant 0.000000e+00 : bf16
    %0 = vector.broadcast %cst : bf16 to vector<1x10x4xbf16>
    %c0 = arith.constant 0 : index
    %c0_0 = arith.constant 0 : index
    %c0_1 = arith.constant 0 : index
    %1 = vector.load %arg5[%c0, %c0_0, %c0_1] : memref<10x10x4xbf16, #tpu.memory_space<vmem>>, vector<1x10x4xbf16>
    tpu.vector_store %arg5[%c0, %c0_0, %c0_1], %0 {strides = array<i32>} : memref<10x10x4xbf16, #tpu.memory_space<vmem>>, vector<1x10x4xbf16>,
    %cst_2 = arith.constant 0.000000e+00 : bf16
    %2 = vector.broadcast %cst_2 : bf16 to vector<1x10x4xbf16>
    %c9 = arith.constant 9 : index
    %c0_3 = arith.constant 0 : index
    %c0_4 = arith.constant 0 : index
    %3 = vector.load %arg5[%c9, %c0_3, %c0_4] : memref<10x10x4xbf16, #tpu.memory_space<vmem>>, vector<1x10x4xbf16>
    tpu.vector_store %arg5[%c9, %c0_3, %c0_4], %2 {strides = array<i32>} : memref<10x10x4xbf16, #tpu.memory_space<vmem>>, vector<1x10x4xbf16>,
    %cst_5 = arith.constant 0.000000e+00 : bf16
    %4 = vector.broadcast %cst_5 : bf16 to vector<10x1x4xbf16>
    %c0_6 = arith.constant 0 : index
    %c0_7 = arith.constant 0 : index
    %c0_8 = arith.constant 0 : index
    %5 = vector.load %arg5[%c0_6, %c0_7, %c0_8] : memref<10x10x4xbf16, #tpu.memory_space<vmem>>, vector<10x1x4xbf16>
    tpu.vector_store %arg5[%c0_6, %c0_7, %c0_8], %4 {strides = array<i32>} : memref<10x10x4xbf16, #tpu.memory_space<vmem>>, vector<10x1x4xbf16>,
    %cst_9 = arith.constant 0.000000e+00 : bf16
    %6 = vector.broadcast %cst_9 : bf16 to vector<10x1x4xbf16>
    %c0_10 = arith.constant 0 : index
    %c9_11 = arith.constant 9 : index
    %c0_12 = arith.constant 0 : index
    %7 = vector.load %arg5[%c0_10, %c9_11, %c0_12] : memref<10x10x4xbf16, #tpu.memory_space<vmem>>, vector<10x1x4xbf16>
    tpu.vector_store %arg5[%c0_10, %c9_11, %c0_12], %6 {strides = array<i32>} : memref<10x10x4xbf16, #tpu.memory_space<vmem>>, vector<10x1x4xbf16>,
    %cst_13 = arith.constant 0.000000e+00 : bf16
    %8 = vector.broadcast %cst_13 : bf16 to vector<1x10x8xbf16>
    %c0_14 = arith.constant 0 : index
    %c0_15 = arith.constant 0 : index
    %c0_16 = arith.constant 0 : index
    %9 = vector.load %arg6[%c0_14, %c0_15, %c0_16] : memref<10x10x8xbf16, #tpu.memory_space<vmem>>, vector<1x10x8xbf16>
    tpu.vector_store %arg6[%c0_14, %c0_15, %c0_16], %8 {strides = array<i32>} : memref<10x10x8xbf16, #tpu.memory_space<vmem>>, vector<1x10x8xbf16>,
    %cst_17 = arith.constant 0.000000e+00 : bf16
    %10 = vector.broadcast %cst_17 : bf16 to vector<1x10x8xbf16>
    %c9_18 = arith.constant 9 : index
    %c0_19 = arith.constant 0 : index
    %c0_20 = arith.constant 0 : index
    %11 = vector.load %arg6[%c9_18, %c0_19, %c0_20] : memref<10x10x8xbf16, #tpu.memory_space<vmem>>, vector<1x10x8xbf16>
    tpu.vector_store %arg6[%c9_18, %c0_19, %c0_20], %10 {strides = array<i32>} : memref<10x10x8xbf16, #tpu.memory_space<vmem>>, vector<1x10x8xbf16>,
    %cst_21 = arith.constant 0.000000e+00 : bf16
    %12 = vector.broadcast %cst_21 : bf16 to vector<10x1x8xbf16>
    %c0_22 = arith.constant 0 : index
    %c0_23 = arith.constant 0 : index
    %c0_24 = arith.constant 0 : index
    %13 = vector.load %arg6[%c0_22, %c0_23, %c0_24] : memref<10x10x8xbf16, #tpu.memory_space<vmem>>, vector<10x1x8xbf16>
    tpu.vector_store %arg6[%c0_22, %c0_23, %c0_24], %12 {strides = array<i32>} : memref<10x10x8xbf16, #tpu.memory_space<vmem>>, vector<10x1x8xbf16>,
    %cst_25 = arith.constant 0.000000e+00 : bf16
    %14 = vector.broadcast %cst_25 : bf16 to vector<10x1x8xbf16>
    %c0_26 = arith.constant 0 : index
    %c9_27 = arith.constant 9 : index
    %c0_28 = arith.constant 0 : index
    %15 = vector.load %arg6[%c0_26, %c9_27, %c0_28] : memref<10x10x8xbf16, #tpu.memory_space<vmem>>, vector<10x1x8xbf16>
    tpu.vector_store %arg6[%c0_26, %c9_27, %c0_28], %14 {strides = array<i32>} : memref<10x10x8xbf16, #tpu.memory_space<vmem>>, vector<10x1x8xbf16>,
    %c0_29 = arith.constant 0 : index
    %c0_30 = arith.constant 0 : index
    %c0_31 = arith.constant 0 : index
    %c0_32 = arith.constant 0 : index
    %16 = vector.load %arg1[%c0_29, %c0_30, %c0_31, %c0_32] : memref<1x16x16x4xbf16, #tpu.memory_space<vmem>>, vector<1x16x16x4xbf16>
    %17 = vector.shape_cast %16 : vector<1x16x16x4xbf16> to vector<16x16x4xbf16>
    %18 = vector.shape_cast %17 : vector<16x16x4xbf16> to vector<16x8x2x4xbf16>
    %cst_33 = arith.constant dense<0xFF80> : vector<16x8x4xbf16>
    %19 = vector.multi_reduction <maximumf>, %18, %cst_33 [2] : vector<16x8x2x4xbf16> to vector<16x8x4xbf16>
    %20 = vector.shape_cast %19 : vector<16x8x4xbf16> to vector<8x2x8x4xbf16>
    %cst_34 = arith.constant dense<0xFF80> : vector<8x8x4xbf16>
    %21 = vector.multi_reduction <maximumf>, %20, %cst_34 [1] : vector<8x2x8x4xbf16> to vector<8x8x4xbf16>
    %c1 = arith.constant 1 : index
    %c1_35 = arith.constant 1 : index
    %c0_36 = arith.constant 0 : index
    %22 = vector.load %arg5[%c1, %c1_35, %c0_36] : memref<10x10x4xbf16, #tpu.memory_space<vmem>>, vector<8x8x4xbf16>
    tpu.vector_store %arg5[%c1, %c1_35, %c0_36], %21 {strides = array<i32>} : memref<10x10x4xbf16, #tpu.memory_space<vmem>>, vector<8x8x4xbf16>,
    %c0_37 = arith.constant 0 : index
    %c0_38 = arith.constant 0 : index
    %c0_39 = arith.constant 0 : index
    %23 = vector.load %arg5[%c0_37, %c0_38, %c0_39] : memref<10x10x4xbf16, #tpu.memory_space<vmem>>, vector<8x8x4xbf16>
    %24 = vector.shape_cast %23 : vector<8x8x4xbf16> to vector<64x4xbf16>
    %c0_40 = arith.constant 0 : index
    %c0_41 = arith.constant 0 : index
    %c0_42 = arith.constant 0 : index
    %25 = vector.load %arg2[%c0_40, %c0_41, %c0_42] : memref<9x4x8xbf16, #tpu.memory_space<vmem>>, vector<1x4x8xbf16>
    %26 = vector.shape_cast %25 : vector<1x4x8xbf16> to vector<4x8xbf16>
    %cst_43 = arith.constant dense<0.000000e+00> : vector<64x8xf32>
    %27 = tpu.matmul %24, %26, %cst_43 {dimension_numbers = #tpu.dot_dimension_numbers<[1], [0], [0], [1], [0, 0, 1, 1], [], []>} : vector<64x4xbf16>, vector<4x8xbf16>, vector<64x8xf32> -> vector<64x8xf32>
    %c0_44 = arith.constant 0 : index
    %c1_45 = arith.constant 1 : index
    %c0_46 = arith.constant 0 : index
    %28 = vector.load %arg5[%c0_44, %c1_45, %c0_46] : memref<10x10x4xbf16, #tpu.memory_space<vmem>>, vector<8x8x4xbf16>
    %29 = vector.shape_cast %28 : vector<8x8x4xbf16> to vector<64x4xbf16>
    %c1_47 = arith.constant 1 : index
    %c0_48 = arith.constant 0 : index
    %c0_49 = arith.constant 0 : index
    %30 = vector.load %arg2[%c1_47, %c0_48, %c0_49] : memref<9x4x8xbf16, #tpu.memory_space<vmem>>, vector<1x4x8xbf16>
    %31 = vector.shape_cast %30 : vector<1x4x8xbf16> to vector<4x8xbf16>
    %cst_50 = arith.constant dense<0.000000e+00> : vector<64x8xf32>
    %32 = tpu.matmul %29, %31, %cst_50 {dimension_numbers = #tpu.dot_dimension_numbers<[1], [0], [0], [1], [0, 0, 1, 1], [], []>} : vector<64x4xbf16>, vector<4x8xbf16>, vector<64x8xf32> -> vector<64x8xf32>
    %33 = arith.addf %27, %32 : vector<64x8xf32>
    %c0_51 = arith.constant 0 : index
    %c2 = arith.constant 2 : index
    %c0_52 = arith.constant 0 : index
    %34 = vector.load %arg5[%c0_51, %c2, %c0_52] : memref<10x10x4xbf16, #tpu.memory_space<vmem>>, vector<8x8x4xbf16>
    %35 = vector.shape_cast %34 : vector<8x8x4xbf16> to vector<64x4xbf16>
    %c2_53 = arith.constant 2 : index
    %c0_54 = arith.constant 0 : index
    %c0_55 = arith.constant 0 : index
    %36 = vector.load %arg2[%c2_53, %c0_54, %c0_55] : memref<9x4x8xbf16, #tpu.memory_space<vmem>>, vector<1x4x8xbf16>
    %37 = vector.shape_cast %36 : vector<1x4x8xbf16> to vector<4x8xbf16>
    %cst_56 = arith.constant dense<0.000000e+00> : vector<64x8xf32>
    %38 = tpu.matmul %35, %37, %cst_56 {dimension_numbers = #tpu.dot_dimension_numbers<[1], [0], [0], [1], [0, 0, 1, 1], [], []>} : vector<64x4xbf16>, vector<4x8xbf16>, vector<64x8xf32> -> vector<64x8xf32>
    %39 = arith.addf %33, %38 : vector<64x8xf32>
    %c1_57 = arith.constant 1 : index
    %c0_58 = arith.constant 0 : index
    %c0_59 = arith.constant 0 : index
    %40 = vector.load %arg5[%c1_57, %c0_58, %c0_59] : memref<10x10x4xbf16, #tpu.memory_space<vmem>>, vector<8x8x4xbf16>
    %41 = vector.shape_cast %40 : vector<8x8x4xbf16> to vector<64x4xbf16>
    %c3 = arith.constant 3 : index
    %c0_60 = arith.constant 0 : index
    %c0_61 = arith.constant 0 : index
    %42 = vector.load %arg2[%c3, %c0_60, %c0_61] : memref<9x4x8xbf16, #tpu.memory_space<vmem>>, vector<1x4x8xbf16>
    %43 = vector.shape_cast %42 : vector<1x4x8xbf16> to vector<4x8xbf16>
    %cst_62 = arith.constant dense<0.000000e+00> : vector<64x8xf32>
    %44 = tpu.matmul %41, %43, %cst_62 {dimension_numbers = #tpu.dot_dimension_numbers<[1], [0], [0], [1], [0, 0, 1, 1], [], []>} : vector<64x4xbf16>, vector<4x8xbf16>, vector<64x8xf32> -> vector<64x8xf32>
    %45 = arith.addf %39, %44 : vector<64x8xf32>
    %c1_63 = arith.constant 1 : index
    %c1_64 = arith.constant 1 : index
    %c0_65 = arith.constant 0 : index
    %46 = vector.load %arg5[%c1_63, %c1_64, %c0_65] : memref<10x10x4xbf16, #tpu.memory_space<vmem>>, vector<8x8x4xbf16>
    %47 = vector.shape_cast %46 : vector<8x8x4xbf16> to vector<64x4xbf16>
    %c4 = arith.constant 4 : index
    %c0_66 = arith.constant 0 : index
    %c0_67 = arith.constant 0 : index
    %48 = vector.load %arg2[%c4, %c0_66, %c0_67] : memref<9x4x8xbf16, #tpu.memory_space<vmem>>, vector<1x4x8xbf16>
    %49 = vector.shape_cast %48 : vector<1x4x8xbf16> to vector<4x8xbf16>
    %cst_68 = arith.constant dense<0.000000e+00> : vector<64x8xf32>
    %50 = tpu.matmul %47, %49, %cst_68 {dimension_numbers = #tpu.dot_dimension_numbers<[1], [0], [0], [1], [0, 0, 1, 1], [], []>} : vector<64x4xbf16>, vector<4x8xbf16>, vector<64x8xf32> -> vector<64x8xf32>
    %51 = arith.addf %45, %50 : vector<64x8xf32>
    %c1_69 = arith.constant 1 : index
    %c2_70 = arith.constant 2 : index
    %c0_71 = arith.constant 0 : index
    %52 = vector.load %arg5[%c1_69, %c2_70, %c0_71] : memref<10x10x4xbf16, #tpu.memory_space<vmem>>, vector<8x8x4xbf16>
    %53 = vector.shape_cast %52 : vector<8x8x4xbf16> to vector<64x4xbf16>
    %c5 = arith.constant 5 : index
    %c0_72 = arith.constant 0 : index
    %c0_73 = arith.constant 0 : index
    %54 = vector.load %arg2[%c5, %c0_72, %c0_73] : memref<9x4x8xbf16, #tpu.memory_space<vmem>>, vector<1x4x8xbf16>
    %55 = vector.shape_cast %54 : vector<1x4x8xbf16> to vector<4x8xbf16>
    %cst_74 = arith.constant dense<0.000000e+00> : vector<64x8xf32>
    %56 = tpu.matmul %53, %55, %cst_74 {dimension_numbers = #tpu.dot_dimension_numbers<[1], [0], [0], [1], [0, 0, 1, 1], [], []>} : vector<64x4xbf16>, vector<4x8xbf16>, vector<64x8xf32> -> vector<64x8xf32>
    %57 = arith.addf %51, %56 : vector<64x8xf32>
    %c2_75 = arith.constant 2 : index
    %c0_76 = arith.constant 0 : index
    %c0_77 = arith.constant 0 : index
    %58 = vector.load %arg5[%c2_75, %c0_76, %c0_77] : memref<10x10x4xbf16, #tpu.memory_space<vmem>>, vector<8x8x4xbf16>
    %59 = vector.shape_cast %58 : vector<8x8x4xbf16> to vector<64x4xbf16>
    %c6 = arith.constant 6 : index
    %c0_78 = arith.constant 0 : index
    %c0_79 = arith.constant 0 : index
    %60 = vector.load %arg2[%c6, %c0_78, %c0_79] : memref<9x4x8xbf16, #tpu.memory_space<vmem>>, vector<1x4x8xbf16>
    %61 = vector.shape_cast %60 : vector<1x4x8xbf16> to vector<4x8xbf16>
    %cst_80 = arith.constant dense<0.000000e+00> : vector<64x8xf32>
    %62 = tpu.matmul %59, %61, %cst_80 {dimension_numbers = #tpu.dot_dimension_numbers<[1], [0], [0], [1], [0, 0, 1, 1], [], []>} : vector<64x4xbf16>, vector<4x8xbf16>, vector<64x8xf32> -> vector<64x8xf32>
    %63 = arith.addf %57, %62 : vector<64x8xf32>
    %c2_81 = arith.constant 2 : index
    %c1_82 = arith.constant 1 : index
    %c0_83 = arith.constant 0 : index
    %64 = vector.load %arg5[%c2_81, %c1_82, %c0_83] : memref<10x10x4xbf16, #tpu.memory_space<vmem>>, vector<8x8x4xbf16>
    %65 = vector.shape_cast %64 : vector<8x8x4xbf16> to vector<64x4xbf16>
    %c7 = arith.constant 7 : index
    %c0_84 = arith.constant 0 : index
    %c0_85 = arith.constant 0 : index
    %66 = vector.load %arg2[%c7, %c0_84, %c0_85] : memref<9x4x8xbf16, #tpu.memory_space<vmem>>, vector<1x4x8xbf16>
    %67 = vector.shape_cast %66 : vector<1x4x8xbf16> to vector<4x8xbf16>
    %cst_86 = arith.constant dense<0.000000e+00> : vector<64x8xf32>
    %68 = tpu.matmul %65, %67, %cst_86 {dimension_numbers = #tpu.dot_dimension_numbers<[1], [0], [0], [1], [0, 0, 1, 1], [], []>} : vector<64x4xbf16>, vector<4x8xbf16>, vector<64x8xf32> -> vector<64x8xf32>
    %69 = arith.addf %63, %68 : vector<64x8xf32>
    %c2_87 = arith.constant 2 : index
    %c2_88 = arith.constant 2 : index
    %c0_89 = arith.constant 0 : index
    %70 = vector.load %arg5[%c2_87, %c2_88, %c0_89] : memref<10x10x4xbf16, #tpu.memory_space<vmem>>, vector<8x8x4xbf16>
    %71 = vector.shape_cast %70 : vector<8x8x4xbf16> to vector<64x4xbf16>
    %c8 = arith.constant 8 : index
    %c0_90 = arith.constant 0 : index
    %c0_91 = arith.constant 0 : index
    %72 = vector.load %arg2[%c8, %c0_90, %c0_91] : memref<9x4x8xbf16, #tpu.memory_space<vmem>>, vector<1x4x8xbf16>
    %73 = vector.shape_cast %72 : vector<1x4x8xbf16> to vector<4x8xbf16>
    %cst_92 = arith.constant dense<0.000000e+00> : vector<64x8xf32>
    %74 = tpu.matmul %71, %73, %cst_92 {dimension_numbers = #tpu.dot_dimension_numbers<[1], [0], [0], [1], [0, 0, 1, 1], [], []>} : vector<64x4xbf16>, vector<4x8xbf16>, vector<64x8xf32> -> vector<64x8xf32>
    %75 = arith.addf %69, %74 : vector<64x8xf32>
    %cst_93 = arith.constant 0.000000e+00 : f32
    %76 = vector.broadcast %cst_93 : f32 to vector<64x8xf32>
    %77 = arith.maximumf %75, %76 : vector<64x8xf32>
    %78 = arith.truncf %77 : vector<64x8xf32> to vector<64x8xbf16>
    %79 = vector.shape_cast %78 : vector<64x8xbf16> to vector<8x8x8xbf16>
    %c1_94 = arith.constant 1 : index
    %c1_95 = arith.constant 1 : index
    %c0_96 = arith.constant 0 : index
    %80 = vector.load %arg6[%c1_94, %c1_95, %c0_96] : memref<10x10x8xbf16, #tpu.memory_space<vmem>>, vector<8x8x8xbf16>
    tpu.vector_store %arg6[%c1_94, %c1_95, %c0_96], %79 {strides = array<i32>} : memref<10x10x8xbf16, #tpu.memory_space<vmem>>, vector<8x8x8xbf16>,
    %c0_97 = arith.constant 0 : index
    %c0_98 = arith.constant 0 : index
    %c0_99 = arith.constant 0 : index
    %81 = vector.load %arg6[%c0_97, %c0_98, %c0_99] : memref<10x10x8xbf16, #tpu.memory_space<vmem>>, vector<8x8x8xbf16>
    %82 = vector.shape_cast %81 : vector<8x8x8xbf16> to vector<64x8xbf16>
    %c0_100 = arith.constant 0 : index
    %c0_101 = arith.constant 0 : index
    %c0_102 = arith.constant 0 : index
    %83 = vector.load %arg3[%c0_100, %c0_101, %c0_102] : memref<9x8x8xbf16, #tpu.memory_space<vmem>>, vector<1x8x8xbf16>
    %84 = vector.shape_cast %83 : vector<1x8x8xbf16> to vector<8x8xbf16>
    %cst_103 = arith.constant dense<0.000000e+00> : vector<8x64xf32>
    %85 = tpu.matmul %84, %82, %cst_103 {dimension_numbers = #tpu.dot_dimension_numbers<[1], [1], [0], [0], [0, 0, 1, 0], [], []>} : vector<8x8xbf16>, vector<64x8xbf16>, vector<8x64xf32> -> vector<8x64xf32>
    %c0_104 = arith.constant 0 : index
    %c1_105 = arith.constant 1 : index
    %c0_106 = arith.constant 0 : index
    %86 = vector.load %arg6[%c0_104, %c1_105, %c0_106] : memref<10x10x8xbf16, #tpu.memory_space<vmem>>, vector<8x8x8xbf16>
    %87 = vector.shape_cast %86 : vector<8x8x8xbf16> to vector<64x8xbf16>
    %c1_107 = arith.constant 1 : index
    %c0_108 = arith.constant 0 : index
    %c0_109 = arith.constant 0 : index
    %88 = vector.load %arg3[%c1_107, %c0_108, %c0_109] : memref<9x8x8xbf16, #tpu.memory_space<vmem>>, vector<1x8x8xbf16>
    %89 = vector.shape_cast %88 : vector<1x8x8xbf16> to vector<8x8xbf16>
    %cst_110 = arith.constant dense<0.000000e+00> : vector<8x64xf32>
    %90 = tpu.matmul %89, %87, %cst_110 {dimension_numbers = #tpu.dot_dimension_numbers<[1], [1], [0], [0], [0, 0, 1, 0], [], []>} : vector<8x8xbf16>, vector<64x8xbf16>, vector<8x64xf32> -> vector<8x64xf32>
    %91 = arith.addf %85, %90 : vector<8x64xf32>
    %c0_111 = arith.constant 0 : index
    %c2_112 = arith.constant 2 : index
    %c0_113 = arith.constant 0 : index
    %92 = vector.load %arg6[%c0_111, %c2_112, %c0_113] : memref<10x10x8xbf16, #tpu.memory_space<vmem>>, vector<8x8x8xbf16>
    %93 = vector.shape_cast %92 : vector<8x8x8xbf16> to vector<64x8xbf16>
    %c2_114 = arith.constant 2 : index
    %c0_115 = arith.constant 0 : index
    %c0_116 = arith.constant 0 : index
    %94 = vector.load %arg3[%c2_114, %c0_115, %c0_116] : memref<9x8x8xbf16, #tpu.memory_space<vmem>>, vector<1x8x8xbf16>
    %95 = vector.shape_cast %94 : vector<1x8x8xbf16> to vector<8x8xbf16>
    %cst_117 = arith.constant dense<0.000000e+00> : vector<8x64xf32>
    %96 = tpu.matmul %95, %93, %cst_117 {dimension_numbers = #tpu.dot_dimension_numbers<[1], [1], [0], [0], [0, 0, 1, 0], [], []>} : vector<8x8xbf16>, vector<64x8xbf16>, vector<8x64xf32> -> vector<8x64xf32>
    %97 = arith.addf %91, %96 : vector<8x64xf32>
    %c1_118 = arith.constant 1 : index
    %c0_119 = arith.constant 0 : index
    %c0_120 = arith.constant 0 : index
    %98 = vector.load %arg6[%c1_118, %c0_119, %c0_120] : memref<10x10x8xbf16, #tpu.memory_space<vmem>>, vector<8x8x8xbf16>
    %99 = vector.shape_cast %98 : vector<8x8x8xbf16> to vector<64x8xbf16>
    %c3_121 = arith.constant 3 : index
    %c0_122 = arith.constant 0 : index
    %c0_123 = arith.constant 0 : index
    %100 = vector.load %arg3[%c3_121, %c0_122, %c0_123] : memref<9x8x8xbf16, #tpu.memory_space<vmem>>, vector<1x8x8xbf16>
    %101 = vector.shape_cast %100 : vector<1x8x8xbf16> to vector<8x8xbf16>
    %cst_124 = arith.constant dense<0.000000e+00> : vector<8x64xf32>
    %102 = tpu.matmul %101, %99, %cst_124 {dimension_numbers = #tpu.dot_dimension_numbers<[1], [1], [0], [0], [0, 0, 1, 0], [], []>} : vector<8x8xbf16>, vector<64x8xbf16>, vector<8x64xf32> -> vector<8x64xf32>
    %103 = arith.addf %97, %102 : vector<8x64xf32>
    %c1_125 = arith.constant 1 : index
    %c1_126 = arith.constant 1 : index
    %c0_127 = arith.constant 0 : index
    %104 = vector.load %arg6[%c1_125, %c1_126, %c0_127] : memref<10x10x8xbf16, #tpu.memory_space<vmem>>, vector<8x8x8xbf16>
    %105 = vector.shape_cast %104 : vector<8x8x8xbf16> to vector<64x8xbf16>
    %c4_128 = arith.constant 4 : index
    %c0_129 = arith.constant 0 : index
    %c0_130 = arith.constant 0 : index
    %106 = vector.load %arg3[%c4_128, %c0_129, %c0_130] : memref<9x8x8xbf16, #tpu.memory_space<vmem>>, vector<1x8x8xbf16>
    %107 = vector.shape_cast %106 : vector<1x8x8xbf16> to vector<8x8xbf16>
    %cst_131 = arith.constant dense<0.000000e+00> : vector<8x64xf32>
    %108 = tpu.matmul %107, %105, %cst_131 {dimension_numbers = #tpu.dot_dimension_numbers<[1], [1], [0], [0], [0, 0, 1, 0], [], []>} : vector<8x8xbf16>, vector<64x8xbf16>, vector<8x64xf32> -> vector<8x64xf32>
    %109 = arith.addf %103, %108 : vector<8x64xf32>
    %c1_132 = arith.constant 1 : index
    %c2_133 = arith.constant 2 : index
    %c0_134 = arith.constant 0 : index
    %110 = vector.load %arg6[%c1_132, %c2_133, %c0_134] : memref<10x10x8xbf16, #tpu.memory_space<vmem>>, vector<8x8x8xbf16>
    %111 = vector.shape_cast %110 : vector<8x8x8xbf16> to vector<64x8xbf16>
    %c5_135 = arith.constant 5 : index
    %c0_136 = arith.constant 0 : index
    %c0_137 = arith.constant 0 : index
    %112 = vector.load %arg3[%c5_135, %c0_136, %c0_137] : memref<9x8x8xbf16, #tpu.memory_space<vmem>>, vector<1x8x8xbf16>
    %113 = vector.shape_cast %112 : vector<1x8x8xbf16> to vector<8x8xbf16>
    %cst_138 = arith.constant dense<0.000000e+00> : vector<8x64xf32>
    %114 = tpu.matmul %113, %111, %cst_138 {dimension_numbers = #tpu.dot_dimension_numbers<[1], [1], [0], [0], [0, 0, 1, 0], [], []>} : vector<8x8xbf16>, vector<64x8xbf16>, vector<8x64xf32> -> vector<8x64xf32>
    %115 = arith.addf %109, %114 : vector<8x64xf32>
    %c2_139 = arith.constant 2 : index
    %c0_140 = arith.constant 0 : index
    %c0_141 = arith.constant 0 : index
    %116 = vector.load %arg6[%c2_139, %c0_140, %c0_141] : memref<10x10x8xbf16, #tpu.memory_space<vmem>>, vector<8x8x8xbf16>
    %117 = vector.shape_cast %116 : vector<8x8x8xbf16> to vector<64x8xbf16>
    %c6_142 = arith.constant 6 : index
    %c0_143 = arith.constant 0 : index
    %c0_144 = arith.constant 0 : index
    %118 = vector.load %arg3[%c6_142, %c0_143, %c0_144] : memref<9x8x8xbf16, #tpu.memory_space<vmem>>, vector<1x8x8xbf16>
    %119 = vector.shape_cast %118 : vector<1x8x8xbf16> to vector<8x8xbf16>
    %cst_145 = arith.constant dense<0.000000e+00> : vector<8x64xf32>
    %120 = tpu.matmul %119, %117, %cst_145 {dimension_numbers = #tpu.dot_dimension_numbers<[1], [1], [0], [0], [0, 0, 1, 0], [], []>} : vector<8x8xbf16>, vector<64x8xbf16>, vector<8x64xf32> -> vector<8x64xf32>
    %121 = arith.addf %115, %120 : vector<8x64xf32>
    %c2_146 = arith.constant 2 : index
    %c1_147 = arith.constant 1 : index
    %c0_148 = arith.constant 0 : index
    %122 = vector.load %arg6[%c2_146, %c1_147, %c0_148] : memref<10x10x8xbf16, #tpu.memory_space<vmem>>, vector<8x8x8xbf16>
    %123 = vector.shape_cast %122 : vector<8x8x8xbf16> to vector<64x8xbf16>
    %c7_149 = arith.constant 7 : index
    %c0_150 = arith.constant 0 : index
    %c0_151 = arith.constant 0 : index
    %124 = vector.load %arg3[%c7_149, %c0_150, %c0_151] : memref<9x8x8xbf16, #tpu.memory_space<vmem>>, vector<1x8x8xbf16>
    %125 = vector.shape_cast %124 : vector<1x8x8xbf16> to vector<8x8xbf16>
    %cst_152 = arith.constant dense<0.000000e+00> : vector<8x64xf32>
    %126 = tpu.matmul %125, %123, %cst_152 {dimension_numbers = #tpu.dot_dimension_numbers<[1], [1], [0], [0], [0, 0, 1, 0], [], []>} : vector<8x8xbf16>, vector<64x8xbf16>, vector<8x64xf32> -> vector<8x64xf32>
    %127 = arith.addf %121, %126 : vector<8x64xf32>
    %c2_153 = arith.constant 2 : index
    %c2_154 = arith.constant 2 : index
    %c0_155 = arith.constant 0 : index
    %128 = vector.load %arg6[%c2_153, %c2_154, %c0_155] : memref<10x10x8xbf16, #tpu.memory_space<vmem>>, vector<8x8x8xbf16>
    %129 = vector.shape_cast %128 : vector<8x8x8xbf16> to vector<64x8xbf16>
    %c8_156 = arith.constant 8 : index
    %c0_157 = arith.constant 0 : index
    %c0_158 = arith.constant 0 : index
    %130 = vector.load %arg3[%c8_156, %c0_157, %c0_158] : memref<9x8x8xbf16, #tpu.memory_space<vmem>>, vector<1x8x8xbf16>
    %131 = vector.shape_cast %130 : vector<1x8x8xbf16> to vector<8x8xbf16>
    %cst_159 = arith.constant dense<0.000000e+00> : vector<8x64xf32>
    %132 = tpu.matmul %131, %129, %cst_159 {dimension_numbers = #tpu.dot_dimension_numbers<[1], [1], [0], [0], [0, 0, 1, 0], [], []>} : vector<8x8xbf16>, vector<64x8xbf16>, vector<8x64xf32> -> vector<8x64xf32>
    %133 = arith.addf %127, %132 : vector<8x64xf32>
    %cst_160 = arith.constant 0.000000e+00 : f32
    %134 = vector.broadcast %cst_160 : f32 to vector<8x64xf32>
    %135 = arith.maximumf %133, %134 : vector<8x64xf32>
    %c0_161 = arith.constant 0 : index
    %c0_162 = arith.constant 0 : index
    %c0_163 = arith.constant 0 : index
    %136 = vector.load %arg4[%c0_161, %c0_162, %c0_163] : memref<1x8x64xf32, #tpu.memory_space<vmem>>, vector<1x8x64xf32>
    %137 = vector.shape_cast %136 : vector<1x8x64xf32> to vector<8x64xf32>
    %138 = vector.shape_cast %135 : vector<8x64xf32> to vector<1x8x64xf32>
    tpu.vector_store %arg4[%c0_161, %c0_162, %c0_163], %138 {strides = array<i32>} : memref<1x8x64xf32, #tpu.memory_space<vmem>>, vector<1x8x64xf32>,
    return
  }
  func.func @transform_0(%arg0: i32) -> (i32, i32, i32, i32) {
    %c0_i32 = arith.constant 0 : i32
    %c0_i32_0 = arith.constant 0 : i32
    %c0_i32_1 = arith.constant 0 : i32
    %c0_i32_2 = arith.constant 0 : i32
    return %arg0, %c0_i32, %c0_i32_0, %c0_i32_1 : i32, i32, i32, i32
  }
  func.func @transform_1(%arg0: i32) -> (i32, i32, i32) {
    %c0_i32 = arith.constant 0 : i32
    %c0_i32_0 = arith.constant 0 : i32
    %c0_i32_1 = arith.constant 0 : i32
    %c0_i32_2 = arith.constant 0 : i32
    return %c0_i32, %c0_i32_0, %c0_i32_1 : i32, i32, i32
  }
  func.func @transform_2(%arg0: i32) -> (i32, i32, i32) {
    %c0_i32 = arith.constant 0 : i32
    %c0_i32_0 = arith.constant 0 : i32
    %c0_i32_1 = arith.constant 0 : i32
    %c0_i32_2 = arith.constant 0 : i32
    return %c0_i32, %c0_i32_0, %c0_i32_1 : i32, i32, i32
  }
  func.func @transform_3(%arg0: i32) -> (i32, i32, i32) {
    %c0_i32 = arith.constant 0 : i32
    %c0_i32_0 = arith.constant 0 : i32
    %c0_i32_1 = arith.constant 0 : i32
    return %arg0, %c0_i32, %c0_i32_0 : i32, i32, i32
  }
}

</mosaic_0001>

<bundles_post_ra>
// kernel: tpu_custom_call.1
= control target key start
LH: loop header
LB: loop body
LE: loop exit
PB: predicated region body
PF: predicated region fallthrough
CT: control target
= control target key end

     0   :  { %8 = vsyncpa [#allocation5], 0  ;;  %s10034_s0 = inlined_call_operand.vmem [shape: bf16[2,16,16,4], index: 0, kind: input, shape index: {}]   ;;  %s10035_s1 = inlined_call_operand.vmem [shape: bf16[9,4,8], index: 1, kind: input, shape index: {}]   ;;  %s10036_s2 = inlined_call_operand.vmem [shape: bf16[9,8,8], index: 2, kind: input, shape index: {}]   ;;  %s10037_s3 = inlined_call_operand.hbm [shape: f32[2,8,64], index: 3, kind: output, shape index: {}]  }
   0x1   :  { %10 = vsyncpa [#allocation5 + $0x1], 0  ;;  %s7488_s12 = smov 0   ;;  %s7490_s13 = smov 0  }
   0x2   :  { %s7492_s14 = smov 0   ;;  %s7494_s15 = smov 0  }
   0x3 LB: > { %s7509_s16 = sadd.s32 4294967295, %s7461_s15   ;;  %s6613_s17 = sadd.s32 4294967294, %s7461_s15   ;;  %s7461_s15 = sphi %s7494_s15, %s10142_s15   ;;  %s7457_s14 = sphi %s7492_s14, %s10141_s14   ;;  %s7453_s13 = sphi %s7490_s13, %s10140_s13   ;;  %s7449_s12 = sphi %s7488_s12, %s10139_s12  }
   0x4   : > { %s7513_s18 = sadd.s32 1, %s7461_s15   ;;  %s91_s19 = sadd.s32 1, %s7457_s14 }
   0x5   : > { %s88_s20 = ssub.s32 %s7461_s15, %s7513_s18  ;;  %p101_p0 = scmp.ne.s32.totalorder %s7457_s14, %s7453_s13 }
   0x6   : > { %p89_p1 = scmp.eq.s32.totalorder %s88_s20, 0  ;;  %p102_p2 = scmp.eq.s32.totalorder %s7509_s16, 1 }
   0x7   : > { %p107_p3 = scmp.ne.s32.totalorder %s7453_s13, %s7449_s12  ;;  %p108_p4 = scmp.eq.s32.totalorder %s6613_s17, 1 }
   0x8   : > { %s7524_s21 = scalar_select %p89_p1, %s7457_s14, %s91_s19  }
   0x9   : > { %p7526_p5 = por %p102_p2, %p101_p0  ;;  %p7530_p6 = por %p108_p4, %p107_p3 }
   0xa   : > { %p6616_p7 = scmp.ge.s32.totalorder %s7461_s15, 1  ;;  %p140_p8 = scmp.lt.s32.totalorder %s7461_s15, 3 }
   0xc   : > { %p141_p9 = pnand %p6616_p7, %p140_p8 }
   0xd   : > { %v6724_v0 = vld [vmem:[%s10035_s1 + $0x2] sm:$0x3] (!%p141_p9)  ;;  %vm3810_vm0 = vcmask (!%p141_p9), 1041408   ;;  %p164_p10 = scmp.lt.s32.totalorder (!%p141_p9), %s7509_s16, 1  ;;  %vm171_vm1 = vcmask (!%p141_p9), 27648   ;;  %v388_v1 = vlaneseq (!%p141_p9)  ;;  %v10039_v3 = vmov (!%p141_p9), 0  }
   0xe   : > { %144 = sbr.rel (%p141_p9) target bundleno = 1345 (0x541), region = 32  ;;  %7315 = vmatprep.subr.msk.bf16.mxu0 (!%p141_p9), %vm3810_vm0, %v6724_v0  ;;  %v3812_v2 = vsel (!%p141_p9), %vm3810_vm0, %v6724_v0, 0  ;;  %172 = vst.msk [vmem:[#allocation2] sm:$0xf] (!%p141_p9), %vm171_vm1, %v10039_v3  ;;  %vm173_vm2 = vcmask (!%p141_p9), 24576   ;;  %vm2810_vm7 = vcmask (!%p141_p9), 31744  }
   0xf   : > { %vm10038_vm3 = vsmask.f32 (!%p141_p9), 256  ;;  %v184_v4 = vld [vmem:[#allocation2 + $0x8] sm:$0x1] (!%p141_p9)  ;;  %176 = vst.msk [vmem:[#allocation2 + $0x48] sm:$0xf] (!%p141_p9), %vm171_vm1, %v10039_v3  ;;  %7025 = vmatpush3.bf16.msra.mxu0 (!%p141_p9), %v3812_v2 }
  0x10   : > { %174 = vst.msk [vmem:[#allocation2 + $0x4] sm:$0x1] (!%p141_p9), %vm173_vm2, %v10039_v3  ;;  %vm7551_vm4 = vmand (!%p141_p9), %vm173_vm2, %vm10038_vm3  ;;  %vm10041_vm5 = vsmask.f32 (!%p141_p9), 7938  ;;  %v216_v6 = vld [vmem:[#allocation2 + $0xc] sm:$0x1] (!%p141_p9) }
  0x11   : > { %177 = vst.msk [vmem:[#allocation2 + $0x4c] sm:$0x1] (!%p141_p9), %vm173_vm2, %v10039_v3  ;;  %v185_v7 = vsel (!%p141_p9), %vm7551_vm4, 0, %v184_v4  ;;  %vm7561_vm6 = vmand (!%p141_p9), %vm173_vm2, %vm10041_vm5  ;;  %v7464_v10 = vmov (!%p141_p9), 1966171168   ;;  %v389_v12 = vshrl.u32 (!%p141_p9), %v388_v1, 7 }
  0x12   : > { %186 = vst [vmem:[#allocation2 + $0x8] sm:$0x1] (!%p141_p9), %v185_v7  ;;  %v217_v9 = vsel (!%p141_p9), %vm7561_vm6, 0, %v216_v6  ;;  %v386_v11 = vunpack.c.l.s4 (!%p141_p9), %v7464_v10  ;;  %v3660_v13 = vld [vmem:[%s10035_s1] sm:$0x3] (!%p141_p9)  ;;  %vm3515_vm8 = vcmask (!%p141_p9), 1042434   ;;  %vm7732_vm3 = vmand (!%p141_p9), %vm171_vm1, %vm10041_vm5 }
  0x13   : > { %218 = vst [vmem:[#allocation2 + $0xc] sm:$0x1] (!%p141_p9), %v217_v9  ;;  %7316 = vmatprep.subr.msk.bf16.mxu0 (!%p141_p9), %vm3810_vm0, %v3660_v13  ;;  %v187_v18 = vld [vmem:[#allocation2 + $0x10] sm:$0x1] (!%p141_p9)  ;;  %vm3517_vm9 = vcmask (!%p141_p9), 1043459   ;;  %vm3519_vm10 = vcmask (!%p141_p9), 1044484  }
  0x14   : > { %v387_v15 = vunpack.c.0.s8 (!%p141_p9), %v386_v11  ;;  %v188_v26 = vsel (!%p141_p9), %vm7551_vm4, 0, %v187_v18  ;;  %vm3521_vm11 = vcmask (!%p141_p9), 1045509   ;;  %vm3523_vm12 = vcmask (!%p141_p9), 1046534   ;;  %s161_s4 = sand.u32 (!%p141_p9), 1, %s7453_s13   ;;  %s6914_s6 = sshll.u32 (!%p141_p9), %s7509_s16, 7 }
  0x15   : > { %s165_s26 = scalar_select %p164_p10, %s7509_s16, 1  ;;  %v181_v19 = vld [vmem:[#allocation2] sm:$0x1]  ;;  %189 = vst [vmem:[#allocation2 + $0x10] sm:$0x1] %v188_v26  ;;  %vm3525_vm13 = vcmask 1047559  }
  0x16   : > { %v7579_v21 = vsub.s32 %v387_v15, %v389_v12  ;;  %v182_v23 = vsel %vm7551_vm4, 0, %v181_v19  ;;  %vm3669_vm14 = vsmask.f32 3328  ;;  %vm3670_vm15 = vsmask.f32 7440  ;;  %s9992_s11 = scalar_lea.hbm %s10037_s3, %s6914_s6  ;;  %s6541_s16 = scalar_lea.sflag [#allocation5], %s161_s4 }
  0x17   : > { %s6917_s27 = sshll.u32 %s165_s26, 7  ;;  %v213_v24 = vld [vmem:[#allocation2 + $0x4] sm:$0x1]  ;;  %183 = vst [vmem:[#allocation2] sm:$0x1] %v182_v23  ;;  %vm7744_vm1 = vmor %vm3669_vm14, %vm3670_vm15  ;;  %vm4003_vm14 = vcmask 1042432  }
  0x18   : > { %s7573_s5 = scalar_lea.vmem %s10034_s0, %s6917_s27  ;;  %v214_v27 = vsel %vm7561_vm6, 0, %v213_v24  ;;  %vm4004_vm15 = vcmask 1046532   ;;  %s7467_s19 = smov [#allocation4]  }
  0x19   : > { %v6620_v14 = vld.sshfl [vmem:[%s7573_s5] sm:$0x33 pattern:$0x75316420]  ;;  %215 = vst [vmem:[#allocation2 + $0x4] sm:$0x1] %v214_v27  ;;  %vm9075_vm5 = vmor %vm4003_vm14, %vm4004_vm15 }
  0x1a   : > { %v6621_v16 = vld.sshfl [vmem:[%s7573_s5 + $0x4] sm:$0x33 pattern:$0x75316420]  ;;  %v384_v17 = vcombine.high %v6620_v14, %v6620_v14  ;;  %v391_v29 = vrot.slane %v6620_v14, %v7579_v21  ;;  %s7403_s20 = sshll.u32 %s7467_s19, 4  ;;  %s7404_s20 = int_to_ptr.vmem [resolvable:$false] %s7403_s20 }
  0x1b   : > { %v6622_v20 = vld.sshfl [vmem:[%s7573_s5 + $0x8] sm:$0x33 pattern:$0x75316420]  ;;  %v408_v22 = vcombine.high %v6621_v16, %v6621_v16  ;;  %v415_v31 = vrot.slane %v6621_v16, %v7579_v21  ;;  %s7405_s24 = scalar_lea.vmem %s7404_s20, 256 }
  0x1c   : > { %v432_v25 = vcombine.high %v6622_v20, %v6622_v20  ;;  %v6623_v28 = vld.sshfl [vmem:[%s7573_s5 + $0xc] sm:$0x33 pattern:$0x75316420]  ;;  %v398_v30 = vrot.slane %v384_v17, %v7579_v21  ;;  %v7593_v33 = vrot.slane %v6622_v20, %v7579_v21  ;;  %v399_v36 = vcombine.high %v391_v29, %v391_v29 }
  0x1d   : > { %v422_v32 = vrot.slane %v408_v22, %v7579_v21  ;;  %v456_v35 = vcombine.high %v6623_v28, %v6623_v28  ;;  %v423_v38 = vcombine.high %v415_v31, %v415_v31  ;;  %v7599_v39 = vrot.slane %v6623_v28, %v7579_v21 }
  0x1e   : > { %v7596_v34 = vrot.slane %v432_v25, %v7579_v21  ;;  %v400_v37 = vcombine.high %v398_v30, %v398_v30  ;;  %v447_v41 = vcombine.high %v7593_v33, %v7593_v33  ;;  %v1147_v45 = vsel %vm173_vm2, %v391_v29, 4286644096 }
  0x1f   : > { %v424_v40 = vcombine.high %v422_v32, %v422_v32  ;;  %v7606_v43 = vrot.slane %v456_v35, %v7579_v21  ;;  %v471_v44 = vcombine.high %v7599_v39, %v7599_v39  ;;  %v1160_v46 = vsel %vm173_vm2, %v398_v30, 4286644096 }
  0x20   : > { %v448_v42 = vcombine.high %v7596_v34, %v7596_v34  ;;  %v1173_v47 = vsel %vm173_vm2, %v399_v36, 4286644096  ;;  %v1149_v49 = vunpack.i.l.bf16 %v1147_v45  ;;  %v1150_v50 = vunpack.i.h.bf16 %v1147_v45 }
  0x21   : > { %v472_v48 = vcombine.high %v7606_v43, %v7606_v43  ;;  %v1162_v51 = vunpack.i.l.bf16 %v1160_v46  ;;  %v1163_v52 = vunpack.i.h.bf16 %v1160_v46  ;;  %v1175_v53 = vunpack.i.l.bf16 %v1173_v47 }
  0x22   : > { %v1176_v54 = vunpack.i.h.bf16 %v1173_v47  ;;  %v1186_v55 = vsel %vm173_vm2, %v400_v37, 4286644096  ;;  %v1151_v56 = vmax.f32 %v1149_v49, %v1150_v50  ;;  %v1199_v59 = vsel %vm173_vm2, %v415_v31, 4286644096 }
  0x23   : > { %v1188_v57 = vunpack.i.l.bf16 %v1186_v55  ;;  %v1189_v58 = vunpack.i.h.bf16 %v1186_v55  ;;  %v1164_v60 = vmax.f32 %v1162_v51, %v1163_v52  ;;  %v1201_v62 = vunpack.i.l.bf16 %v1199_v59 }
  0x24   : > { %v1177_v61 = vmax.f32 %v1175_v53, %v1176_v54  ;;  %v1202_v63 = vunpack.i.h.bf16 %v1199_v59  ;;  %v1152_v0 = vrot.slane %v1151_v56, 4  ;;  %v1212_v2 = vsel %vm173_vm2, %v422_v32, 4286644096 }
  0x25   : > { %v1190_v1 = vmax.f32 %v1188_v57, %v1189_v58  ;;  %v1225_v4 = vsel %vm173_vm2, %v423_v38, 4286644096  ;;  %v1165_v6 = vrot.slane %v1164_v60, 4  ;;  %v1214_v10 = vunpack.i.l.bf16 %v1212_v2 }
  0x26   : > { %v1178_v7 = vrot.slane %v1177_v61, 4  ;;  %v1203_v9 = vmax.f32 %v1201_v62, %v1202_v63  ;;  %v1153_v11 = vmax.f32 %v1151_v56, %v1152_v0  ;;  %v1215_v13 = vunpack.i.h.bf16 %v1212_v2 }
  0x27   : > { %v1191_v12 = vrot.slane %v1190_v1, 4  ;;  %v1227_v14 = vunpack.i.l.bf16 %v1225_v4  ;;  %v1166_v15 = vmax.f32 %v1164_v60, %v1165_v6  ;;  %v1228_v18 = vunpack.i.h.bf16 %v1225_v4 }
  0x28   : > { %v1179_v16 = vmax.f32 %v1177_v61, %v1178_v7  ;;  %v1204_v17 = vrot.slane %v1203_v9, 4  ;;  %v1154_v19 = vrot.slane %v1153_v11, 2  ;;  %v1216_v22 = vmax.f32 %v1214_v10, %v1215_v13 }
  0x29   : > { %v1192_v20 = vmax.f32 %v1190_v1, %v1191_v12  ;;  %v1238_v23 = vsel %vm173_vm2, %v424_v40, 4286644096  ;;  %v1167_v24 = vrot.slane %v1166_v15, 2  ;;  %v1229_v27 = vmax.f32 %v1227_v14, %v1228_v18 }
  0x2a   : > { %v1180_v25 = vrot.slane %v1179_v16, 2  ;;  %v1205_v26 = vmax.f32 %v1203_v9, %v1204_v17  ;;  %v1155_v28 = vmax.f32 %v1153_v11, %v1154_v19  ;;  %v1217_v30 = vrot.slane %v1216_v22, 4 }
  0x2b   : > { %v1193_v29 = vrot.slane %v1192_v20, 2  ;;  %v1240_v31 = vunpack.i.l.bf16 %v1238_v23  ;;  %v1168_v32 = vmax.f32 %v1166_v15, %v1167_v24  ;;  %v1230_v37 = vrot.slane %v1229_v27, 4 }
  0x2c   : > { %v1181_v35 = vmax.f32 %v1179_v16, %v1180_v25  ;;  %v1206_v36 = vrot.slane %v1205_v26, 2  ;;  %v1156_v38 = vrot.slane %v1155_v28, 1  ;;  %v1218_v46 = vmax.f32 %v1216_v22, %v1217_v30 }
  0x2d   : > { %v1194_v45 = vmax.f32 %v1192_v20, %v1193_v29  ;;  %v1241_v47 = vunpack.i.h.bf16 %v1238_v23  ;;  %v1169_v49 = vrot.slane %v1168_v32, 1  ;;  %v1231_v40 = vmax.f32 %v1229_v27, %v1230_v37 }
  0x2e   : > { %v1182_v50 = vrot.slane %v1181_v35, 1  ;;  %v1207_v51 = vmax.f32 %v1205_v26, %v1206_v36  ;;  %v7620_v52 = vmax.f32 %v1155_v28, %v1156_v38  ;;  %v1219_v54 = vrot.slane %v1218_v46, 2 }
  0x2f   : > { %v1195_v53 = vrot.slane %v1194_v45, 1  ;;  %v1242_v55 = vmax.f32 %v1240_v31, %v1241_v47  ;;  %v7622_v56 = vmax.f32 %v1168_v32, %v1169_v49  ;;  %v1232_v59 = vrot.slane %v1231_v40, 2 }
  0x30   : > { %v7624_v57 = vmax.f32 %v1181_v35, %v1182_v50  ;;  %v1208_v58 = vrot.slane %v1207_v51, 1  ;;  %v1158_v60 = vpack.i.bf16 %v7620_v52, %v7620_v52  ;;  %v1220_v62 = vmax.f32 %v1218_v46, %v1219_v54 }
  0x31   : > { %v7628_v61 = vmax.f32 %v1194_v45, %v1195_v53  ;;  %v1243_v63 = vrot.slane %v1242_v55, 4  ;;  %v1171_v0 = vpack.i.bf16 %v7622_v56, %v7622_v56  ;;  %v1233_v4 = vmax.f32 %v1231_v40, %v1232_v59 }
  0x32   : > { %v1184_v1 = vpack.i.bf16 %v7624_v57, %v7624_v57  ;;  %v7634_v2 = vmax.f32 %v1207_v51, %v1208_v58  ;;  %v1221_v7 = vrot.slane %v1220_v62, 1  ;;  %v1251_v10 = vsel %vm173_vm2, %v7593_v33, 4286644096 }
  0x33   : > { %v1197_v6 = vpack.i.bf16 %v7628_v61, %v7628_v61  ;;  %v1244_v9 = vmax.f32 %v1242_v55, %v1243_v63  ;;  %v1234_v12 = vrot.slane %v1233_v4, 1  ;;  %v1253_v13 = vunpack.i.l.bf16 %v1251_v10 }
  0x34   : > { %v1210_v11 = vpack.i.bf16 %v7634_v2, %v7634_v2  ;;  %v1254_v14 = vunpack.i.h.bf16 %v1251_v10  ;;  %v7642_v15 = vmax.f32 %v1220_v62, %v1221_v7  ;;  %v1264_v17 = vsel %vm173_vm2, %v7596_v34, 4286644096 }
  0x35   : > { %v1245_v16 = vrot.slane %v1244_v9, 2  ;;  %v1277_v18 = vsel %vm173_vm2, %v447_v41, 4286644096  ;;  %v7650_v19 = vmax.f32 %v1233_v4, %v1234_v12  ;;  %v1266_v22 = vunpack.i.l.bf16 %v1264_v17 }
  0x36   : > { %v1255_v20 = vmax.f32 %v1253_v13, %v1254_v14  ;;  %v1267_v23 = vunpack.i.h.bf16 %v1264_v17  ;;  %v1223_v24 = vpack.i.bf16 %v7642_v15, %v7642_v15  ;;  %v1279_v26 = vunpack.i.l.bf16 %v1277_v18 }
  0x37   : > { %v1246_v25 = vmax.f32 %v1244_v9, %v1245_v16  ;;  %v1280_v27 = vunpack.i.h.bf16 %v1277_v18  ;;  %v1236_v28 = vpack.i.bf16 %v7650_v19, %v7650_v19  ;;  %v1290_v33 = vsel %vm173_vm2, %v448_v42, 4286644096 }
  0x38   : > { %v1256_v29 = vrot.slane %v1255_v20, 4  ;;  %v1268_v30 = vmax.f32 %v1266_v22, %v1267_v23  ;;  %v1292_v32 = vunpack.i.l.bf16 %v1290_v33  ;;  %v1293_v35 = vunpack.i.h.bf16 %v1290_v33 }
  0x39   : > { %v1247_v41 = vrot.slane %v1246_v25, 1  ;;  %v1281_v31 = vmax.f32 %v1279_v26, %v1280_v27  ;;  %v1303_v38 = vsel %vm173_vm2, %v7599_v39, 4286644096  ;;  %v1316_v45 = vsel %vm173_vm2, %v7606_v43, 4286644096 }
  0x3a   : > { %v1257_v36 = vmax.f32 %v1255_v20, %v1256_v29  ;;  %v1269_v37 = vrot.slane %v1268_v30, 4  ;;  %v1294_v49 = vmax.f32 %v1292_v32, %v1293_v35  ;;  %v1305_v50 = vunpack.i.l.bf16 %v1303_v38 }
  0x3b   : > { %v7664_v46 = vmax.f32 %v1246_v25, %v1247_v41  ;;  %v1282_v47 = vrot.slane %v1281_v31, 4  ;;  %v1306_v51 = vunpack.i.h.bf16 %v1303_v38  ;;  %v1318_v40 = vunpack.i.l.bf16 %v1316_v45 }
  0x3c   : > { %v1258_v34 = vrot.slane %v1257_v36, 2  ;;  %v1270_v42 = vmax.f32 %v1268_v30, %v1269_v37  ;;  %v1295_v55 = vrot.slane %v1294_v49, 4  ;;  %v1319_v58 = vunpack.i.h.bf16 %v1316_v45 }
  0x3d   : > { %v1249_v53 = vpack.i.bf16 %v7664_v46, %v7664_v46  ;;  %v1283_v54 = vmax.f32 %v1281_v31, %v1282_v47  ;;  %v1307_v63 = vmax.f32 %v1305_v50, %v1306_v51  ;;  %v1329_v4 = vsel %vm173_vm2, %v471_v44, 4286644096 }
  0x3e   : > { %v1259_v59 = vmax.f32 %v1257_v36, %v1258_v34  ;;  %v1271_v62 = vrot.slane %v1270_v42, 2  ;;  %v1296_v9 = vmax.f32 %v1294_v49, %v1295_v55  ;;  %v1320_v10 = vmax.f32 %v1318_v40, %v1319_v58 }
  0x3f   : > { %v1284_v7 = vrot.slane %v1283_v54, 2  ;;  %v1331_v12 = vunpack.i.l.bf16 %v1329_v4  ;;  %v1308_v16 = vrot.slane %v1307_v63, 4  ;;  %v1332_v17 = vunpack.i.h.bf16 %v1329_v4 }
  0x40   : > { %v1260_v13 = vrot.slane %v1259_v59, 1  ;;  %v1272_v14 = vmax.f32 %v1270_v42, %v1271_v62  ;;  %v1297_v20 = vrot.slane %v1296_v9, 2  ;;  %v1321_v22 = vrot.slane %v1320_v10, 4 }
  0x41   : > { %v1285_v18 = vmax.f32 %v1283_v54, %v1284_v7  ;;  %v1342_v23 = vsel %vm173_vm2, %v472_v48, 4286644096  ;;  %v1309_v26 = vmax.f32 %v1307_v63, %v1308_v16  ;;  %v1333_v44 = vmax.f32 %v1331_v12, %v1332_v17 }
  0x42   : > { %v1261_v25 = vmax.f32 %v1259_v59, %v1260_v13  ;;  %v1273_v39 = vrot.slane %v1272_v14, 1  ;;  %v1298_v29 = vmax.f32 %v1296_v9, %v1297_v20  ;;  %v1322_v30 = vmax.f32 %v1320_v10, %v1321_v22 }
  0x43   : > { %v1286_v27 = vrot.slane %v1285_v18, 1  ;;  %v1344_v33 = vunpack.i.l.bf16 %v1342_v23  ;;  %v1310_v32 = vrot.slane %v1309_v26, 2  ;;  %v1334_v35 = vrot.slane %v1333_v44, 4 }
  0x44   : > { %v1262_v41 = vpack.i.bf16 %v1261_v25, %v1261_v25  ;;  %v1274_v31 = vmax.f32 %v1272_v14, %v1273_v39  ;;  %v1299_v37 = vrot.slane %v1298_v29, 1  ;;  %v1323_v38 = vrot.slane %v1322_v30, 2 }
  0x45   : > { %v1287_v36 = vmax.f32 %v1285_v18, %v1286_v27  ;;  %v1345_v45 = vunpack.i.h.bf16 %v1342_v23  ;;  %v1311_v43 = vmax.f32 %v1309_v26, %v1310_v32  ;;  %v1335_v49 = vmax.f32 %v1333_v44, %v1334_v35 }
  0x46   : > { %v1275_v47 = vpack.i.bf16 %v1274_v31, %v1274_v31  ;;  %v2812_v48 = vsel %vm2810_vm7, %v1158_v60, 4286644096  ;;  %v1300_v34 = vmax.f32 %v1298_v29, %v1299_v37  ;;  %v1324_v42 = vmax.f32 %v1322_v30, %v1323_v38 }
  0x47   : > { %v1288_v50 = vpack.i.bf16 %v1287_v36, %v1287_v36  ;;  %v1346_v51 = vmax.f32 %v1344_v33, %v1345_v45  ;;  %v1312_v40 = vrot.slane %v1311_v43, 1  ;;  %v1336_v54 = vrot.slane %v1335_v49, 2  ;;  %v7715_v45 = vld [vmem:[#allocation2 + $0x4] sm:$0x1] }
  0x48   : > { %v2815_v55 = vsel %vm2810_vm7, %v1262_v41, 4286644096  ;;  %v2819_v58 = vsel %vm2810_vm7, %v1171_v0, 4286644096  ;;  %v1301_v59 = vpack.i.bf16 %v1300_v34, %v1300_v34  ;;  %v1325_v62 = vrot.slane %v1324_v42, 1 }
  0x49   : > { %v1347_v63 = vrot.slane %v1346_v51, 4  ;;  %v2817_v4 = vmax.bf16 %v2815_v55, %v2812_v48  ;;  %v1313_v52 = vmax.f32 %v1311_v43, %v1312_v40  ;;  %v1337_v7 = vmax.f32 %v1335_v49, %v1336_v54  ;;  %v3652_v41 = vld [vmem:[#allocation2] sm:$0xf]  ;;  %v190_v49 = vld [vmem:[#allocation2 + $0x18] sm:$0x1] }
  0x4a   : > { %v2822_v60 = vsel %vm2810_vm7, %v1275_v47, 4286644096  ;;  %v2826_v9 = vsel %vm2810_vm7, %v1184_v1, 4286644096  ;;  %v1326_v10 = vmax.f32 %v1324_v42, %v1325_v62  ;;  %v2829_v56 = vsel %vm2810_vm7, %v1288_v50, 4286644096 }
  0x4b   : > { %v1348_v12 = vmax.f32 %v1346_v51, %v1347_v63  ;;  %v2824_v13 = vmax.bf16 %v2822_v60, %v2819_v58  ;;  %v1314_v0 = vpack.i.bf16 %v1313_v52, %v1313_v52  ;;  %v1338_v14 = vrot.slane %v1337_v7, 1  ;;  %v219_v51 = vld [vmem:[#allocation2 + $0x14] sm:$0x1]  ;;  %v222_v40 = vld [vmem:[#allocation2 + $0x1c] sm:$0x1] }
  0x4c   : > { %v2831_v16 = vmax.bf16 %v2829_v56, %v2826_v9  ;;  %v2833_v17 = vsel %vm2810_vm7, %v1197_v6, 4286644096  ;;  %v1327_v18 = vpack.i.bf16 %v1326_v10, %v1326_v10  ;;  %v2836_v1 = vsel %vm2810_vm7, %v1301_v59, 4286644096  ;;  %v3607_v52 = vld [vmem:[#allocation2 + $0xc] sm:$0x1] }
  0x4d   : > { %v1349_v57 = vrot.slane %v1348_v12, 2  ;;  %v2840_v20 = vsel %vm2810_vm7, %v1210_v11, 4286644096  ;;  %v1339_v22 = vmax.f32 %v1337_v7, %v1338_v14  ;;  %v2838_v23 = vmax.bf16 %v2836_v1, %v2833_v17 }
  0x4e   : > { %v2843_v25 = vsel %vm2810_vm7, %v1314_v0, 4286644096  ;;  %v2847_v61 = vsel %vm2810_vm7, %v1223_v24, 4286644096  ;;  %v2850_v26 = vsel %vm2810_vm7, %v1327_v18, 4286644096  ;;  %v6652_v24 = vcombine.low %v2817_v4, %v2817_v4 }
  0x4f   : > { %v1350_v6 = vmax.f32 %v1348_v12, %v1349_v57  ;;  %v2845_v39 = vmax.bf16 %v2843_v25, %v2840_v20  ;;  %v2854_v2 = vsel %vm2810_vm7, %v1236_v28, 4286644096  ;;  %v1340_v11 = vpack.i.bf16 %v1339_v22, %v1339_v22  ;;  %v6624_v59 = vld.sshfl [vmem:[%s7573_s5 + $0x10] sm:$0x33 pattern:$0x75316420] }
  0x50   : > { %v2852_v44 = vmax.bf16 %v2850_v26, %v2847_v61  ;;  %v2861_v15 = vsel %vm2810_vm7, %v1249_v53, 4286644096  ;;  %v6653_v29 = vcombine.low %v2824_v13, %v2824_v13  ;;  %v6654_v30 = vcombine.low %v2831_v16, %v2831_v16  ;;  %v6625_v13 = vld.sshfl [vmem:[%s7573_s5 + $0x14] sm:$0x33 pattern:$0x75316420] }
  0x51   : > { %v1351_v27 = vrot.slane %v1350_v6, 1  ;;  %v6655_v33 = vcombine.low %v2838_v23, %v2838_v23  ;;  %v2857_v19 = vsel %vm2810_vm7, %v1340_v11, 4286644096  ;;  %v6656_v31 = vcombine.low %v2845_v39, %v2845_v39  ;;  %v3604_v20 = vld [vmem:[#allocation2 + $0x8] sm:$0xf] }
  0x52   : > { %v6657_v28 = vcombine.low %v2852_v44, %v2852_v44  ;;  %v3451_v32 = vunpack.c.l.b16 %v6652_v24  ;;  %v2859_v36 = vmax.bf16 %v2857_v19, %v2854_v2  ;;  %v3452_v37 = vunpack.c.l.b16 %v6653_v29  ;;  %v6626_v18 = vld.sshfl [vmem:[%s7573_s5 + $0x18] sm:$0x33 pattern:$0x75316420] }
  0x53   : > { %v1352_v35 = vmax.f32 %v1350_v6, %v1351_v27  ;;  %v3453_v38 = vunpack.c.l.b16 %v6654_v30  ;;  %v3454_v46 = vunpack.c.l.b16 %v6655_v33  ;;  %v3455_v53 = vunpack.c.l.b16 %v6656_v31  ;;  %v6627_v39 = vld.sshfl [vmem:[%s7573_s5 + $0x1c] sm:$0x33 pattern:$0x75316420] }
  0x54   : > { %v3456_v47 = vunpack.c.l.b16 %v6657_v28  ;;  %v3673_v43 = vshrl.u32 %v3652_v41, 16  ;;  %v6658_v50 = vcombine.low %v2859_v36, %v2859_v36  ;;  %v3516_v34 = vsel %vm3515_vm8, %v3452_v37, %v3451_v32  ;;  %v6628_v44 = vld.sshfl [vmem:[%s7573_s5 + $0x20] sm:$0x33 pattern:$0x75316420] }
  0x55   : > { %v1353_v48 = vpack.i.bf16 %v1352_v35, %v1352_v35  ;;  %v3676_v42 = vshll.u32 %v3652_v41, 16  ;;  %v3518_v54 = vsel %vm3517_vm9, %v3453_v38, %v3516_v34  ;;  %v3682_v58 = vshll.u32 %v7715_v45, 16  ;;  %v6629_v33 = vld.sshfl [vmem:[%s7573_s5 + $0x24] sm:$0x33 pattern:$0x75316420] }
  0x56   : > { %v3675_v55 = vrot.slane %v3673_v43, 4  ;;  %v3457_v63 = vunpack.c.l.b16 %v6658_v50  ;;  %v3520_v4 = vsel %vm3519_vm10, %v3454_v46, %v3518_v54  ;;  %v191_v12 = vsel %vm7551_vm4, 0, %v190_v49  ;;  %v6630_v35 = vld.sshfl [vmem:[%s7573_s5 + $0x28] sm:$0x33 pattern:$0x75316420] }
  0x57   : > { %v2864_v62 = vsel %vm2810_vm7, %v1353_v48, 4286644096  ;;  %v3678_v7 = vrot.slane %v3676_v42, 5  ;;  %v3522_v9 = vsel %vm3521_vm11, %v3455_v53, %v3520_v4  ;;  %v7724_v10 = vrot.slane %v3682_v58, 5  ;;  %192 = vst [vmem:[#allocation2 + $0x18] sm:$0x1] %v191_v12 }
  0x58   : > { %v2866_v60 = vmax.bf16 %v2864_v62, %v2861_v15  ;;  %v3524_v56 = vsel %vm3523_vm12, %v3456_v47, %v3522_v9  ;;  %v220_v16 = vsel %vm7561_vm6, 0, %v219_v51  ;;  %v223_v17 = vsel %vm7561_vm6, 0, %v222_v40  ;;  %v6631_v53 = vld.sshfl [vmem:[%s7573_s5 + $0x2c] sm:$0x33 pattern:$0x75316420] }
  0x59   : > { %v3679_v14 = vor.u32 %v3678_v7, %v3675_v55  ;;  %v3526_v57 = vsel %vm3525_vm13, %v3457_v63, %v3524_v56  ;;  %221 = vst [vmem:[#allocation2 + $0x14] sm:$0x1] %v220_v16  ;;  %224 = vst [vmem:[#allocation2 + $0x1c] sm:$0x1] %v223_v17  ;;  %v480_v23 = vcombine.high %v6624_v59, %v6624_v59 }
  0x5a   : > { %v6918_v1 = vcombine.low %v2866_v60, %v2866_v60  ;;  %v7749_v25 = vrot.slane %v6624_v59, %v7579_v21  ;;  %v3569_v61 = vpack.c.b16 %v3526_v57, %v3526_v57  ;;  %v504_v26 = vcombine.high %v6625_v13, %v6625_v13 }
  0x5b   : > { %v7751_v6 = vrot.slane %v3679_v14, 4  ;;  %v7755_v2 = vrot.slane %v6625_v13, %v7579_v21  ;;  %v494_v15 = vrot.slane %v480_v23, %v7579_v21  ;;  %v528_v24 = vcombine.high %v6626_v18, %v6626_v18 }
  0x5c   : > { %v3608_v11 = vsel %vm7551_vm4, %v6918_v1, %v3607_v52  ;;  %v3605_v27 = vsel %vm7732_vm3, %v3569_v61, %v3604_v20  ;;  %v495_v41 = vcombine.high %v7749_v25, %v7749_v25  ;;  %v7772_v19 = vrot.slane %v504_v26, %v7579_v21 }
  0x5d   : > { %3609 = vst [vmem:[#allocation2 + $0xc] sm:$0x1] %v3608_v11  ;;  %v3685_v29 = vsel %vm7744_vm1, %v7751_v6, %v7724_v10  ;;  %3606 = vst [vmem:[#allocation2 + $0x8] sm:$0xf] %v3605_v27  ;;  %v7775_v31 = vrot.slane %v6626_v18, %v7579_v21  ;;  %v7778_v28 = vrot.slane %v528_v24, %v7579_v21  ;;  %v1355_v12 = vsel %vm173_vm2, %v7749_v25, 4286644096 }
  0x5e   : > { %v552_v32 = vcombine.high %v6627_v39, %v6627_v39  ;;  %v519_v36 = vcombine.high %v7755_v2, %v7755_v2  ;;  %v7784_v37 = vrot.slane %v6627_v39, %v7579_v21  ;;  %v576_v38 = vcombine.high %v6628_v44, %v6628_v44 }
  0x5f   : > { %v7787_v46 = vrot.slane %v6628_v44, %v7579_v21  ;;  %v496_v47 = vcombine.high %v494_v15, %v494_v15  ;;  %v520_v43 = vcombine.high %v7772_v19, %v7772_v19  ;;  %v543_v49 = vcombine.high %v7775_v31, %v7775_v31 }
  0x60   : > { %v600_v48 = vcombine.high %v6629_v33, %v6629_v33  ;;  %v544_v50 = vcombine.high %v7778_v28, %v7778_v28  ;;  %v7797_v34 = vrot.slane %v552_v32, %v7579_v21  ;;  %v7800_v42 = vrot.slane %v576_v38, %v7579_v21 }
  0x61   : > { %v7803_v51 = vrot.slane %v6629_v33, %v7579_v21  ;;  %v567_v40 = vcombine.high %v7784_v37, %v7784_v37  ;;  %v591_v54 = vcombine.high %v7787_v46, %v7787_v46  ;;  %v624_v55 = vcombine.high %v6630_v35, %v6630_v35 }
  0x62   : > { %v7810_v58 = vrot.slane %v6630_v35, %v7579_v21  ;;  %v568_v59 = vcombine.high %v7797_v34, %v7797_v34  ;;  %v7815_v62 = vrot.slane %v600_v48, %v7579_v21  ;;  %v648_v63 = vcombine.high %v6631_v53, %v6631_v53 }
  0x63   : > { %v7818_v4 = vrot.slane %v6631_v53, %v7579_v21  ;;  %v592_v7 = vcombine.high %v7800_v42, %v7800_v42  ;;  %v615_v60 = vcombine.high %v7803_v51, %v7803_v51  ;;  %v7827_v9 = vrot.slane %v624_v55, %v7579_v21 }
  0x64   : > { %v7820_v52 = vld [vmem:[#allocation2 + $0xc] sm:$0x1]  ;;  %v3653_v13 = vld [vmem:[#allocation2 + $0x8] sm:$0xf]  ;;  %v616_v14 = vcombine.high %v7815_v62, %v7815_v62  ;;  %v639_v16 = vcombine.high %v7810_v58, %v7810_v58  ;;  %v7837_v17 = vrot.slane %v648_v63, %v7579_v21  ;;  %v1357_v20 = vunpack.i.l.bf16 %v1355_v12 }
  0x65   : > { %v3696_v56 = vshll.u32 %v7820_v52, 16  ;;  %v3687_v18 = vshrl.u32 %v3653_v13, 16  ;;  %v3690_v57 = vshll.u32 %v3653_v13, 16  ;;  %v663_v1 = vcombine.high %v7818_v4, %v7818_v4 }
  0x66   : > { %v640_v25 = vcombine.high %v7827_v9, %v7827_v9  ;;  %v1358_v61 = vunpack.i.h.bf16 %v1355_v12  ;;  %v1368_v39 = vsel %vm173_vm2, %v494_v15, 4286644096  ;;  %v1381_v33 = vsel %vm173_vm2, %v495_v41, 4286644096 }
  0x67   : > { %v3698_v23 = vrot.slane %v3696_v56, 5  ;;  %v3689_v26 = vrot.slane %v3687_v18, 4  ;;  %v3692_v11 = vrot.slane %v3690_v57, 5  ;;  %v1370_v44 = vunpack.i.l.bf16 %v1368_v39 }
  0x68   : > { %v1371_v24 = vunpack.i.h.bf16 %v1368_v39  ;;  %v1359_v27 = vmax.f32 %v1357_v20, %v1358_v61  ;;  %v1394_v32 = vsel %vm173_vm2, %v496_v47, 4286644096  ;;  %v1407_v35 = vsel %vm173_vm2, %v7755_v2, 4286644096 }
  0x69   : > { %v3693_v38 = vor.u32 %v3692_v11, %v3689_v26  ;;  %v1383_v48 = vunpack.i.l.bf16 %v1381_v33  ;;  %v1384_v55 = vunpack.i.h.bf16 %v1381_v33  ;;  %v1396_v12 = vunpack.i.l.bf16 %v1394_v32 }
  0x6a   : > { %v1372_v53 = vmax.f32 %v1370_v44, %v1371_v24  ;;  %v1360_v63 = vrot.slane %v1359_v27, 4  ;;  %v1397_v13 = vunpack.i.h.bf16 %v1394_v32  ;;  %v1409_v15 = vunpack.i.l.bf16 %v1407_v35 }
  0x6b   : > { %v3694_v56 = vrot.slane %v3693_v38, 4  ;;  %v1385_v57 = vmax.f32 %v1383_v48, %v1384_v55  ;;  %v1410_v39 = vunpack.i.h.bf16 %v1407_v35  ;;  %v1420_v41 = vsel %vm173_vm2, %v7772_v19, 4286644096 }
  0x6c   : > { %v1373_v18 = vrot.slane %v1372_v53, 4  ;;  %v1361_v20 = vmax.f32 %v1359_v27, %v1360_v63  ;;  %v1398_v61 = vmax.f32 %v1396_v12, %v1397_v13  ;;  %v1433_v47 = vsel %vm173_vm2, %v519_v36, 4286644096 }
  0x6d   : > { %v3699_v2 = vsel %vm7744_vm1, %v3694_v56, %v3698_v23  ;;  %v1386_v11 = vrot.slane %v1385_v57, 4  ;;  %v1411_v44 = vmax.f32 %v1409_v15, %v1410_v39  ;;  %v1422_v32 = vunpack.i.l.bf16 %v1420_v41 }
  0x6e   : > { %v1374_v26 = vmax.f32 %v1372_v53, %v1373_v18  ;;  %v6725_v24 = vcombine.low %v3685_v29, %v3699_v2  ;;  %v1362_v33 = vrot.slane %v1361_v20, 2  ;;  %v1399_v27 = vrot.slane %v1398_v61, 4 }
  0x6f   : > { %v1387_v38 = vmax.f32 %v1385_v57, %v1386_v11  ;;  %v1412_v48 = vrot.slane %v1411_v44, 4  ;;  %v1423_v55 = vunpack.i.h.bf16 %v1420_v41  ;;  %v1435_v53 = vunpack.i.l.bf16 %v1433_v47 }
  0x70   : > { %v1375_v35 = vrot.slane %v1374_v26, 2  ;;  %7026 = vmatprep.mubr.msk.bf16.mxu0 %vm2810_vm7, %v6725_v24  ;;  %v1363_v36 = vmax.f32 %v1361_v20, %v1362_v33  ;;  %v1400_v23 = vmax.f32 %v1398_v61, %v1399_v27  ;;  %v1436_v63 = vunpack.i.h.bf16 %v1433_v47 }
  0x71   : > { %v1388_v13 = vrot.slane %v1387_v38, 2  ;;  %v1413_v15 = vmax.f32 %v1411_v44, %v1412_v48  ;;  %v1424_v56 = vmax.f32 %v1422_v32, %v1423_v55  ;;  %v1446_v29 = vsel %vm173_vm2, %v520_v43, 4286644096 }
  0x72   : > { %v1376_v12 = vmax.f32 %v1374_v26, %v1375_v35  ;;  %v1364_v18 = vrot.slane %v1363_v36, 1  ;;  %v1401_v10 = vrot.slane %v1400_v23, 2  ;;  %v1437_v6 = vmax.f32 %v1435_v53, %v1436_v63 }
  0x73   : > { %v1389_v39 = vmax.f32 %v1387_v38, %v1388_v13  ;;  %v1414_v41 = vrot.slane %v1413_v15, 2  ;;  %v1425_v2 = vrot.slane %v1424_v56, 4  ;;  %v1448_v26 = vunpack.i.l.bf16 %v1446_v29 }
  0x74   : > { %v1377_v57 = vrot.slane %v1376_v12, 1  ;;  %v7863_v20 = vmax.f32 %v1363_v36, %v1364_v18  ;;  %v1402_v61 = vmax.f32 %v1400_v23, %v1401_v10  ;;  %v1438_v47 = vrot.slane %v1437_v6, 4 }
  0x75   : > { %v1390_v44 = vrot.slane %v1389_v39, 1  ;;  %v1415_v24 = vmax.f32 %v1413_v15, %v1414_v41  ;;  %v1426_v33 = vmax.f32 %v1424_v56, %v1425_v2  ;;  %v664_v27 = vcombine.high %v7837_v17, %v7837_v17 }
  0x76   : > { %v7865_v11 = vmax.f32 %v1376_v12, %v1377_v57  ;;  %v1403_v19 = vrot.slane %v1402_v61, 1  ;;  %v1439_v32 = vmax.f32 %v1437_v6, %v1438_v47  ;;  %v1449_v43 = vunpack.i.h.bf16 %v1446_v29 }
  0x77   : > { %v1366_v35 = vpack.i.bf16 %v7863_v20, %v7863_v20  ;;  %v7871_v38 = vmax.f32 %v1389_v39, %v1390_v44  ;;  %v1416_v48 = vrot.slane %v1415_v24, 1  ;;  %v1427_v55 = vrot.slane %v1426_v33, 2 }
  0x78   : > { %v7873_v36 = vmax.f32 %v1402_v61, %v1403_v19  ;;  %v1440_v23 = vrot.slane %v1439_v32, 2  ;;  %v1450_v53 = vmax.f32 %v1448_v26, %v1449_v43  ;;  %v1459_v63 = vsel %vm173_vm2, %v7775_v31, 4286644096 }
  0x79   : > { %v1379_v12 = vpack.i.bf16 %v7865_v11, %v7865_v11  ;;  %v1428_v15 = vmax.f32 %v1426_v33, %v1427_v55  ;;  %v1461_v56 = vunpack.i.l.bf16 %v1459_v63  ;;  %v7881_v18 = vmax.f32 %v1415_v24, %v1416_v48 }
  0x7a   : > { %v1441_v10 = vmax.f32 %v1439_v32, %v1440_v23  ;;  %v1451_v6 = vrot.slane %v1450_v53, 4  ;;  %v1462_v29 = vunpack.i.h.bf16 %v1459_v63  ;;  %v1472_v41 = vsel %vm173_vm2, %v7778_v28, 4286644096 }
  0x7b   : > { %v1429_v39 = vrot.slane %v1428_v15, 1  ;;  %v1485_v2 = vsel %vm173_vm2, %v543_v49, 4286644096  ;;  %v1474_v44 = vunpack.i.l.bf16 %v1472_v41  ;;  %v1475_v33 = vunpack.i.h.bf16 %v1472_v41 }
  0x7c   : > { %v1442_v61 = vrot.slane %v1441_v10, 1  ;;  %v1452_v47 = vmax.f32 %v1450_v53, %v1451_v6  ;;  %v1463_v26 = vmax.f32 %v1461_v56, %v1462_v29  ;;  %v1487_v19 = vunpack.i.l.bf16 %v1485_v2 }
  0x7d   : > { %v7891_v24 = vmax.f32 %v1428_v15, %v1429_v39  ;;  %v1488_v32 = vunpack.i.h.bf16 %v1485_v2  ;;  %v1498_v31 = vsel %vm173_vm2, %v544_v50, 4286644096  ;;  %v1476_v23 = vmax.f32 %v1474_v44, %v1475_v33 }
  0x7e   : > { %v1453_v48 = vrot.slane %v1452_v47, 2  ;;  %v1464_v55 = vrot.slane %v1463_v26, 4  ;;  %v7899_v49 = vmax.f32 %v1441_v10, %v1442_v61  ;;  %v1500_v63 = vunpack.i.l.bf16 %v1498_v31 }
  0x7f   : > { %v1489_v53 = vmax.f32 %v1487_v19, %v1488_v32  ;;  %v1501_v29 = vunpack.i.h.bf16 %v1498_v31  ;;  %v1477_v39 = vrot.slane %v1476_v23, 4  ;;  %v1511_v2 = vsel %vm173_vm2, %v7784_v37, 4286644096 }
  0x80   : > { %v1454_v56 = vmax.f32 %v1452_v47, %v1453_v48  ;;  %v1465_v6 = vmax.f32 %v1463_v26, %v1464_v55  ;;  %v1524_v28 = vsel %vm173_vm2, %v7797_v34, 4286644096  ;;  %v1513_v44 = vunpack.i.l.bf16 %v1511_v2 }
  0x81   : > { %v1490_v41 = vrot.slane %v1489_v53, 4  ;;  %v1502_v61 = vmax.f32 %v1500_v63, %v1501_v29  ;;  %v1478_v33 = vmax.f32 %v1476_v23, %v1477_v39  ;;  %v1514_v32 = vunpack.i.h.bf16 %v1511_v2 }
  0x82   : > { %v1455_v50 = vrot.slane %v1454_v56, 1  ;;  %v1466_v10 = vrot.slane %v1465_v6, 2  ;;  %v1526_v3 = vunpack.i.l.bf16 %v1524_v28  ;;  %v1527_v55 = vunpack.i.h.bf16 %v1524_v28 }
  0x83   : > { %v1491_v19 = vmax.f32 %v1489_v53, %v1490_v41  ;;  %v1503_v48 = vrot.slane %v1502_v61, 4  ;;  %v1479_v31 = vrot.slane %v1478_v33, 2  ;;  %v1515_v15 = vmax.f32 %v1513_v44, %v1514_v32 }
  0x84   : > { %v1467_v26 = vmax.f32 %v1465_v6, %v1466_v10  ;;  %v1537_v43 = vsel %vm173_vm2, %v567_v40, 4286644096  ;;  %v7913_v63 = vmax.f32 %v1454_v56, %v1455_v50  ;;  %v1528_v29 = vmax.f32 %v1526_v3, %v1527_v55 }
  0x85   : > { %v1492_v30 = vrot.slane %v1491_v19, 2  ;;  %v1504_v53 = vmax.f32 %v1502_v61, %v1503_v48  ;;  %v1480_v39 = vmax.f32 %v1478_v33, %v1479_v31  ;;  %v1516_v2 = vrot.slane %v1515_v15, 4 }
  0x86   : > { %v1468_v23 = vrot.slane %v1467_v26, 1  ;;  %v1539_v47 = vunpack.i.l.bf16 %v1537_v43  ;;  %v1529_v10 = vrot.slane %v1528_v29, 4  ;;  %v1540_v57 = vunpack.i.h.bf16 %v1537_v43 }
  0x87   : > { %v1493_v41 = vmax.f32 %v1491_v19, %v1492_v30  ;;  %v1505_v28 = vrot.slane %v1504_v53, 2  ;;  %v1481_v44 = vrot.slane %v1480_v39, 1  ;;  %v1517_v13 = vmax.f32 %v1515_v15, %v1516_v2 }
  0x88   : > { %v7915_v6 = vmax.f32 %v1467_v26, %v1468_v23  ;;  %v1550_v37 = vsel %vm173_vm2, %v568_v59, 4286644096  ;;  %v1530_v30 = vmax.f32 %v1528_v29, %v1529_v10  ;;  %v1541_v56 = vmax.f32 %v1539_v47, %v1540_v57 }
  0x89   : > { %v1494_v32 = vrot.slane %v1493_v41, 1  ;;  %v1506_v40 = vmax.f32 %v1504_v53, %v1505_v28  ;;  %v7923_v50 = vmax.f32 %v1480_v39, %v1481_v44  ;;  %v1518_v33 = vrot.slane %v1517_v13, 2 }
  0x8a   : > { %v1552_v43 = vunpack.i.l.bf16 %v1550_v37  ;;  %v1531_v26 = vrot.slane %v1530_v30, 2  ;;  %v1542_v15 = vrot.slane %v1541_v56, 4  ;;  %v1553_v48 = vunpack.i.h.bf16 %v1550_v37 }
  0x8b   : > { %v7925_v61 = vmax.f32 %v1493_v41, %v1494_v32  ;;  %v1507_v19 = vrot.slane %v1506_v40, 1  ;;  %v1470_v34 = vpack.i.bf16 %v7915_v6, %v7915_v6  ;;  %v1519_v55 = vmax.f32 %v1517_v13, %v1518_v33 }
  0x8c   : > { %v1563_v57 = vsel %vm173_vm2, %v7787_v46, 4286644096  ;;  %v1532_v31 = vmax.f32 %v1530_v30, %v1531_v26  ;;  %v1543_v23 = vmax.f32 %v1541_v56, %v1542_v15  ;;  %v1554_v53 = vmax.f32 %v1552_v43, %v1553_v48 }
  0x8d   : > { %v7933_v47 = vmax.f32 %v1506_v40, %v1507_v19  ;;  %v1520_v29 = vrot.slane %v1519_v55, 1  ;;  %v1565_v39 = vunpack.i.l.bf16 %v1563_v57  ;;  %v1566_v41 = vunpack.i.h.bf16 %v1563_v57 }
  0x8e   : > { %v1576_v2 = vsel %vm173_vm2, %v7800_v42, 4286644096  ;;  %v1533_v10 = vrot.slane %v1532_v31, 1  ;;  %v1544_v44 = vrot.slane %v1543_v23, 2  ;;  %v1555_v13 = vrot.slane %v1554_v53, 4 }
  0x8f   : > { %v7939_v32 = vmax.f32 %v1519_v55, %v1520_v29  ;;  %v1567_v37 = vmax.f32 %v1565_v39, %v1566_v41  ;;  %v1578_v40 = vunpack.i.l.bf16 %v1576_v2  ;;  %v1579_v33 = vunpack.i.h.bf16 %v1576_v2 }
  0x90   : > { %v7941_v30 = vmax.f32 %v1532_v31, %v1533_v10  ;;  %v1545_v56 = vmax.f32 %v1543_v23, %v1544_v44  ;;  %v1556_v43 = vmax.f32 %v1554_v53, %v1555_v13  ;;  %v1589_v19 = vsel %vm173_vm2, %v591_v54, 4286644096 }
  0x91   : > { %v1568_v15 = vrot.slane %v1567_v37, 4  ;;  %v1580_v48 = vmax.f32 %v1578_v40, %v1579_v33  ;;  %v1591_v57 = vunpack.i.l.bf16 %v1589_v19  ;;  %v1592_v31 = vunpack.i.h.bf16 %v1589_v19 }
  0x92   : > { %v1546_v29 = vrot.slane %v1545_v56, 1  ;;  %v1557_v39 = vrot.slane %v1556_v43, 2  ;;  %v1602_v46 = vsel %vm173_vm2, %v592_v7, 4286644096  ;;  %v1615_v54 = vsel %vm173_vm2, %v7803_v51, 4286644096 }
  0x93   : > { %v1569_v41 = vmax.f32 %v1567_v37, %v1568_v15  ;;  %v1581_v23 = vrot.slane %v1580_v48, 4  ;;  %v1593_v10 = vmax.f32 %v1591_v57, %v1592_v31  ;;  %v1604_v44 = vunpack.i.l.bf16 %v1602_v46 }
  0x94   : > { %v1558_v2 = vmax.f32 %v1556_v43, %v1557_v39  ;;  %v1605_v33 = vunpack.i.h.bf16 %v1602_v46  ;;  %v1617_v19 = vunpack.i.l.bf16 %v1615_v54  ;;  %v7959_v37 = vmax.f32 %v1545_v56, %v1546_v29 }
  0x95   : > { %v1570_v13 = vrot.slane %v1569_v41, 2  ;;  %v1582_v40 = vmax.f32 %v1580_v48, %v1581_v23  ;;  %v1594_v3 = vrot.slane %v1593_v10, 4  ;;  %v1618_v42 = vunpack.i.h.bf16 %v1615_v54 }
  0x96   : > { %v1559_v15 = vrot.slane %v1558_v2, 1  ;;  %v1606_v26 = vmax.f32 %v1604_v44, %v1605_v33  ;;  %v1628_v28 = vsel %vm173_vm2, %v7815_v62, 4286644096  ;;  %v1680_v62 = vsel %vm173_vm2, %v7827_v9, 4286644096 }
  0x97   : > { %v1571_v55 = vmax.f32 %v1569_v41, %v1570_v13  ;;  %v1583_v7 = vrot.slane %v1582_v40, 2  ;;  %v1595_v43 = vmax.f32 %v1593_v10, %v1594_v3  ;;  %v1619_v57 = vmax.f32 %v1617_v19, %v1618_v42 }
  0x98   : > { %v7963_v59 = vmax.f32 %v1558_v2, %v1559_v15  ;;  %v1630_v39 = vunpack.i.l.bf16 %v1628_v28  ;;  %v1607_v23 = vrot.slane %v1606_v26, 4  ;;  %v1631_v46 = vunpack.i.h.bf16 %v1628_v28 }
  0x99   : > { %v1572_v31 = vrot.slane %v1571_v55, 1  ;;  %v1584_v48 = vmax.f32 %v1582_v40, %v1583_v7  ;;  %v1596_v29 = vrot.slane %v1595_v43, 2  ;;  %v1620_v54 = vrot.slane %v1619_v57, 4 }
  0x9a   : > { %v1641_v41 = vsel %vm173_vm2, %v615_v60, 4286644096  ;;  %v1608_v3 = vmax.f32 %v1606_v26, %v1607_v23  ;;  %v1632_v10 = vmax.f32 %v1630_v39, %v1631_v46  ;;  %v1654_v60 = vsel %vm173_vm2, %v616_v14, 4286644096 }
  0x9b   : > { %v7971_v44 = vmax.f32 %v1571_v55, %v1572_v31  ;;  %v1585_v2 = vrot.slane %v1584_v48, 1  ;;  %v1597_v13 = vmax.f32 %v1595_v43, %v1596_v29  ;;  %v1621_v33 = vmax.f32 %v1619_v57, %v1620_v54 }
  0x9c   : > { %v1643_v40 = vunpack.i.l.bf16 %v1641_v41  ;;  %v1644_v19 = vunpack.i.h.bf16 %v1641_v41  ;;  %v1609_v42 = vrot.slane %v1608_v3, 2  ;;  %v1633_v7 = vrot.slane %v1632_v10, 4 }
  0x9d   : > { %v7975_v15 = vmax.f32 %v1584_v48, %v1585_v2  ;;  %v1598_v56 = vrot.slane %v1597_v13, 1  ;;  %v1622_v51 = vrot.slane %v1621_v33, 2  ;;  %v1656_v57 = vunpack.i.l.bf16 %v1654_v60 }
  0x9e   : > { %v1645_v53 = vmax.f32 %v1643_v40, %v1644_v19  ;;  %v1610_v55 = vmax.f32 %v1608_v3, %v1609_v42  ;;  %v1634_v43 = vmax.f32 %v1632_v10, %v1633_v7  ;;  %v1657_v23 = vunpack.i.h.bf16 %v1654_v60 }
  0x9f   : > { %v7983_v39 = vmax.f32 %v1597_v13, %v1598_v56  ;;  %v1623_v31 = vmax.f32 %v1621_v33, %v1622_v51  ;;  %v1667_v54 = vsel %vm173_vm2, %v7810_v58, 4286644096  ;;  %v1682_v7 = vunpack.i.l.bf16 %v1680_v62 }
  0xa0   : > { %v1646_v48 = vrot.slane %v1645_v53, 4  ;;  %v1611_v46 = vrot.slane %v1610_v55, 1  ;;  %v1635_v29 = vrot.slane %v1634_v43, 2  ;;  %v1658_v3 = vmax.f32 %v1656_v57, %v1657_v23 }
  0xa1   : > { %v1624_v41 = vrot.slane %v1623_v31, 1  ;;  %v1669_v13 = vunpack.i.l.bf16 %v1667_v54  ;;  %v1670_v33 = vunpack.i.h.bf16 %v1667_v54  ;;  %v1683_v28 = vunpack.i.h.bf16 %v1680_v62 }
  0xa2   : > { %v1647_v2 = vmax.f32 %v1645_v53, %v1646_v48  ;;  %v7991_v10 = vmax.f32 %v1610_v55, %v1611_v46  ;;  %v1636_v56 = vmax.f32 %v1634_v43, %v1635_v29  ;;  %v1659_v42 = vrot.slane %v1658_v3, 4 }
  0xa3   : > { %v7995_v51 = vmax.f32 %v1623_v31, %v1624_v41  ;;  %v1671_v26 = vmax.f32 %v1669_v13, %v1670_v33  ;;  %v1693_v43 = vsel %vm173_vm2, %v639_v16, 4286644096  ;;  %v1684_v46 = vmax.f32 %v1682_v7, %v1683_v28 }
  0xa4   : > { %v1648_v19 = vrot.slane %v1647_v2, 2  ;;  %v1637_v60 = vrot.slane %v1636_v56, 1  ;;  %v1660_v55 = vmax.f32 %v1658_v3, %v1659_v42  ;;  %v1695_v29 = vunpack.i.l.bf16 %v1693_v43 }
  0xa5   : > { %v1672_v23 = vrot.slane %v1671_v26, 4  ;;  %v1696_v41 = vunpack.i.h.bf16 %v1693_v43  ;;  %v1706_v62 = vsel %vm173_vm2, %v640_v25, 4286644096  ;;  %v1685_v58 = vrot.slane %v1684_v46, 4 }
  0xa6   : > { %v1649_v57 = vmax.f32 %v1647_v2, %v1648_v19  ;;  %v8003_v48 = vmax.f32 %v1636_v56, %v1637_v60  ;;  %v1661_v54 = vrot.slane %v1660_v55, 2  ;;  %v1708_v13 = vunpack.i.l.bf16 %v1706_v62 }
  0xa7   : > { %v1673_v3 = vmax.f32 %v1671_v26, %v1672_v23  ;;  %v1697_v28 = vmax.f32 %v1695_v29, %v1696_v41  ;;  %v1709_v33 = vunpack.i.h.bf16 %v1706_v62  ;;  %v1686_v42 = vmax.f32 %v1684_v46, %v1685_v58 }
  0xa8   : > { %v1650_v31 = vrot.slane %v1649_v57, 1  ;;  %v1662_v56 = vmax.f32 %v1660_v55, %v1661_v54  ;;  %v1719_v7 = vsel %vm173_vm2, %v7818_v4, 4286644096  ;;  %v1732_v9 = vsel %vm173_vm2, %v7837_v17, 4286644096 }
  0xa9   : > { %v1674_v19 = vrot.slane %v1673_v3, 2  ;;  %v1698_v26 = vrot.slane %v1697_v28, 4  ;;  %v1710_v43 = vmax.f32 %v1708_v13, %v1709_v33  ;;  %v1687_v2 = vrot.slane %v1686_v42, 2 }
  0xaa   : > { %v8017_v25 = vmax.f32 %v1649_v57, %v1650_v31  ;;  %v1663_v60 = vrot.slane %v1662_v56, 1  ;;  %v1721_v53 = vunpack.i.l.bf16 %v1719_v7  ;;  %v1722_v16 = vunpack.i.h.bf16 %v1719_v7 }
  0xab   : > { %v1675_v23 = vmax.f32 %v1673_v3, %v1674_v19  ;;  %v1699_v29 = vmax.f32 %v1697_v28, %v1698_v26  ;;  %v1711_v54 = vrot.slane %v1710_v43, 4  ;;  %v1734_v46 = vunpack.i.l.bf16 %v1732_v9 }
  0xac   : > { %v8019_v55 = vmax.f32 %v1662_v56, %v1663_v60  ;;  %v1688_v62 = vmax.f32 %v1686_v42, %v1687_v2  ;;  %v1723_v58 = vmax.f32 %v1721_v53, %v1722_v16  ;;  %v1735_v40 = vunpack.i.h.bf16 %v1732_v9 }
  0xad   : > { %v1676_v41 = vrot.slane %v1675_v23, 1  ;;  %v1652_v57 = vpack.i.bf16 %v8017_v25, %v8017_v25  ;;  %v1700_v31 = vrot.slane %v1699_v29, 2  ;;  %v1712_v14 = vmax.f32 %v1710_v43, %v1711_v54 }
  0xae   : > { %v1745_v3 = vsel %vm173_vm2, %v663_v1, 4286644096  ;;  %v1689_v56 = vrot.slane %v1688_v62, 1  ;;  %v1724_v28 = vrot.slane %v1723_v58, 4  ;;  %v1736_v33 = vmax.f32 %v1734_v46, %v1735_v40 }
  0xaf   : > { %v8027_v13 = vmax.f32 %v1675_v23, %v1676_v41  ;;  %v1701_v19 = vmax.f32 %v1699_v29, %v1700_v31  ;;  %v1713_v7 = vrot.slane %v1712_v14, 2  ;;  %v1747_v2 = vunpack.i.l.bf16 %v1745_v3 }
  0xb0   : > { %v1748_v53 = vunpack.i.h.bf16 %v1745_v3  ;;  %v1665_v16 = vpack.i.bf16 %v8019_v55, %v8019_v55  ;;  %v8031_v42 = vmax.f32 %v1688_v62, %v1689_v56  ;;  %v1725_v9 = vmax.f32 %v1723_v58, %v1724_v28 }
  0xb1   : > { %v1737_v60 = vrot.slane %v1736_v33, 4  ;;  %v1702_v26 = vrot.slane %v1701_v19, 1  ;;  %v1714_v4 = vmax.f32 %v1712_v14, %v1713_v7  ;;  %v1758_v1 = vsel %vm173_vm2, %v664_v27, 4286644096 }
  0xb2   : > { %v1749_v43 = vmax.f32 %v1747_v2, %v1748_v53  ;;  %v1678_v40 = vpack.i.bf16 %v8027_v13, %v8027_v13  ;;  %v1726_v23 = vrot.slane %v1725_v9, 2  ;;  %v1760_v54 = vunpack.i.l.bf16 %v1758_v1 }
  0xb3   : > { %v1738_v29 = vmax.f32 %v1736_v33, %v1737_v60  ;;  %v1703_v46 = vmax.f32 %v1701_v19, %v1702_v26  ;;  %v1715_v41 = vrot.slane %v1714_v4, 1  ;;  %v1761_v31 = vunpack.i.h.bf16 %v1758_v1 }
  0xb4   : > { %v1750_v62 = vrot.slane %v1749_v43, 4  ;;  %v1727_v58 = vmax.f32 %v1725_v9, %v1726_v23  ;;  %v2868_v14 = vsel %vm2810_vm7, %v1366_v35, 4286644096  ;;  %v2871_v17 = vsel %vm2810_vm7, %v1470_v34, 4286644096 }
  0xb5   : > { %v1739_v3 = vrot.slane %v1738_v29, 2  ;;  %v1691_v27 = vpack.i.bf16 %v8031_v42, %v8031_v42  ;;  %v1716_v13 = vmax.f32 %v1714_v4, %v1715_v41  ;;  %v1762_v28 = vmax.f32 %v1760_v54, %v1761_v31 }
  0xb6   : > { %v1751_v56 = vmax.f32 %v1749_v43, %v1750_v62  ;;  %v1704_v33 = vpack.i.bf16 %v1703_v46, %v1703_v46  ;;  %v1728_v19 = vrot.slane %v1727_v58, 1  ;;  %v8049_v2 = vmax.bf16 %v2871_v17, %v2868_v14 }
  0xb7   : > { %v1740_v7 = vmax.f32 %v1738_v29, %v1739_v3  ;;  %v1763_v20 = vrot.slane %v1762_v28, 4  ;;  %v2875_v35 = vsel %vm2810_vm7, %v1379_v12, 4286644096  ;;  %v10052_v6 = vpack.i.bf16 %v7923_v50, %v7923_v50 }
  0xb8   : > { %v1752_v53 = vrot.slane %v1751_v56, 2  ;;  %v1717_v42 = vpack.i.bf16 %v1716_v13, %v1716_v13  ;;  %v1729_v9 = vmax.f32 %v1727_v58, %v1728_v19  ;;  %v10053_v26 = vpack.i.bf16 %v7871_v38, %v7871_v38 }
  0xb9   : > { %v2878_v34 = vsel %vm2810_vm7, %v10052_v6, 4286644096  ;;  %v1741_v60 = vrot.slane %v1740_v7, 1  ;;  %v1764_v1 = vmax.f32 %v1762_v28, %v1763_v20  ;;  %v10054_v11 = vpack.i.bf16 %v7925_v61, %v7925_v61 }
  0xba   : > { %v2882_v4 = vsel %vm2810_vm7, %v10053_v26, 4286644096  ;;  %v1753_v43 = vmax.f32 %v1751_v56, %v1752_v53  ;;  %v10055_v50 = vpack.i.bf16 %v7873_v36, %v7873_v36  ;;  %v1730_v29 = vpack.i.bf16 %v1729_v9, %v1729_v9 }
  0xbb   : > { %v2885_v12 = vsel %vm2810_vm7, %v10054_v11, 4286644096  ;;  %v1742_v54 = vmax.f32 %v1740_v7, %v1741_v60  ;;  %v8071_v46 = vmax.bf16 %v2878_v34, %v2875_v35  ;;  %v10056_v38 = vpack.i.bf16 %v7933_v47, %v7933_v47 }
  0xbc   : > { %v2889_v23 = vsel %vm2810_vm7, %v10055_v50, 4286644096  ;;  %v1754_v62 = vrot.slane %v1753_v43, 1  ;;  %v1765_v31 = vrot.slane %v1764_v1, 2  ;;  %v2887_v58 = vmax.bf16 %v2885_v12, %v2882_v4 }
  0xbd   : > { %v2892_v41 = vsel %vm2810_vm7, %v10056_v38, 4286644096  ;;  %v10057_v61 = vpack.i.bf16 %v7881_v18, %v7881_v18  ;;  %v10058_v14 = vpack.i.bf16 %v7939_v32, %v7939_v32  ;;  %v10059_v13 = vpack.i.bf16 %v7891_v24, %v7891_v24 }
  0xbe   : > { %v2894_v36 = vmax.bf16 %v2892_v41, %v2889_v23  ;;  %v10060_v56 = vpack.i.bf16 %v7941_v30, %v7941_v30  ;;  %v1743_v19 = vpack.i.bf16 %v1742_v54, %v1742_v54  ;;  %v1755_v18 = vmax.f32 %v1753_v43, %v1754_v62 }
  0xbf   : > { %v2896_v3 = vsel %vm2810_vm7, %v10057_v61, 4286644096  ;;  %v2899_v17 = vsel %vm2810_vm7, %v10058_v14, 4286644096  ;;  %v2903_v47 = vsel %vm2810_vm7, %v10059_v13, 4286644096  ;;  %v1766_v7 = vmax.f32 %v1764_v1, %v1765_v31 }
  0xc0   : > { %v2906_v28 = vsel %vm2810_vm7, %v10060_v56, 4286644096  ;;  %v2901_v53 = vmax.bf16 %v2899_v17, %v2896_v3  ;;  %v10061_v32 = vpack.i.bf16 %v7899_v49, %v7899_v49  ;;  %v10062_v24 = vpack.i.bf16 %v7959_v37, %v7959_v37 }
  0xc1   : > { %v2908_v20 = vmax.bf16 %v2906_v28, %v2903_v47  ;;  %v10063_v30 = vpack.i.bf16 %v7913_v63, %v7913_v63  ;;  %v1756_v9 = vpack.i.bf16 %v1755_v18, %v1755_v18  ;;  %v1767_v60 = vrot.slane %v1766_v7, 1 }
  0xc2   : > { %v2910_v35 = vsel %vm2810_vm7, %v10061_v32, 4286644096  ;;  %v2913_v6 = vsel %vm2810_vm7, %v10062_v24, 4286644096  ;;  %v10064_v26 = vpack.i.bf16 %v7963_v59, %v7963_v59  ;;  %v6660_v49 = vcombine.low %v8049_v2, %v8049_v2 }
  0xc3   : > { %v2917_v34 = vsel %vm2810_vm7, %v10063_v30, 4286644096  ;;  %v2915_v43 = vmax.bf16 %v2913_v6, %v2910_v35  ;;  %v10065_v37 = vpack.i.bf16 %v7971_v44, %v7971_v44  ;;  %v2927_v63 = vsel %vm2810_vm7, %v1678_v40, 4286644096 }
  0xc4   : > { %v2920_v4 = vsel %vm2810_vm7, %v10064_v26, 4286644096  ;;  %v10066_v11 = vpack.i.bf16 %v7975_v15, %v7975_v15  ;;  %v1768_v50 = vmax.f32 %v1766_v7, %v1767_v60  ;;  %v2934_v23 = vsel %vm2810_vm7, %v1691_v27, 4286644096 }
  0xc5   : > { %v2924_v1 = vsel %vm2810_vm7, %v10065_v37, 4286644096  ;;  %v10067_v2 = vpack.i.bf16 %v7983_v39, %v7983_v39  ;;  %v2941_v44 = vsel %vm2810_vm7, %v1704_v33, 4286644096  ;;  %v10068_v40 = vpack.i.bf16 %v7991_v10, %v7991_v10 }
  0xc6   : > { %v2931_v12 = vsel %vm2810_vm7, %v10066_v11, 4286644096  ;;  %v2929_v59 = vmax.bf16 %v2927_v63, %v2924_v1  ;;  %v2948_v15 = vsel %vm2810_vm7, %v1717_v42, 4286644096  ;;  %v1769_v62 = vpack.i.bf16 %v1768_v50, %v1768_v50 }
  0xc7   : > { %v2938_v54 = vsel %vm2810_vm7, %v10067_v2, 4286644096  ;;  %v2936_v38 = vmax.bf16 %v2934_v23, %v2931_v12  ;;  %v2945_v41 = vsel %vm2810_vm7, %v10068_v40, 4286644096  ;;  %v10069_v27 = vpack.i.bf16 %v7995_v51, %v7995_v51  ;;  %v3619_v23 = vld [vmem:[#allocation2 + $0x1c] sm:$0x1] }
  0xc8   : > { %v2943_v31 = vmax.bf16 %v2941_v44, %v2938_v54  ;;  %v2950_v61 = vmax.bf16 %v2948_v15, %v2945_v41  ;;  %v2955_v3 = vsel %vm2810_vm7, %v1730_v29, 4286644096  ;;  %v10070_v33 = vpack.i.bf16 %v8003_v48, %v8003_v48  ;;  %v225_v40 = vld [vmem:[#allocation2 + $0x24] sm:$0x1]  ;;  %v228_v41 = vld [vmem:[#allocation2 + $0x2c] sm:$0x1] }
  0xc9   : > { %v2952_v39 = vsel %vm2810_vm7, %v10069_v27, 4286644096  ;;  %v2962_v10 = vsel %vm2810_vm7, %v1743_v19, 4286644096  ;;  %v6661_v42 = vcombine.low %v8071_v46, %v8071_v46  ;;  %v2966_v51 = vsel %vm2810_vm7, %v1652_v57, 4286644096 }
  0xca   : > { %v2959_v14 = vsel %vm2810_vm7, %v10070_v33, 4286644096  ;;  %v2957_v17 = vmax.bf16 %v2955_v3, %v2952_v39  ;;  %v2969_v47 = vsel %vm2810_vm7, %v1756_v9, 4286644096  ;;  %v2973_v48 = vsel %vm2810_vm7, %v1665_v16, 4286644096 }
  0xcb   : > { %v2964_v13 = vmax.bf16 %v2962_v10, %v2959_v14  ;;  %v2971_v29 = vmax.bf16 %v2969_v47, %v2966_v51  ;;  %v2976_v56 = vsel %vm2810_vm7, %v1769_v62, 4286644096  ;;  %v6662_v28 = vcombine.low %v2887_v58, %v2887_v58  ;;  %v6632_v27 = vld.sshfl [vmem:[%s7573_s5 + $0x30] sm:$0x33 pattern:$0x75316420] }
  0xcc   : > { %v2922_v19 = vmax.bf16 %v2920_v4, %v2917_v34  ;;  %v6663_v46 = vcombine.low %v2894_v36, %v2894_v36  ;;  %v6664_v18 = vcombine.low %v2901_v53, %v2901_v53  ;;  %v6665_v7 = vcombine.low %v2908_v20, %v2908_v20  ;;  %v3613_v4 = vld [vmem:[#allocation2 + $0x14] sm:$0x1]  ;;  %v6634_v47 = vld.sshfl [vmem:[%s7573_s5 + $0x38] sm:$0x33 pattern:$0x75316420] }
  0xcd   : > { %v6666_v32 = vcombine.low %v2915_v43, %v2915_v43  ;;  %v6668_v35 = vcombine.low %v2929_v59, %v2929_v59  ;;  %v6669_v25 = vcombine.low %v2936_v38, %v2936_v38  ;;  %v6670_v24 = vcombine.low %v2943_v31, %v2943_v31  ;;  %v193_v43 = vld [vmem:[#allocation2 + $0x20] sm:$0x1]  ;;  %v6633_v10 = vld.sshfl [vmem:[%s7573_s5 + $0x34] sm:$0x33 pattern:$0x75316420] }
  0xce   : > { %v2978_v57 = vmax.bf16 %v2976_v56, %v2973_v48  ;;  %v6671_v6 = vcombine.low %v2950_v61, %v2950_v61  ;;  %v6672_v30 = vcombine.low %v2957_v17, %v2957_v17  ;;  %v6673_v9 = vcombine.low %v2964_v13, %v2964_v13  ;;  %v3610_v56 = vld [vmem:[#allocation2 + $0x10] sm:$0xf] }
  0xcf   : > { %v6674_v60 = vcombine.low %v2971_v29, %v2971_v29  ;;  %v3459_v26 = vunpack.c.l.b16 %v6660_v49  ;;  %v3460_v55 = vunpack.c.l.b16 %v6661_v42  ;;  %v3461_v37 = vunpack.c.l.b16 %v6662_v28  ;;  %v196_v49 = vld [vmem:[#allocation2 + $0x28] sm:$0x1] }
  0xd0   : > { %v3462_v16 = vunpack.c.l.b16 %v6663_v46  ;;  %v3463_v1 = vunpack.c.l.b16 %v6664_v18  ;;  %v3464_v63 = vunpack.c.l.b16 %v6665_v7  ;;  %v3467_v58 = vunpack.c.l.b16 %v6668_v35  ;;  %v3616_v7 = vld [vmem:[#allocation2 + $0x18] sm:$0xf] }
  0xd1   : > { %v3465_v34 = vunpack.c.l.b16 %v6666_v32  ;;  %v3468_v36 = vunpack.c.l.b16 %v6669_v25  ;;  %v3469_v53 = vunpack.c.l.b16 %v6670_v24  ;;  %v3470_v20 = vunpack.c.l.b16 %v6671_v6  ;;  %v6635_v32 = vld.sshfl [vmem:[%s7573_s5 + $0x3c] sm:$0x33 pattern:$0x75316420] }
  0xd2   : > { %v3471_v11 = vunpack.c.l.b16 %v6672_v30  ;;  %v3472_v12 = vunpack.c.l.b16 %v6673_v9  ;;  %v3527_v50 = vsel %vm3515_vm8, %v3460_v55, %v3459_v26  ;;  %v6919_v59 = vcombine.low %v2922_v19, %v2922_v19  ;;  %v6636_v6 = vld.sshfl [vmem:[%s7573_s5 + $0x40] sm:$0x33 pattern:$0x75316420] }
  0xd3   : > { %v3473_v2 = vunpack.c.l.b16 %v6674_v60  ;;  %v3528_v54 = vsel %vm3517_vm9, %v3461_v37, %v3527_v50  ;;  %v3533_v38 = vsel %vm3515_vm8, %v3468_v36, %v3467_v58  ;;  %v6920_v44 = vcombine.low %v2978_v57, %v2978_v57  ;;  %v7390_v26 = vld [vmem:[%s10035_s1] sm:$0x3] }
  0xd4   : > { %v3529_v15 = vsel %vm3519_vm10, %v3462_v16, %v3528_v54  ;;  %v3534_v62 = vsel %vm3517_vm9, %v3469_v53, %v3533_v38  ;;  %v3614_v31 = vsel %vm7551_vm4, %v6919_v59, %v3613_v4  ;;  %v194_v61 = vsel %vm7551_vm4, 0, %v193_v43  ;;  %v6639_v38 = vld.sshfl [vmem:[%s7573_s5 + $0x4c] sm:$0x33 pattern:$0x75316420] }
  0xd5   : > { %v3530_v39 = vsel %vm3521_vm11, %v3463_v1, %v3529_v15  ;;  %v3535_v3 = vsel %vm3519_vm10, %v3470_v20, %v3534_v62  ;;  %3615 = vst [vmem:[#allocation2 + $0x14] sm:$0x1] %v3614_v31  ;;  %v3620_v33 = vsel %vm7551_vm4, %v6920_v44, %v3619_v23  ;;  %195 = vst [vmem:[#allocation2 + $0x20] sm:$0x1] %v194_v61  ;;  %v197_v14 = vsel %vm7551_vm4, 0, %v196_v49 }
  0xd6   : > { %v3531_v42 = vsel %vm3523_vm12, %v3464_v63, %v3530_v39  ;;  %v3536_v17 = vsel %vm3521_vm11, %v3471_v11, %v3535_v3  ;;  %3621 = vst [vmem:[#allocation2 + $0x1c] sm:$0x1] %v3620_v33  ;;  %198 = vst [vmem:[#allocation2 + $0x28] sm:$0x1] %v197_v14  ;;  %v226_v13 = vsel %vm7561_vm6, 0, %v225_v40  ;;  %v229_v51 = vsel %vm7561_vm6, 0, %v228_v41 }
  0xd7   : > { %v3532_v29 = vsel %vm3525_vm13, %v3465_v34, %v3531_v42  ;;  %v3537_v48 = vsel %vm3523_vm12, %v3472_v12, %v3536_v17  ;;  %227 = vst [vmem:[#allocation2 + $0x24] sm:$0x1] %v226_v13  ;;  %230 = vst [vmem:[#allocation2 + $0x2c] sm:$0x1] %v229_v51  ;;  %v672_v28 = vcombine.high %v6632_v27, %v6632_v27  ;;  %v8198_v55 = vsel %vm3810_vm0, %v7390_v26, 0 }
  0xd8   : > { %v8180_v19 = vrot.slane %v6632_v27, %v7579_v21  ;;  %v3538_v46 = vsel %vm3525_vm13, %v3473_v2, %v3537_v48  ;;  %v3571_v18 = vpack.c.b16 %v3532_v29, %v3532_v29  ;;  %v696_v35 = vcombine.high %v6633_v10, %v6633_v10  ;;  %v6637_v63 = vld.sshfl [vmem:[%s7573_s5 + $0x44] sm:$0x33 pattern:$0x75316420] }
  0xd9   : > { %v8185_v25 = vrot.slane %v6633_v10, %v7579_v21  ;;  %v3573_v57 = vpack.c.b16 %v3538_v46, %v3538_v46  ;;  %v8190_v30 = vrot.slane %v672_v28, %v7579_v21  ;;  %v720_v9 = vcombine.high %v6634_v47, %v6634_v47  ;;  %v6638_v20 = vld.sshfl [vmem:[%s7573_s5 + $0x48] sm:$0x33 pattern:$0x75316420] }
  0xda   : > { %v3611_v60 = vsel %vm7732_vm3, %v3571_v18, %v3610_v56  ;;  %v687_v37 = vcombine.high %v8180_v19, %v8180_v19  ;;  %v8203_v16 = vrot.slane %v6634_v47, %v7579_v21  ;;  %v8209_v58 = vrot.slane %v696_v35, %v7579_v21 }
  0xdb   : > { %3612 = vst [vmem:[#allocation2 + $0x10] sm:$0xf] %v3611_v60  ;;  %v3617_v1 = vsel %vm7732_vm3, %v3573_v57, %v3616_v7  ;;  %v8212_v34 = vrot.slane %v720_v9, %v7579_v21  ;;  %v744_v36 = vcombine.high %v6635_v32, %v6635_v32  ;;  %v688_v4 = vcombine.high %v8190_v30, %v8190_v30 }
  0xdc   : > { %3618 = vst [vmem:[#allocation2 + $0x18] sm:$0xf] %v3617_v1  ;;  %v3663_v53 = vld [vmem:[#allocation2 + $0x14] sm:$0x1]  ;;  %v711_v43 = vcombine.high %v8185_v25, %v8185_v25  ;;  %v8220_v11 = vrot.slane %v6635_v32, %v7579_v21  ;;  %v768_v12 = vcombine.high %v6636_v6, %v6636_v6  ;;  %v712_v23 = vcombine.high %v8209_v58, %v8209_v58 }
  0xdd   : > { %v3664_v50 = vld [vmem:[#allocation2 + $0x1c] sm:$0x1]  ;;  %v3710_v59 = vshll.u32 %v3663_v53, 16  ;;  %v735_v49 = vcombine.high %v8203_v16, %v8203_v16  ;;  %v8227_v2 = vrot.slane %v744_v36, %v7579_v21  ;;  %v736_v44 = vcombine.high %v8212_v34, %v8212_v34 }
  0xde   : > { %v3724_v54 = vshll.u32 %v3664_v50, 16  ;;  %v759_v40 = vcombine.high %v8220_v11, %v8220_v11  ;;  %v8235_v41 = vrot.slane %v6636_v6, %v7579_v21  ;;  %v8240_v31 = vrot.slane %v768_v12, %v7579_v21 }
  0xdf   : > { %v3712_v15 = vrot.slane %v3710_v59, 5  ;;  %v760_v62 = vcombine.high %v8227_v2, %v8227_v2  ;;  %v792_v61 = vcombine.high %v6637_v63, %v6637_v63  ;;  %v8245_v3 = vrot.slane %v6637_v63, %v7579_v21 }
  0xe0   : > { %v3726_v27 = vrot.slane %v3724_v54, 5  ;;  %v783_v39 = vcombine.high %v8235_v41, %v8235_v41  ;;  %v816_v33 = vcombine.high %v6638_v20, %v6638_v20  ;;  %v784_v14 = vcombine.high %v8240_v31, %v8240_v31 }
  0xe1   : > { %v8250_v10 = vrot.slane %v792_v61, %v7579_v21  ;;  %v8253_v42 = vrot.slane %v6638_v20, %v7579_v21  ;;  %v840_v17 = vcombine.high %v6639_v38, %v6639_v38  ;;  %v807_v51 = vcombine.high %v8245_v3, %v8245_v3 }
  0xe2   : > { %v3654_v13 = vld [vmem:[#allocation2 + $0x10] sm:$0xf]  ;;  %v8258_v47 = vrot.slane %v816_v33, %v7579_v21  ;;  %v8261_v29 = vrot.slane %v6639_v38, %v7579_v21  ;;  %v1771_v48 = vsel %vm173_vm2, %v8180_v19, 4286644096  ;;  %v1784_v12 = vsel %vm173_vm2, %v8190_v30, 4286644096 }
  0xe3   : > { %v3655_v56 = vld [vmem:[#allocation2 + $0x18] sm:$0xf]  ;;  %v3701_v28 = vshrl.u32 %v3654_v13, 16  ;;  %v3704_v46 = vshll.u32 %v3654_v13, 16  ;;  %v808_v18 = vcombine.high %v8250_v10, %v8250_v10  ;;  %v831_v7 = vcombine.high %v8253_v42, %v8253_v42 }
  0xe4   : > { %v3715_v32 = vshrl.u32 %v3655_v56, 16  ;;  %v3718_v35 = vshll.u32 %v3655_v56, 16  ;;  %v832_v57 = vcombine.high %v8258_v47, %v8258_v47  ;;  %v8272_v6 = vrot.slane %v840_v17, %v7579_v21 }
  0xe5   : > { %v3703_v9 = vrot.slane %v3701_v28, 4  ;;  %v3706_v60 = vrot.slane %v3704_v46, 5  ;;  %v855_v19 = vcombine.high %v8261_v29, %v8261_v29  ;;  %v1773_v26 = vunpack.i.l.bf16 %v1771_v48 }
  0xe6   : > { %v3717_v1 = vrot.slane %v3715_v32, 4  ;;  %v3720_v63 = vrot.slane %v3718_v35, 5  ;;  %v856_v36 = vcombine.high %v8272_v6, %v8272_v6  ;;  %v1774_v53 = vunpack.i.h.bf16 %v1771_v48 }
  0xe7   : > { %v3707_v20 = vor.u32 %v3706_v60, %v3703_v9  ;;  %v1797_v50 = vsel %vm173_vm2, %v687_v37, 4286644096  ;;  %v1810_v59 = vsel %vm173_vm2, %v688_v4, 4286644096  ;;  %v1786_v61 = vunpack.i.l.bf16 %v1784_v12 }
  0xe8   : > { %v3721_v54 = vor.u32 %v3720_v63, %v3717_v1  ;;  %v1775_v38 = vmax.f32 %v1773_v26, %v1774_v53  ;;  %v1787_v33 = vunpack.i.h.bf16 %v1784_v12  ;;  %v1799_v13 = vunpack.i.l.bf16 %v1797_v50 }
  0xe9   : > { %v3708_v17 = vrot.slane %v3707_v20, 4  ;;  %v1800_v56 = vunpack.i.h.bf16 %v1797_v50  ;;  %v1812_v28 = vunpack.i.l.bf16 %v1810_v59  ;;  %v1813_v48 = vunpack.i.h.bf16 %v1810_v59 }
  0xea   : > { %v3722_v46 = vrot.slane %v3721_v54, 4  ;;  %v1776_v32 = vrot.slane %v1775_v38, 4  ;;  %v1788_v35 = vmax.f32 %v1786_v61, %v1787_v33  ;;  %v1823_v37 = vsel %vm173_vm2, %v8185_v25, 4286644096 }
  0xeb   : > { %v3713_v9 = vsel %vm7744_vm1, %v3708_v17, %v3712_v15  ;;  %v1801_v30 = vmax.f32 %v1799_v13, %v1800_v56  ;;  %v1836_v4 = vsel %vm173_vm2, %v8209_v58, 4286644096  ;;  %v1814_v63 = vmax.f32 %v1812_v28, %v1813_v48 }
  0xec   : > { %v3727_v60 = vsel %vm7744_vm1, %v3722_v46, %v3726_v27  ;;  %v1777_v26 = vmax.f32 %v1775_v38, %v1776_v32  ;;  %v1789_v1 = vrot.slane %v1788_v35, 4  ;;  %v1825_v12 = vunpack.i.l.bf16 %v1823_v37 }
  0xed   : > { %v6726_v53 = vcombine.low %v3713_v9, %v3727_v60  ;;  %v1802_v20 = vrot.slane %v1801_v30, 4  ;;  %v1826_v50 = vunpack.i.h.bf16 %v1823_v37  ;;  %v1815_v15 = vrot.slane %v1814_v63, 4 }
  0xee   : > { %v1778_v59 = vrot.slane %v1777_v26, 2  ;;  %v1790_v54 = vmax.f32 %v1788_v35, %v1789_v1  ;;  %v1838_v61 = vunpack.i.l.bf16 %v1836_v4  ;;  %v1839_v13 = vunpack.i.h.bf16 %v1836_v4 }
  0xef   : > { %7027 = vmatmul.mubr.msk.bf16.vlgmr.msra.gmra.mrb[0].mxu0 %vm2810_vm7, %v6726_v53  ;;  %v1803_v33 = vmax.f32 %v1801_v30, %v1802_v20  ;;  %v1827_v17 = vmax.f32 %v1825_v12, %v1826_v50  ;;  %v1849_v27 = vsel %vm173_vm2, %v711_v43, 4286644096  ;;  %v1816_v28 = vmax.f32 %v1814_v63, %v1815_v15 }
  0xf0   : > { %7035 = vmatpush3.bf16.msra.mxu0 %v8198_v55  ;;  %v1779_v38 = vmax.f32 %v1777_v26, %v1778_v59  ;;  %v1791_v56 = vrot.slane %v1790_v54, 2  ;;  %v1851_v46 = vunpack.i.l.bf16 %v1849_v27  ;;  %v1840_v48 = vmax.f32 %v1838_v61, %v1839_v13 }
  0xf1   : > { %v1804_v32 = vrot.slane %v1803_v33, 2  ;;  %v1828_v35 = vrot.slane %v1827_v17, 4  ;;  %v1852_v9 = vunpack.i.h.bf16 %v1849_v27  ;;  %v1817_v30 = vrot.slane %v1816_v28, 2 }
  0xf2   : > { %v1780_v37 = vrot.slane %v1779_v38, 1  ;;  %v1792_v60 = vmax.f32 %v1790_v54, %v1791_v56  ;;  %v1862_v25 = vsel %vm173_vm2, %v712_v23, 4286644096  ;;  %v1841_v1 = vrot.slane %v1840_v48, 4 }
  0xf3   : > { %v1805_v4 = vmax.f32 %v1803_v33, %v1804_v32  ;;  %v1829_v43 = vmax.f32 %v1827_v17, %v1828_v35  ;;  %v1853_v55 = vmax.f32 %v1851_v46, %v1852_v9  ;;  %v1818_v53 = vmax.f32 %v1816_v28, %v1817_v30 }
  0xf4   : > { %v8300_v26 = vmax.f32 %v1779_v38, %v1780_v37  ;;  %v1793_v63 = vrot.slane %v1792_v60, 1  ;;  %v1864_v20 = vunpack.i.l.bf16 %v1862_v25  ;;  %v1842_v59 = vmax.f32 %v1840_v48, %v1841_v1 }
  0xf5   : > { %v1806_v12 = vrot.slane %v1805_v4, 1  ;;  %v1830_v50 = vrot.slane %v1829_v43, 2  ;;  %v1854_v15 = vrot.slane %v1853_v55, 4  ;;  %v1819_v58 = vrot.slane %v1818_v53, 1 }
  0xf6   : > { %v1782_v54 = vpack.i.bf16 %v8300_v26, %v8300_v26  ;;  %v8304_v61 = vmax.f32 %v1792_v60, %v1793_v63  ;;  %v1865_v23 = vunpack.i.h.bf16 %v1862_v25  ;;  %v1843_v13 = vrot.slane %v1842_v59, 2 }
  0xf7   : > { %v8306_v33 = vmax.f32 %v1805_v4, %v1806_v12  ;;  %v1831_v17 = vmax.f32 %v1829_v43, %v1830_v50  ;;  %v1855_v27 = vmax.f32 %v1853_v55, %v1854_v15  ;;  %v8310_v56 = vmax.f32 %v1818_v53, %v1819_v58 }
  0xf8   : > { %v1795_v38 = vpack.i.bf16 %v8304_v61, %v8304_v61  ;;  %v1866_v28 = vmax.f32 %v1864_v20, %v1865_v23  ;;  %v1875_v46 = vsel %vm173_vm2, %v8203_v16, 4286644096  ;;  %v1844_v48 = vmax.f32 %v1842_v59, %v1843_v13 }
  0xf9   : > { %v1832_v35 = vrot.slane %v1831_v17, 1  ;;  %v1856_v9 = vrot.slane %v1855_v27, 2  ;;  %v1877_v30 = vunpack.i.l.bf16 %v1875_v46  ;;  %v1878_v25 = vunpack.i.h.bf16 %v1875_v46 }
  0xfa   : > { %v1867_v60 = vrot.slane %v1866_v28, 4  ;;  %v1845_v43 = vrot.slane %v1844_v48, 1  ;;  %v1888_v55 = vsel %vm173_vm2, %v8212_v34, 4286644096  ;;  %v1901_v58 = vsel %vm173_vm2, %v735_v49, 4286644096 }
  0xfb   : > { %v8318_v4 = vmax.f32 %v1831_v17, %v1832_v35  ;;  %v1857_v1 = vmax.f32 %v1855_v27, %v1856_v9  ;;  %v1879_v53 = vmax.f32 %v1877_v30, %v1878_v25  ;;  %v1890_v20 = vunpack.i.l.bf16 %v1888_v55 }
  0xfc   : > { %v1868_v63 = vmax.f32 %v1866_v28, %v1867_v60  ;;  %v1891_v12 = vunpack.i.h.bf16 %v1888_v55  ;;  %v8324_v59 = vmax.f32 %v1844_v48, %v1845_v43  ;;  %v1903_v27 = vunpack.i.l.bf16 %v1901_v58 }
  0xfd   : > { %v1858_v15 = vrot.slane %v1857_v1, 1  ;;  %v1880_v17 = vrot.slane %v1879_v53, 4  ;;  %v1904_v35 = vunpack.i.h.bf16 %v1901_v58  ;;  %v1914_v48 = vsel %vm173_vm2, %v736_v44, 4286644096 }
  0xfe   : > { %v1869_v23 = vrot.slane %v1868_v63, 2  ;;  %v1892_v13 = vmax.f32 %v1890_v20, %v1891_v12  ;;  %v1916_v30 = vunpack.i.l.bf16 %v1914_v48  ;;  %v1917_v43 = vunpack.i.h.bf16 %v1914_v48 }
  0xff   : > { %v8332_v46 = vmax.f32 %v1857_v1, %v1858_v15  ;;  %v1881_v60 = vmax.f32 %v1879_v53, %v1880_v17  ;;  %v1905_v25 = vmax.f32 %v1903_v27, %v1904_v35  ;;  %v1927_v55 = vsel %vm173_vm2, %v8220_v11, 4286644096 }
 0x100   : > { %v1870_v9 = vmax.f32 %v1868_v63, %v1869_v23  ;;  %v1893_v16 = vrot.slane %v1892_v13, 4  ;;  %v1929_v15 = vunpack.i.l.bf16 %v1927_v55  ;;  %v1918_v34 = vmax.f32 %v1916_v30, %v1917_v43 }
 0x101   : > { %v1882_v20 = vrot.slane %v1881_v60, 2  ;;  %v1906_v58 = vrot.slane %v1905_v25, 4  ;;  %v1930_v24 = vunpack.i.h.bf16 %v1927_v55  ;;  %v1940_v44 = vsel %vm173_vm2, %v8227_v2, 4286644096 }
 0x102   : > { %v1871_v1 = vrot.slane %v1870_v9, 1  ;;  %v1894_v12 = vmax.f32 %v1892_v13, %v1893_v16  ;;  %v1942_v17 = vunpack.i.l.bf16 %v1940_v44  ;;  %v1919_v35 = vrot.slane %v1918_v34, 4 }
 0x103   : > { %v1883_v53 = vmax.f32 %v1881_v60, %v1882_v20  ;;  %v1907_v27 = vmax.f32 %v1905_v25, %v1906_v58  ;;  %v1931_v48 = vmax.f32 %v1929_v15, %v1930_v24  ;;  %v1943_v49 = vunpack.i.h.bf16 %v1940_v44 }
 0x104   : > { %v8344_v63 = vmax.f32 %v1870_v9, %v1871_v1  ;;  %v1895_v23 = vrot.slane %v1894_v12, 2  ;;  %v1953_v30 = vsel %vm173_vm2, %v759_v40, 4286644096  ;;  %v1920_v9 = vmax.f32 %v1918_v34, %v1919_v35 }
 0x105   : > { %v1884_v13 = vrot.slane %v1883_v53, 1  ;;  %v1908_v43 = vrot.slane %v1907_v27, 2  ;;  %v1932_v55 = vrot.slane %v1931_v48, 4  ;;  %v1944_v60 = vmax.f32 %v1942_v17, %v1943_v49 }
 0x106   : > { %v1896_v16 = vmax.f32 %v1894_v12, %v1895_v23  ;;  %v1955_v20 = vunpack.i.l.bf16 %v1953_v30  ;;  %v1956_v24 = vunpack.i.h.bf16 %v1953_v30  ;;  %v1921_v58 = vrot.slane %v1920_v9, 2 }
 0x107   : > { %v8352_v1 = vmax.f32 %v1883_v53, %v1884_v13  ;;  %v1909_v15 = vmax.f32 %v1907_v27, %v1908_v43  ;;  %v1933_v44 = vmax.f32 %v1931_v48, %v1932_v55  ;;  %v1945_v28 = vrot.slane %v1944_v60, 4 }
 0x108   : > { %v1897_v25 = vrot.slane %v1896_v16, 1  ;;  %v1957_v11 = vmax.f32 %v1955_v20, %v1956_v24  ;;  %v1966_v40 = vsel %vm173_vm2, %v760_v62, 4286644096  ;;  %v1922_v34 = vmax.f32 %v1920_v9, %v1921_v58 }
 0x109   : > { %v1886_v12 = vpack.i.bf16 %v8352_v1, %v8352_v1  ;;  %v1910_v49 = vrot.slane %v1909_v15, 1  ;;  %v1934_v53 = vrot.slane %v1933_v44, 2  ;;  %v1946_v17 = vmax.f32 %v1944_v60, %v1945_v28 }
 0x10a   : > { %v8356_v23 = vmax.f32 %v1896_v16, %v1897_v25  ;;  %v1958_v35 = vrot.slane %v1957_v11, 4  ;;  %v1968_v48 = vunpack.i.l.bf16 %v1966_v40  ;;  %v1969_v13 = vunpack.i.h.bf16 %v1966_v40 }
 0x10b   : > { %v8364_v30 = vmax.f32 %v1909_v15, %v1910_v49  ;;  %v1923_v16 = vrot.slane %v1922_v34, 1  ;;  %v1935_v43 = vmax.f32 %v1933_v44, %v1934_v53  ;;  %v1947_v55 = vrot.slane %v1946_v17, 2 }
 0x10c   : > { %v1959_v25 = vmax.f32 %v1957_v11, %v1958_v35  ;;  %v1970_v20 = vmax.f32 %v1968_v48, %v1969_v13  ;;  %v1979_v2 = vsel %vm173_vm2, %v8235_v41, 4286644096  ;;  %v1992_v62 = vsel %vm173_vm2, %v8240_v31, 4286644096 }
 0x10d   : > { %v8372_v9 = vmax.f32 %v1922_v34, %v1923_v16  ;;  %v1936_v60 = vrot.slane %v1935_v43, 1  ;;  %v1948_v24 = vmax.f32 %v1946_v17, %v1947_v55  ;;  %v1981_v40 = vunpack.i.l.bf16 %v1979_v2 }
 0x10e   : > { %v1960_v15 = vrot.slane %v1959_v25, 2  ;;  %v1971_v58 = vrot.slane %v1970_v20, 4  ;;  %v1982_v44 = vunpack.i.h.bf16 %v1979_v2  ;;  %v1994_v35 = vunpack.i.l.bf16 %v1992_v62 }
 0x10f   : > { %v8376_v49 = vmax.f32 %v1935_v43, %v1936_v60  ;;  %v1949_v53 = vrot.slane %v1948_v24, 1  ;;  %v1995_v37 = vunpack.i.h.bf16 %v1992_v62  ;;  %v2005_v17 = vsel %vm173_vm2, %v783_v39, 4286644096 }
 0x110   : > { %v1961_v48 = vmax.f32 %v1959_v25, %v1960_v15  ;;  %v1972_v13 = vmax.f32 %v1970_v20, %v1971_v58  ;;  %v1983_v50 = vmax.f32 %v1981_v40, %v1982_v44  ;;  %v2018_v43 = vsel %vm173_vm2, %v784_v14, 4286644096 }
 0x111   : > { %v8380_v16 = vmax.f32 %v1948_v24, %v1949_v53  ;;  %v1996_v2 = vmax.f32 %v1994_v35, %v1995_v37  ;;  %v2007_v60 = vunpack.i.l.bf16 %v2005_v17  ;;  %v2008_v24 = vunpack.i.h.bf16 %v2005_v17 }
 0x112   : > { %v1962_v55 = vrot.slane %v1961_v48, 1  ;;  %v1973_v25 = vrot.slane %v1972_v13, 2  ;;  %v1984_v20 = vrot.slane %v1983_v50, 4  ;;  %v2020_v15 = vunpack.i.l.bf16 %v2018_v43 }
 0x113   : > { %v1997_v39 = vrot.slane %v1996_v2, 4  ;;  %v2009_v44 = vmax.f32 %v2007_v60, %v2008_v24  ;;  %v2021_v53 = vunpack.i.h.bf16 %v2018_v43  ;;  %v2031_v31 = vsel %vm173_vm2, %v8245_v3, 4286644096 }
 0x114   : > { %v8392_v58 = vmax.f32 %v1961_v48, %v1962_v55  ;;  %v1974_v41 = vmax.f32 %v1972_v13, %v1973_v25  ;;  %v1985_v40 = vmax.f32 %v1983_v50, %v1984_v20  ;;  %v2044_v14 = vsel %vm173_vm2, %v8250_v10, 4286644096 }
 0x115   : > { %v1998_v17 = vmax.f32 %v1996_v2, %v1997_v39  ;;  %v2010_v34 = vrot.slane %v2009_v44, 4  ;;  %v2022_v48 = vmax.f32 %v2020_v15, %v2021_v53  ;;  %v2033_v55 = vunpack.i.l.bf16 %v2031_v31 }
 0x116   : > { %v1975_v35 = vrot.slane %v1974_v41, 1  ;;  %v1986_v62 = vrot.slane %v1985_v40, 2  ;;  %v2034_v13 = vunpack.i.h.bf16 %v2031_v31  ;;  %v2046_v20 = vunpack.i.l.bf16 %v2044_v14 }
 0x117   : > { %v1999_v43 = vrot.slane %v1998_v17, 2  ;;  %v2011_v60 = vmax.f32 %v2009_v44, %v2010_v34  ;;  %v2023_v24 = vrot.slane %v2022_v48, 4  ;;  %v2047_v28 = vunpack.i.h.bf16 %v2044_v14 }
 0x118   : > { %v8400_v50 = vmax.f32 %v1974_v41, %v1975_v35  ;;  %v1987_v25 = vmax.f32 %v1985_v40, %v1986_v62  ;;  %v2035_v11 = vmax.f32 %v2033_v55, %v2034_v13  ;;  %v2057_v2 = vsel %vm173_vm2, %v807_v51, 4286644096 }
 0x119   : > { %v2000_v27 = vmax.f32 %v1998_v17, %v1999_v43  ;;  %v2012_v15 = vrot.slane %v2011_v60, 2  ;;  %v2024_v41 = vmax.f32 %v2022_v48, %v2023_v24  ;;  %v2048_v62 = vmax.f32 %v2046_v20, %v2047_v28 }
 0x11a   : > { %v1988_v37 = vrot.slane %v1987_v25, 1  ;;  %v2036_v39 = vrot.slane %v2035_v11, 4  ;;  %v2059_v44 = vunpack.i.l.bf16 %v2057_v2  ;;  %v2060_v53 = vunpack.i.h.bf16 %v2057_v2 }
 0x11b   : > { %v2001_v34 = vrot.slane %v2000_v27, 1  ;;  %v2013_v31 = vmax.f32 %v2011_v60, %v2012_v15  ;;  %v2025_v14 = vrot.slane %v2024_v41, 2  ;;  %v2049_v55 = vrot.slane %v2048_v62, 4 }
 0x11c   : > { %v8408_v40 = vmax.f32 %v1987_v25, %v1988_v37  ;;  %v2037_v35 = vmax.f32 %v2035_v11, %v2036_v39  ;;  %v2061_v3 = vmax.f32 %v2059_v44, %v2060_v53  ;;  %v2070_v51 = vsel %vm173_vm2, %v808_v18, 4286644096 }
 0x11d   : > { %v8412_v13 = vmax.f32 %v2000_v27, %v2001_v34  ;;  %v2014_v28 = vrot.slane %v2013_v31, 1  ;;  %v2026_v37 = vmax.f32 %v2024_v41, %v2025_v14  ;;  %v2050_v25 = vmax.f32 %v2048_v62, %v2049_v55 }
 0x11e   : > { %v2038_v48 = vrot.slane %v2037_v35, 2  ;;  %v2062_v11 = vrot.slane %v2061_v3, 4  ;;  %v2072_v20 = vunpack.i.l.bf16 %v2070_v51  ;;  %v2073_v60 = vunpack.i.h.bf16 %v2070_v51 }
 0x11f   : > { %v8420_v24 = vmax.f32 %v2013_v31, %v2014_v28  ;;  %v2027_v27 = vrot.slane %v2026_v37, 1  ;;  %v2051_v15 = vrot.slane %v2050_v25, 2  ;;  %v2083_v10 = vsel %vm173_vm2, %v8253_v42, 4286644096 }
 0x120   : > { %v2039_v2 = vmax.f32 %v2037_v35, %v2038_v48  ;;  %v2063_v39 = vmax.f32 %v2061_v3, %v2062_v11  ;;  %v2074_v34 = vmax.f32 %v2072_v20, %v2073_v60  ;;  %v2096_v18 = vsel %vm173_vm2, %v8258_v47, 4286644096 }
 0x121   : > { %v8428_v62 = vmax.f32 %v2026_v37, %v2027_v27  ;;  %v2052_v53 = vmax.f32 %v2050_v25, %v2051_v15  ;;  %v2085_v55 = vunpack.i.l.bf16 %v2083_v10  ;;  %v2086_v35 = vunpack.i.h.bf16 %v2083_v10 }
 0x122   : > { %v2040_v44 = vrot.slane %v2039_v2, 1  ;;  %v2064_v31 = vrot.slane %v2063_v39, 2  ;;  %v2075_v14 = vrot.slane %v2074_v34, 4  ;;  %v2098_v48 = vunpack.i.l.bf16 %v2096_v18 }
 0x123   : > { %v2053_v28 = vrot.slane %v2052_v53, 1  ;;  %v2087_v60 = vmax.f32 %v2085_v55, %v2086_v35  ;;  %v2099_v43 = vunpack.i.h.bf16 %v2096_v18  ;;  %v2109_v25 = vsel %vm173_vm2, %v831_v7, 4286644096 }
 0x124   : > { %v8432_v51 = vmax.f32 %v2039_v2, %v2040_v44  ;;  %v2065_v11 = vmax.f32 %v2063_v39, %v2064_v31  ;;  %v2076_v20 = vmax.f32 %v2074_v34, %v2075_v14  ;;  %v2122_v2 = vsel %vm173_vm2, %v832_v57, 4286644096 }
 0x125   : > { %v8436_v27 = vmax.f32 %v2052_v53, %v2053_v28  ;;  %v2088_v34 = vrot.slane %v2087_v60, 4  ;;  %v2100_v10 = vmax.f32 %v2098_v48, %v2099_v43  ;;  %v2111_v44 = vunpack.i.l.bf16 %v2109_v25 }
 0x126   : > { %v2066_v15 = vrot.slane %v2065_v11, 1  ;;  %v2077_v39 = vrot.slane %v2076_v20, 2  ;;  %v2112_v53 = vunpack.i.h.bf16 %v2109_v25  ;;  %v2124_v31 = vunpack.i.l.bf16 %v2122_v2 }
 0x127   : > { %v2089_v55 = vmax.f32 %v2087_v60, %v2088_v34  ;;  %v2101_v7 = vrot.slane %v2100_v10, 4  ;;  %v2125_v28 = vunpack.i.h.bf16 %v2122_v2  ;;  %v2135_v47 = vsel %vm173_vm2, %v8261_v29, 4286644096 }
 0x128   : > { %v8448_v14 = vmax.f32 %v2065_v11, %v2066_v15  ;;  %v2078_v42 = vmax.f32 %v2076_v20, %v2077_v39  ;;  %v2113_v35 = vmax.f32 %v2111_v44, %v2112_v53  ;;  %v2148_v57 = vsel %vm173_vm2, %v8272_v6, 4286644096 }
 0x129   : > { %v2090_v18 = vrot.slane %v2089_v55, 2  ;;  %v2102_v25 = vmax.f32 %v2100_v10, %v2101_v7  ;;  %v2126_v11 = vmax.f32 %v2124_v31, %v2125_v28  ;;  %v2137_v15 = vunpack.i.l.bf16 %v2135_v47 }
 0x12a   : > { %v2079_v48 = vrot.slane %v2078_v42, 1  ;;  %v2114_v37 = vrot.slane %v2113_v35, 4  ;;  %v2138_v20 = vunpack.i.h.bf16 %v2135_v47  ;;  %v2150_v34 = vunpack.i.l.bf16 %v2148_v57 }
 0x12b   : > { %v2091_v39 = vmax.f32 %v2089_v55, %v2090_v18  ;;  %v2103_v2 = vrot.slane %v2102_v25, 2  ;;  %v2127_v53 = vrot.slane %v2126_v11, 4  ;;  %v2151_v41 = vunpack.i.h.bf16 %v2148_v57 }
 0x12c   : > { %v8456_v60 = vmax.f32 %v2078_v42, %v2079_v48  ;;  %v2115_v44 = vmax.f32 %v2113_v35, %v2114_v37  ;;  %v2139_v3 = vmax.f32 %v2137_v15, %v2138_v20  ;;  %v2161_v10 = vsel %vm173_vm2, %v855_v19, 4286644096 }
 0x12d   : > { %v2092_v43 = vrot.slane %v2091_v39, 1  ;;  %v2104_v32 = vmax.f32 %v2102_v25, %v2103_v2  ;;  %v2128_v42 = vmax.f32 %v2126_v11, %v2127_v53  ;;  %v2152_v18 = vmax.f32 %v2150_v34, %v2151_v41 }
 0x12e   : > { %v2081_v17 = vpack.i.bf16 %v8456_v60, %v8456_v60  ;;  %v2116_v31 = vrot.slane %v2115_v44, 2  ;;  %v2140_v7 = vrot.slane %v2139_v3, 4  ;;  %v2163_v35 = vunpack.i.l.bf16 %v2161_v10 }
 0x12f   : > { %v8464_v55 = vmax.f32 %v2091_v39, %v2092_v43  ;;  %v2105_v37 = vrot.slane %v2104_v32, 1  ;;  %v2164_v28 = vunpack.i.h.bf16 %v2161_v10  ;;  %v2129_v57 = vrot.slane %v2128_v42, 2 }
 0x130   : > { %v2117_v47 = vmax.f32 %v2115_v44, %v2116_v31  ;;  %v2141_v48 = vmax.f32 %v2139_v3, %v2140_v7  ;;  %v2153_v15 = vrot.slane %v2152_v18, 4  ;;  %v2174_v19 = vsel %vm173_vm2, %v856_v36, 4286644096 }
 0x131   : > { %v2094_v25 = vpack.i.bf16 %v8464_v55, %v8464_v55  ;;  %v8468_v20 = vmax.f32 %v2104_v32, %v2105_v37  ;;  %v2165_v29 = vmax.f32 %v2163_v35, %v2164_v28  ;;  %v2130_v43 = vmax.f32 %v2128_v42, %v2129_v57 }
 0x132   : > { %v2118_v41 = vrot.slane %v2117_v47, 1  ;;  %v2142_v11 = vrot.slane %v2141_v48, 2  ;;  %v2154_v39 = vmax.f32 %v2152_v18, %v2153_v15  ;;  %v2176_v34 = vunpack.i.l.bf16 %v2174_v19 }
 0x133   : > { %v2107_v2 = vpack.i.bf16 %v8468_v20, %v8468_v20  ;;  %v2166_v3 = vrot.slane %v2165_v29, 4  ;;  %v2177_v44 = vunpack.i.h.bf16 %v2174_v19  ;;  %v2131_v10 = vrot.slane %v2130_v43, 1 }
 0x134   : > { %v2119_v53 = vmax.f32 %v2117_v47, %v2118_v41  ;;  %v2143_v32 = vmax.f32 %v2141_v48, %v2142_v11  ;;  %v2155_v31 = vrot.slane %v2154_v39, 2  ;;  %v2980_v6 = vsel %vm2810_vm7, %v1782_v54, 4286644096 }
 0x135   : > { %v2167_v7 = vmax.f32 %v2165_v29, %v2166_v3  ;;  %v2178_v37 = vmax.f32 %v2176_v34, %v2177_v44  ;;  %v2983_v36 = vsel %vm2810_vm7, %v1886_v12, 4286644096  ;;  %v2132_v18 = vmax.f32 %v2130_v43, %v2131_v10 }
 0x136   : > { %v2120_v42 = vpack.i.bf16 %v2119_v53, %v2119_v53  ;;  %v2144_v35 = vrot.slane %v2143_v32, 1  ;;  %v2156_v28 = vmax.f32 %v2154_v39, %v2155_v31  ;;  %v8484_v48 = vmax.bf16 %v2983_v36, %v2980_v6 }
 0x137   : > { %v2168_v47 = vrot.slane %v2167_v7, 2  ;;  %v2179_v57 = vrot.slane %v2178_v37, 4  ;;  %v2987_v26 = vsel %vm2810_vm7, %v1795_v38, 4286644096  ;;  %v2133_v15 = vpack.i.bf16 %v2132_v18, %v2132_v18 }
 0x138   : > { %v2145_v54 = vmax.f32 %v2143_v32, %v2144_v35  ;;  %v2157_v20 = vrot.slane %v2156_v28, 1  ;;  %v10071_v1 = vpack.i.bf16 %v8356_v23, %v8356_v23  ;;  %v10072_v43 = vpack.i.bf16 %v8306_v33, %v8306_v33 }
 0x139   : > { %v2169_v29 = vmax.f32 %v2167_v7, %v2168_v47  ;;  %v2180_v19 = vmax.f32 %v2178_v37, %v2179_v57  ;;  %v10073_v38 = vpack.i.bf16 %v8364_v30, %v8364_v30  ;;  %v10074_v23 = vpack.i.bf16 %v8310_v56, %v8310_v56 }
 0x13a   : > { %v2990_v12 = vsel %vm2810_vm7, %v10071_v1, 4286644096  ;;  %v2994_v11 = vsel %vm2810_vm7, %v10072_v43, 4286644096  ;;  %v2146_v61 = vpack.i.bf16 %v2145_v54, %v2145_v54  ;;  %v2158_v39 = vmax.f32 %v2156_v28, %v2157_v20 }
 0x13b   : > { %v8494_v41 = vmax.bf16 %v2990_v12, %v2987_v26  ;;  %v2997_v3 = vsel %vm2810_vm7, %v10073_v38, 4286644096  ;;  %v3001_v34 = vsel %vm2810_vm7, %v10074_v23, 4286644096  ;;  %v2170_v44 = vrot.slane %v2169_v29, 1 }
 0x13c   : > { %v2181_v53 = vrot.slane %v2180_v19, 2  ;;  %v2999_v10 = vmax.bf16 %v2997_v3, %v2994_v11  ;;  %v10075_v33 = vpack.i.bf16 %v8372_v9, %v8372_v9  ;;  %v2159_v31 = vpack.i.bf16 %v2158_v39, %v2158_v39 }
 0x13d   : > { %v10076_v30 = vpack.i.bf16 %v8318_v4, %v8318_v4  ;;  %v10077_v56 = vpack.i.bf16 %v8376_v49, %v8376_v49  ;;  %v2171_v36 = vmax.f32 %v2169_v29, %v2170_v44  ;;  %v10078_v9 = vpack.i.bf16 %v8324_v59, %v8324_v59 }
 0x13e   : > { %v3004_v32 = vsel %vm2810_vm7, %v10075_v33, 4286644096  ;;  %v2182_v18 = vmax.f32 %v2180_v19, %v2181_v53  ;;  %v10079_v47 = vpack.i.bf16 %v8380_v16, %v8380_v16  ;;  %v10080_v57 = vpack.i.bf16 %v8332_v46, %v8332_v46 }
 0x13f   : > { %v3006_v7 = vmax.bf16 %v3004_v32, %v3001_v34  ;;  %v3008_v37 = vsel %vm2810_vm7, %v10076_v30, 4286644096  ;;  %v3011_v6 = vsel %vm2810_vm7, %v10077_v56, 4286644096  ;;  %v3015_v28 = vsel %vm2810_vm7, %v10078_v9, 4286644096 }
 0x140   : > { %v3013_v35 = vmax.bf16 %v3011_v6, %v3008_v37  ;;  %v3018_v4 = vsel %vm2810_vm7, %v10079_v47, 4286644096  ;;  %v3022_v49 = vsel %vm2810_vm7, %v10080_v57, 4286644096  ;;  %v10081_v26 = vpack.i.bf16 %v8392_v58, %v8392_v58 }
 0x141   : > { %v6676_v59 = vcombine.low %v8484_v48, %v8484_v48  ;;  %v2172_v20 = vpack.i.bf16 %v2171_v36, %v2171_v36  ;;  %v2183_v1 = vrot.slane %v2182_v18, 1  ;;  %v3020_v12 = vmax.bf16 %v3018_v4, %v3015_v28 }
 0x142   : > { %v3025_v54 = vsel %vm2810_vm7, %v10081_v26, 4286644096  ;;  %v10082_v16 = vpack.i.bf16 %v8344_v63, %v8344_v63  ;;  %v10083_v46 = vpack.i.bf16 %v8400_v50, %v8400_v50  ;;  %v10084_v58 = vpack.i.bf16 %v8408_v40, %v8408_v40 }
 0x143   : > { %v3027_v29 = vmax.bf16 %v3025_v54, %v3022_v49  ;;  %v6677_v48 = vcombine.low %v8494_v41, %v8494_v41  ;;  %v2184_v39 = vmax.f32 %v2182_v18, %v2183_v1  ;;  %v3039_v63 = vsel %vm2810_vm7, %v2094_v25, 4286644096 }
 0x144   : > { %v3029_v19 = vsel %vm2810_vm7, %v10082_v16, 4286644096  ;;  %v3032_v43 = vsel %vm2810_vm7, %v10083_v46, 4286644096  ;;  %v3036_v11 = vsel %vm2810_vm7, %v10084_v58, 4286644096  ;;  %v10085_v50 = vpack.i.bf16 %v8412_v13, %v8412_v13 }
 0x145   : > { %v8552_v38 = vmax.bf16 %v3032_v43, %v3029_v19  ;;  %v3041_v23 = vmax.bf16 %v3039_v63, %v3036_v11  ;;  %v3046_v40 = vsel %vm2810_vm7, %v2107_v2, 4286644096  ;;  %v10086_v34 = vpack.i.bf16 %v8420_v24, %v8420_v24  ;;  %v199_v63 = vld [vmem:[#allocation2 + $0x30] sm:$0x1] }
 0x146   : > { %v3043_v3 = vsel %vm2810_vm7, %v10085_v50, 4286644096  ;;  %v3053_v44 = vsel %vm2810_vm7, %v2120_v42, 4286644096  ;;  %v2185_v53 = vpack.i.bf16 %v2184_v39, %v2184_v39  ;;  %v10087_v25 = vpack.i.bf16 %v8428_v62, %v8428_v62 }
 0x147   : > { %v3050_v41 = vsel %vm2810_vm7, %v10086_v34, 4286644096  ;;  %v3048_v33 = vmax.bf16 %v3046_v40, %v3043_v3  ;;  %v3060_v32 = vsel %vm2810_vm7, %v2133_v15, 4286644096  ;;  %v10088_v2 = vpack.i.bf16 %v8432_v51, %v8432_v51  ;;  %v3625_v40 = vld [vmem:[#allocation2 + $0x24] sm:$0x1] }
 0x148   : > { %v3055_v55 = vmax.bf16 %v3053_v44, %v3050_v41  ;;  %v3057_v13 = vsel %vm2810_vm7, %v10087_v25, 4286644096  ;;  %v3067_v24 = vsel %vm2810_vm7, %v2146_v61, 4286644096  ;;  %v6678_v37 = vcombine.low %v2999_v10, %v2999_v10  ;;  %v3631_v34 = vld [vmem:[#allocation2 + $0x2c] sm:$0x1] }
 0x149   : > { %v3064_v30 = vsel %vm2810_vm7, %v10088_v2, 4286644096  ;;  %v3062_v56 = vmax.bf16 %v3060_v32, %v3057_v13  ;;  %v10089_v6 = vpack.i.bf16 %v8436_v27, %v8436_v27  ;;  %v3074_v62 = vsel %vm2810_vm7, %v2159_v31, 4286644096 }
 0x14a   : > { %v3069_v42 = vmax.bf16 %v3067_v24, %v3064_v30  ;;  %v10090_v15 = vpack.i.bf16 %v8448_v14, %v8448_v14  ;;  %v3081_v9 = vsel %vm2810_vm7, %v2172_v20, 4286644096  ;;  %v3085_v61 = vsel %vm2810_vm7, %v2081_v17, 4286644096 }
 0x14b   : > { %v3071_v36 = vsel %vm2810_vm7, %v10089_v6, 4286644096  ;;  %v3088_v27 = vsel %vm2810_vm7, %v2185_v53, 4286644096  ;;  %v6679_v28 = vcombine.low %v3006_v7, %v3006_v7  ;;  %v6680_v47 = vcombine.low %v3013_v35, %v3013_v35  ;;  %v231_v53 = vld [vmem:[#allocation2 + $0x34] sm:$0x1] }
 0x14c   : > { %v3076_v18 = vmax.bf16 %v3074_v62, %v3071_v36  ;;  %v3078_v51 = vsel %vm2810_vm7, %v10090_v15, 4286644096  ;;  %v3090_v4 = vmax.bf16 %v3088_v27, %v3085_v61  ;;  %v6681_v31 = vcombine.low %v3020_v12, %v3020_v12  ;;  %v202_v12 = vld [vmem:[#allocation2 + $0x38] sm:$0x1] }
 0x14d   : > { %v3083_v10 = vmax.bf16 %v3081_v9, %v3078_v51  ;;  %v6682_v57 = vcombine.low %v3027_v29, %v3027_v29  ;;  %v6684_v49 = vcombine.low %v3041_v23, %v3041_v23  ;;  %v6685_v26 = vcombine.low %v3048_v33, %v3048_v33  ;;  %v234_v33 = vld [vmem:[#allocation2 + $0x3c] sm:$0x1]  ;;  %v6640_v2 = vld.sshfl [vmem:[%s7573_s5 + $0x50] sm:$0x33 pattern:$0x75316420] }
 0x14e   : > { %v6686_v14 = vcombine.low %v3055_v55, %v3055_v55  ;;  %v6687_v54 = vcombine.low %v3062_v56, %v3062_v56  ;;  %v6688_v1 = vcombine.low %v3069_v42, %v3069_v42  ;;  %v6689_v16 = vcombine.low %v3076_v18, %v3076_v18  ;;  %v6641_v56 = vld.sshfl [vmem:[%s7573_s5 + $0x54] sm:$0x33 pattern:$0x75316420] }
 0x14f   : > { %v6690_v20 = vcombine.low %v3083_v10, %v3083_v10  ;;  %v3475_v19 = vunpack.c.l.b16 %v6676_v59  ;;  %v3476_v46 = vunpack.c.l.b16 %v6677_v48  ;;  %v3477_v60 = vunpack.c.l.b16 %v6678_v37  ;;  %v6642_v18 = vld.sshfl [vmem:[%s7573_s5 + $0x58] sm:$0x33 pattern:$0x75316420] }
 0x150   : > { %v3478_v43 = vunpack.c.l.b16 %v6679_v28  ;;  %v3479_v17 = vunpack.c.l.b16 %v6680_v47  ;;  %v3480_v58 = vunpack.c.l.b16 %v6681_v31  ;;  %v3481_v11 = vunpack.c.l.b16 %v6682_v57  ;;  %v6643_v9 = vld.sshfl [vmem:[%s7573_s5 + $0x5c] sm:$0x33 pattern:$0x75316420]  ;;  %v3622_v47 = vld [vmem:[#allocation2 + $0x20] sm:$0xf] }
 0x151   : > { %v3483_v39 = vunpack.c.l.b16 %v6684_v49  ;;  %v3484_v7 = vunpack.c.l.b16 %v6685_v26  ;;  %v3485_v35 = vunpack.c.l.b16 %v6686_v14  ;;  %v3486_v29 = vunpack.c.l.b16 %v6687_v54  ;;  %v8629_v49 = vld [vmem:[#allocation2 + $0x14] sm:$0x1] }
 0x152   : > { %v3487_v50 = vunpack.c.l.b16 %v6688_v1  ;;  %v3488_v3 = vunpack.c.l.b16 %v6689_v16  ;;  %v3489_v23 = vunpack.c.l.b16 %v6690_v20  ;;  %v3539_v59 = vsel %vm3515_vm8, %v3476_v46, %v3475_v19  ;;  %v6644_v1 = vld.sshfl [vmem:[%s7573_s5 + $0x60] sm:$0x33 pattern:$0x75316420]  ;;  %v8636_v20 = vld [vmem:[#allocation2 + $0x1c] sm:$0x1] }
 0x153   : > { %v3545_v48 = vsel %vm3515_vm8, %v3484_v7, %v3483_v39  ;;  %v6921_v41 = vcombine.low %v8552_v38, %v8552_v38  ;;  %v6922_v44 = vcombine.low %v3090_v4, %v3090_v4  ;;  %v3540_v55 = vsel %vm3517_vm9, %v3477_v60, %v3539_v59  ;;  %v3628_v4 = vld [vmem:[#allocation2 + $0x28] sm:$0xf]  ;;  %v6645_v46 = vld.sshfl [vmem:[%s7573_s5 + $0x64] sm:$0x33 pattern:$0x75316420] }
 0x154   : > { %v3546_v25 = vsel %vm3517_vm9, %v3485_v35, %v3545_v48  ;;  %v200_v13 = vsel %vm7551_vm4, 0, %v199_v63  ;;  %v203_v32 = vsel %vm7551_vm4, 0, %v202_v12  ;;  %v3541_v30 = vsel %vm3519_vm10, %v3478_v43, %v3540_v55  ;;  %v6646_v35 = vld.sshfl [vmem:[%s7573_s5 + $0x68] sm:$0x33 pattern:$0x75316420] }
 0x155   : > { %v3547_v24 = vsel %vm3519_vm10, %v3486_v29, %v3546_v25  ;;  %v3626_v38 = vsel %vm7551_vm4, %v6921_v41, %v3625_v40  ;;  %v3632_v37 = vsel %vm7551_vm4, %v6922_v44, %v3631_v34  ;;  %201 = vst [vmem:[#allocation2 + $0x30] sm:$0x1] %v200_v13  ;;  %204 = vst [vmem:[#allocation2 + $0x38] sm:$0x1] %v203_v32  ;;  %v232_v36 = vsel %vm7561_vm6, 0, %v231_v53 }
 0x156   : > { %v3542_v42 = vsel %vm3521_vm11, %v3479_v17, %v3541_v30  ;;  %v3548_v6 = vsel %vm3521_vm11, %v3487_v50, %v3547_v24  ;;  %3627 = vst [vmem:[#allocation2 + $0x24] sm:$0x1] %v3626_v38  ;;  %3633 = vst [vmem:[#allocation2 + $0x2c] sm:$0x1] %v3632_v37  ;;  %v235_v62 = vsel %vm7561_vm6, 0, %v234_v33  ;;  %v864_v61 = vcombine.high %v6640_v2, %v6640_v2 }
 0x157   : > { %v3543_v15 = vsel %vm3523_vm12, %v3480_v58, %v3542_v42  ;;  %v3549_v51 = vsel %vm3523_vm12, %v3488_v3, %v3548_v6  ;;  %233 = vst [vmem:[#allocation2 + $0x34] sm:$0x1] %v232_v36  ;;  %236 = vst [vmem:[#allocation2 + $0x3c] sm:$0x1] %v235_v62  ;;  %v8622_v10 = vrot.slane %v6640_v2, %v7579_v21 }
 0x158   : > { %v3544_v27 = vsel %vm3525_vm13, %v3481_v11, %v3543_v15  ;;  %v3550_v28 = vsel %vm3525_vm13, %v3489_v23, %v3549_v51  ;;  %v888_v31 = vcombine.high %v6641_v56, %v6641_v56  ;;  %v8627_v57 = vrot.slane %v6641_v56, %v7579_v21  ;;  %v6647_v53 = vld.sshfl [vmem:[%s7573_s5 + $0x6c] sm:$0x33 pattern:$0x75316420] }
 0x159   : > { %v3575_v14 = vpack.c.b16 %v3544_v27, %v3544_v27  ;;  %v3577_v54 = vpack.c.b16 %v3550_v28, %v3550_v28  ;;  %v8634_v16 = vrot.slane %v864_v61, %v7579_v21  ;;  %v879_v60 = vcombine.high %v8622_v10, %v8622_v10 }
 0x15a   : > { %v912_v43 = vcombine.high %v6642_v18, %v6642_v18  ;;  %v8643_v17 = vrot.slane %v6642_v18, %v7579_v21  ;;  %v8650_v39 = vrot.slane %v888_v31, %v7579_v21  ;;  %v936_v7 = vcombine.high %v6643_v9, %v6643_v9 }
 0x15b   : > { %v3623_v58 = vsel %vm7732_vm3, %v3575_v14, %v3622_v47  ;;  %v3629_v11 = vsel %vm7732_vm3, %v3577_v54, %v3628_v4  ;;  %v880_v63 = vcombine.high %v8634_v16, %v8634_v16  ;;  %v903_v12 = vcombine.high %v8627_v57, %v8627_v57 }
 0x15c   : > { %3624 = vst [vmem:[#allocation2 + $0x20] sm:$0xf] %v3623_v58  ;;  %3630 = vst [vmem:[#allocation2 + $0x28] sm:$0xf] %v3629_v11  ;;  %v8658_v29 = vrot.slane %v912_v43, %v7579_v21  ;;  %v8661_v50 = vrot.slane %v6643_v9, %v7579_v21  ;;  %v904_v40 = vcombine.high %v8650_v39, %v8650_v39  ;;  %v2187_v51 = vsel %vm173_vm2, %v8622_v10, 4286644096 }
 0x15d   : > { %v3665_v3 = vld [vmem:[#allocation2 + $0x24] sm:$0x1]  ;;  %v3666_v23 = vld [vmem:[#allocation2 + $0x2c] sm:$0x1]  ;;  %v960_v34 = vcombine.high %v6644_v1, %v6644_v1  ;;  %v8666_v59 = vrot.slane %v6644_v1, %v7579_v21  ;;  %v984_v48 = vcombine.high %v6645_v46, %v6645_v46  ;;  %v927_v33 = vcombine.high %v8643_v17, %v8643_v17 }
 0x15e   : > { %v3738_v41 = vshll.u32 %v3665_v3, 16  ;;  %v3752_v44 = vshll.u32 %v3666_v23, 16  ;;  %v8672_v55 = vrot.slane %v936_v7, %v7579_v21  ;;  %v928_v25 = vcombine.high %v8658_v29, %v8658_v29 }
 0x15f   : > { %v951_v13 = vcombine.high %v8661_v50, %v8661_v50  ;;  %v8679_v32 = vrot.slane %v960_v34, %v7579_v21  ;;  %v8682_v2 = vrot.slane %v6645_v46, %v7579_v21  ;;  %v975_v38 = vcombine.high %v8666_v59, %v8666_v59 }
 0x160   : > { %v3740_v30 = vrot.slane %v3738_v41, 5  ;;  %v952_v24 = vcombine.high %v8672_v55, %v8672_v55  ;;  %v1008_v37 = vcombine.high %v6646_v35, %v6646_v35  ;;  %v3754_v56 = vrot.slane %v3752_v44, 5 }
 0x161   : > { %v8689_v42 = vrot.slane %v984_v48, %v7579_v21  ;;  %v8692_v6 = vrot.slane %v6646_v35, %v7579_v21  ;;  %v1032_v36 = vcombine.high %v6647_v53, %v6647_v53  ;;  %v976_v62 = vcombine.high %v8679_v32, %v8679_v32 }
 0x162   : > { %v999_v18 = vcombine.high %v8682_v2, %v8682_v2  ;;  %v8699_v15 = vrot.slane %v1008_v37, %v7579_v21  ;;  %v8710_v28 = vrot.slane %v6647_v53, %v7579_v21  ;;  %v2189_v47 = vunpack.i.l.bf16 %v2187_v51 }
 0x163   : > { %v8703_v9 = vld [vmem:[#allocation2 + $0x20] sm:$0xf]  ;;  %v8705_v61 = vld [vmem:[#allocation2 + $0x28] sm:$0xf]  ;;  %v1000_v27 = vcombine.high %v8689_v42, %v8689_v42  ;;  %v2190_v4 = vunpack.i.h.bf16 %v2187_v51  ;;  %v1023_v1 = vcombine.high %v8692_v6, %v8692_v6  ;;  %v8721_v43 = vrot.slane %v1032_v36, %v7579_v21 }
 0x164   : > { %v3729_v31 = vshrl.u32 %v8703_v9, 16  ;;  %v3732_v14 = vshll.u32 %v8703_v9, 16  ;;  %v3743_v54 = vshrl.u32 %v8705_v61, 16  ;;  %v3746_v10 = vshll.u32 %v8705_v61, 16 }
 0x165   : > { %v2191_v58 = vmax.f32 %v2189_v47, %v2190_v4  ;;  %v2200_v48 = vsel %vm173_vm2, %v8634_v16, 4286644096  ;;  %v2213_v41 = vsel %vm173_vm2, %v879_v60, 4286644096  ;;  %v2226_v4 = vsel %vm173_vm2, %v880_v63, 4286644096 }
 0x166   : > { %v3731_v11 = vrot.slane %v3729_v31, 4  ;;  %v3734_v7 = vrot.slane %v3732_v14, 5  ;;  %v3745_v35 = vrot.slane %v3743_v54, 4  ;;  %v3748_v3 = vrot.slane %v3746_v10, 5 }
 0x167   : > { %v2192_v34 = vrot.slane %v2191_v58, 4  ;;  %v2202_v37 = vunpack.i.l.bf16 %v2200_v48  ;;  %v2203_v51 = vunpack.i.h.bf16 %v2200_v48  ;;  %v2215_v19 = vunpack.i.l.bf16 %v2213_v41 }
 0x168   : > { %v3735_v44 = vor.u32 %v3734_v7, %v3731_v11  ;;  %v3749_v53 = vor.u32 %v3748_v3, %v3745_v35  ;;  %v2216_v47 = vunpack.i.h.bf16 %v2213_v41  ;;  %v2228_v10 = vunpack.i.l.bf16 %v2226_v4 }
 0x169   : > { %v2193_v36 = vmax.f32 %v2191_v58, %v2192_v34  ;;  %v2204_v54 = vmax.f32 %v2202_v37, %v2203_v51  ;;  %v2229_v46 = vunpack.i.h.bf16 %v2226_v4  ;;  %v2239_v16 = vsel %vm173_vm2, %v8627_v57, 4286644096 }
 0x16a   : > { %v3736_v31 = vrot.slane %v3735_v44, 4  ;;  %v3750_v14 = vrot.slane %v3749_v53, 4  ;;  %v2217_v23 = vmax.f32 %v2215_v19, %v2216_v47  ;;  %v2241_v7 = vunpack.i.l.bf16 %v2239_v16  ;;  %v8745_v47 = vld [vmem:[%s10035_s1 + $0x4] sm:$0x3] }
 0x16b   : > { %v2194_v26 = vrot.slane %v2193_v36, 2  ;;  %v2205_v11 = vrot.slane %v2204_v54, 4  ;;  %v2230_v34 = vmax.f32 %v2228_v10, %v2229_v46  ;;  %v2242_v41 = vunpack.i.h.bf16 %v2239_v16  ;;  %7317 = vmatprep.subr.msk.bf16.mxu0 %vm3810_vm0, %v8745_v47 }
 0x16c   : > { %v3741_v60 = vsel %vm7744_vm1, %v3736_v31, %v3740_v30  ;;  %v3755_v58 = vsel %vm7744_vm1, %v3750_v14, %v3754_v56  ;;  %v2218_v3 = vrot.slane %v2217_v23, 4  ;;  %v2252_v19 = vsel %vm173_vm2, %v8650_v39, 4286644096 }
 0x16d   : > { %v6727_v35 = vcombine.low %v3741_v60, %v3755_v58  ;;  %v2195_v63 = vmax.f32 %v2193_v36, %v2194_v26  ;;  %v2206_v48 = vmax.f32 %v2204_v54, %v2205_v11  ;;  %v2265_v44 = vsel %vm173_vm2, %v903_v12, 4286644096 }
 0x16e   : > { %v2219_v56 = vmax.f32 %v2217_v23, %v2218_v3  ;;  %v2231_v53 = vrot.slane %v2230_v34, 4  ;;  %v2254_v37 = vunpack.i.l.bf16 %v2252_v19  ;;  %v2243_v26 = vmax.f32 %v2241_v7, %v2242_v41 }
 0x16f   : > { %7030 = vmatprep.mubr.msk.bf16.mxu0 %vm2810_vm7, %v6727_v35  ;;  %v2196_v30 = vrot.slane %v2195_v63, 1  ;;  %v2207_v51 = vrot.slane %v2206_v48, 2  ;;  %v2255_v36 = vunpack.i.h.bf16 %v2252_v19  ;;  %v2267_v46 = vunpack.i.l.bf16 %v2265_v44 }
 0x170   : > { %v2220_v4 = vrot.slane %v2219_v56, 2  ;;  %v2232_v12 = vmax.f32 %v2230_v34, %v2231_v53  ;;  %v2268_v31 = vunpack.i.h.bf16 %v2265_v44  ;;  %v2244_v14 = vrot.slane %v2243_v26, 4 }
 0x171   : > { %v2208_v23 = vmax.f32 %v2206_v48, %v2207_v51  ;;  %v2256_v54 = vmax.f32 %v2254_v37, %v2255_v36  ;;  %v2278_v10 = vsel %vm173_vm2, %v904_v40, 4286644096  ;;  %v8755_v16 = vmax.f32 %v2195_v63, %v2196_v30 }
 0x172   : > { %v2221_v60 = vmax.f32 %v2219_v56, %v2220_v4  ;;  %v2233_v58 = vrot.slane %v2232_v12, 2  ;;  %v2269_v11 = vmax.f32 %v2267_v46, %v2268_v31  ;;  %v2245_v35 = vmax.f32 %v2243_v26, %v2244_v14 }
 0x173   : > { %v2209_v7 = vrot.slane %v2208_v23, 1  ;;  %v2257_v3 = vrot.slane %v2256_v54, 4  ;;  %v2280_v34 = vunpack.i.l.bf16 %v2278_v10  ;;  %v2281_v48 = vunpack.i.h.bf16 %v2278_v10 }
 0x174   : > { %v2222_v41 = vrot.slane %v2221_v60, 1  ;;  %v2234_v19 = vmax.f32 %v2232_v12, %v2233_v58  ;;  %v2270_v44 = vrot.slane %v2269_v11, 4  ;;  %v2246_v37 = vrot.slane %v2245_v35, 2 }
 0x175   : > { %v8757_v53 = vmax.f32 %v2208_v23, %v2209_v7  ;;  %v2258_v51 = vmax.f32 %v2256_v54, %v2257_v3  ;;  %v2291_v39 = vsel %vm173_vm2, %v8643_v17, 4286644096  ;;  %v2282_v56 = vmax.f32 %v2280_v34, %v2281_v48 }
 0x176   : > { %v8761_v40 = vmax.f32 %v2221_v60, %v2222_v41  ;;  %v2235_v63 = vrot.slane %v2234_v19, 1  ;;  %v2271_v30 = vmax.f32 %v2269_v11, %v2270_v44  ;;  %v2247_v36 = vmax.f32 %v2245_v35, %v2246_v37 }
 0x177   : > { %v2259_v46 = vrot.slane %v2258_v51, 2  ;;  %v2293_v4 = vunpack.i.l.bf16 %v2291_v39  ;;  %v2283_v14 = vrot.slane %v2282_v56, 4  ;;  %v2294_v60 = vunpack.i.h.bf16 %v2291_v39 }
 0x178   : > { %v8767_v31 = vmax.f32 %v2234_v19, %v2235_v63  ;;  %v2272_v23 = vrot.slane %v2271_v30, 2  ;;  %v2248_v54 = vrot.slane %v2247_v36, 1  ;;  %v2304_v58 = vsel %vm173_vm2, %v8658_v29, 4286644096 }
 0x179   : > { %v2260_v10 = vmax.f32 %v2258_v51, %v2259_v46  ;;  %v2284_v35 = vmax.f32 %v2282_v56, %v2283_v14  ;;  %v2306_v3 = vunpack.i.l.bf16 %v2304_v58  ;;  %v2295_v44 = vmax.f32 %v2293_v4, %v2294_v60 }
 0x17a   : > { %v2273_v7 = vmax.f32 %v2271_v30, %v2272_v23  ;;  %v8773_v34 = vmax.f32 %v2247_v36, %v2248_v54  ;;  %v2307_v19 = vunpack.i.h.bf16 %v2304_v58  ;;  %v2317_v51 = vsel %vm173_vm2, %v927_v33, 4286644096 }
 0x17b   : > { %v2261_v41 = vrot.slane %v2260_v10, 1  ;;  %v2285_v37 = vrot.slane %v2284_v35, 2  ;;  %v2330_v39 = vsel %vm173_vm2, %v928_v25, 4286644096  ;;  %v2296_v56 = vrot.slane %v2295_v44, 4 }
 0x17c   : > { %v2274_v48 = vrot.slane %v2273_v7, 1  ;;  %v2308_v36 = vmax.f32 %v2306_v3, %v2307_v19  ;;  %v2319_v23 = vunpack.i.l.bf16 %v2317_v51  ;;  %v2320_v14 = vunpack.i.h.bf16 %v2317_v51 }
 0x17d   : > { %v8785_v30 = vmax.f32 %v2260_v10, %v2261_v41  ;;  %v2286_v4 = vmax.f32 %v2284_v35, %v2285_v37  ;;  %v2297_v33 = vmax.f32 %v2295_v44, %v2296_v56  ;;  %v2332_v29 = vunpack.i.l.bf16 %v2330_v39 }
 0x17e   : > { %v8787_v46 = vmax.f32 %v2273_v7, %v2274_v48  ;;  %v2309_v54 = vrot.slane %v2308_v36, 4  ;;  %v2321_v58 = vmax.f32 %v2319_v23, %v2320_v14  ;;  %v2333_v10 = vunpack.i.h.bf16 %v2330_v39 }
 0x17f   : > { %v2287_v60 = vrot.slane %v2286_v4, 1  ;;  %v2298_v41 = vrot.slane %v2297_v33, 2  ;;  %v2343_v7 = vsel %vm173_vm2, %v8661_v50, 4286644096  ;;  %v2356_v35 = vsel %vm173_vm2, %v8672_v55, 4286644096 }
 0x180   : > { %v2310_v63 = vmax.f32 %v2308_v36, %v2309_v54  ;;  %v2322_v44 = vrot.slane %v2321_v58, 4  ;;  %v2334_v19 = vmax.f32 %v2332_v29, %v2333_v10  ;;  %v2345_v48 = vunpack.i.l.bf16 %v2343_v7 }
 0x181   : > { %v2299_v37 = vmax.f32 %v2297_v33, %v2298_v41  ;;  %v2346_v56 = vunpack.i.h.bf16 %v2343_v7  ;;  %v2358_v25 = vunpack.i.l.bf16 %v2356_v35  ;;  %v8799_v23 = vmax.f32 %v2286_v4, %v2287_v60 }
 0x182   : > { %v2311_v51 = vrot.slane %v2310_v63, 2  ;;  %v2323_v39 = vmax.f32 %v2321_v58, %v2322_v44  ;;  %v2335_v36 = vrot.slane %v2334_v19, 4  ;;  %v2359_v14 = vunpack.i.h.bf16 %v2356_v35 }
 0x183   : > { %v2300_v54 = vrot.slane %v2299_v37, 1  ;;  %v2347_v11 = vmax.f32 %v2345_v48, %v2346_v56  ;;  %v2369_v3 = vsel %vm173_vm2, %v951_v13, 4286644096  ;;  %v2447_v50 = vsel %vm173_vm2, %v8682_v2, 4286644096 }
 0x184   : > { %v2312_v17 = vmax.f32 %v2310_v63, %v2311_v51  ;;  %v2324_v12 = vrot.slane %v2323_v39, 2  ;;  %v2336_v29 = vmax.f32 %v2334_v19, %v2335_v36  ;;  %v2360_v10 = vmax.f32 %v2358_v25, %v2359_v14 }
 0x185   : > { %v2371_v33 = vunpack.i.l.bf16 %v2369_v3  ;;  %v8805_v41 = vmax.f32 %v2299_v37, %v2300_v54  ;;  %v2348_v4 = vrot.slane %v2347_v11, 4  ;;  %v2372_v60 = vunpack.i.h.bf16 %v2369_v3 }
 0x186   : > { %v2313_v7 = vrot.slane %v2312_v17, 1  ;;  %v2325_v58 = vmax.f32 %v2323_v39, %v2324_v12  ;;  %v2337_v44 = vrot.slane %v2336_v29, 2  ;;  %v2361_v35 = vrot.slane %v2360_v10, 4 }
 0x187   : > { %v2382_v63 = vsel %vm173_vm2, %v952_v24, 4286644096  ;;  %v2349_v25 = vmax.f32 %v2347_v11, %v2348_v4  ;;  %v2373_v19 = vmax.f32 %v2371_v33, %v2372_v60 }
 0x188   : > { %v8813_v13 = vmax.f32 %v2312_v17, %v2313_v7  ;;  %v2326_v48 = vrot.slane %v2325_v58, 1  ;;  %v2338_v37 = vmax.f32 %v2336_v29, %v2337_v44  ;;  %v2362_v51 = vmax.f32 %v2360_v10, %v2361_v35 }
 0x189   : > { %v2384_v56 = vunpack.i.l.bf16 %v2382_v63  ;;  %v2350_v3 = vrot.slane %v2349_v25, 2  ;;  %v2374_v39 = vrot.slane %v2373_v19, 4  ;;  %v2385_v36 = vunpack.i.h.bf16 %v2382_v63 }
 0x18a   : > { %v8817_v55 = vmax.f32 %v2325_v58, %v2326_v48  ;;  %v2339_v24 = vrot.slane %v2338_v37, 1  ;;  %v2363_v14 = vrot.slane %v2362_v51, 2  ;;  %v2395_v17 = vsel %vm173_vm2, %v8666_v59, 4286644096 }
 0x18b   : > { %v2351_v54 = vmax.f32 %v2349_v25, %v2350_v3  ;;  %v2375_v11 = vmax.f32 %v2373_v19, %v2374_v39  ;;  %v2386_v33 = vmax.f32 %v2384_v56, %v2385_v36  ;;  %v2397_v7 = vunpack.i.l.bf16 %v2395_v17 }
 0x18c   : > { %v8823_v10 = vmax.f32 %v2338_v37, %v2339_v24  ;;  %v2364_v4 = vmax.f32 %v2362_v51, %v2363_v14  ;;  %v2398_v60 = vunpack.i.h.bf16 %v2395_v17  ;;  %v2408_v63 = vsel %vm173_vm2, %v8679_v32, 4286644096 }
 0x18d   : > { %v2352_v44 = vrot.slane %v2351_v54, 1  ;;  %v2376_v35 = vrot.slane %v2375_v11, 2  ;;  %v2387_v58 = vrot.slane %v2386_v33, 4  ;;  %v2410_v56 = vunpack.i.l.bf16 %v2408_v63 }
 0x18e   : > { %v2365_v25 = vrot.slane %v2364_v4, 1  ;;  %v2399_v19 = vmax.f32 %v2397_v7, %v2398_v60  ;;  %v2411_v37 = vunpack.i.h.bf16 %v2408_v63  ;;  %v2421_v14 = vsel %vm173_vm2, %v975_v38, 4286644096 }
 0x18f   : > { %v8829_v3 = vmax.f32 %v2351_v54, %v2352_v44  ;;  %v2377_v39 = vmax.f32 %v2375_v11, %v2376_v35  ;;  %v2388_v36 = vmax.f32 %v2386_v33, %v2387_v58  ;;  %v2434_v17 = vsel %vm173_vm2, %v976_v62, 4286644096 }
 0x190   : > { %v8831_v24 = vmax.f32 %v2364_v4, %v2365_v25  ;;  %v2400_v51 = vrot.slane %v2399_v19, 4  ;;  %v2412_v33 = vmax.f32 %v2410_v56, %v2411_v37  ;;  %v2423_v44 = vunpack.i.l.bf16 %v2421_v14 }
 0x191   : > { %v2378_v7 = vrot.slane %v2377_v39, 1  ;;  %v2389_v11 = vrot.slane %v2388_v36, 2  ;;  %v2424_v35 = vunpack.i.h.bf16 %v2421_v14  ;;  %v2436_v32 = vunpack.i.l.bf16 %v2434_v17 }
 0x192   : > { %v2401_v60 = vmax.f32 %v2399_v19, %v2400_v51  ;;  %v2413_v58 = vrot.slane %v2412_v33, 4  ;;  %v2437_v25 = vunpack.i.h.bf16 %v2434_v17  ;;  %v2449_v4 = vunpack.i.l.bf16 %v2447_v50 }
 0x193   : > { %v2390_v38 = vmax.f32 %v2388_v36, %v2389_v11  ;;  %v2425_v62 = vmax.f32 %v2423_v44, %v2424_v35  ;;  %v8849_v54 = vmax.f32 %v2377_v39, %v2378_v7  ;;  %v2450_v48 = vunpack.i.h.bf16 %v2447_v50 }
 0x194   : > { %v2402_v63 = vrot.slane %v2401_v60, 2  ;;  %v2414_v37 = vmax.f32 %v2412_v33, %v2413_v58  ;;  %v2438_v14 = vmax.f32 %v2436_v32, %v2437_v25  ;;  %v2460_v11 = vsel %vm173_vm2, %v8689_v42, 4286644096 }
 0x195   : > { %v2391_v56 = vrot.slane %v2390_v38, 1  ;;  %v2426_v51 = vrot.slane %v2425_v62, 4  ;;  %v2473_v17 = vsel %vm173_vm2, %v999_v18, 4286644096  ;;  %v2451_v33 = vmax.f32 %v2449_v4, %v2450_v48 }
 0x196   : > { %v2403_v19 = vmax.f32 %v2401_v60, %v2402_v63  ;;  %v2415_v36 = vrot.slane %v2414_v37, 2  ;;  %v2439_v44 = vrot.slane %v2438_v14, 4  ;;  %v2462_v50 = vunpack.i.l.bf16 %v2460_v11 }
 0x197   : > { %v8851_v29 = vmax.f32 %v2390_v38, %v2391_v56  ;;  %v2427_v7 = vmax.f32 %v2425_v62, %v2426_v51  ;;  %v2463_v38 = vunpack.i.h.bf16 %v2460_v11  ;;  %v2452_v25 = vrot.slane %v2451_v33, 4 }
 0x198   : > { %v2404_v39 = vrot.slane %v2403_v19, 1  ;;  %v2416_v35 = vmax.f32 %v2414_v37, %v2415_v36  ;;  %v2440_v63 = vmax.f32 %v2438_v14, %v2439_v44  ;;  %v2475_v2 = vunpack.i.l.bf16 %v2473_v17 }
 0x199   : > { %v2428_v32 = vrot.slane %v2427_v7, 2  ;;  %v2464_v59 = vmax.f32 %v2462_v50, %v2463_v38  ;;  %v2476_v12 = vunpack.i.h.bf16 %v2473_v17  ;;  %v2453_v4 = vmax.f32 %v2451_v33, %v2452_v25 }
 0x19a   : > { %v8861_v58 = vmax.f32 %v2403_v19, %v2404_v39  ;;  %v2417_v56 = vrot.slane %v2416_v35, 1  ;;  %v2441_v48 = vrot.slane %v2440_v63, 2  ;;  %v2486_v19 = vsel %vm173_vm2, %v1000_v27, 4286644096 }
 0x19b   : > { %v2429_v62 = vmax.f32 %v2427_v7, %v2428_v32  ;;  %v2465_v37 = vrot.slane %v2464_v59, 4  ;;  %v2477_v36 = vmax.f32 %v2475_v2, %v2476_v12  ;;  %v2454_v39 = vrot.slane %v2453_v4, 2 }
 0x19c   : > { %v8865_v51 = vmax.f32 %v2416_v35, %v2417_v56  ;;  %v2442_v11 = vmax.f32 %v2440_v63, %v2441_v48  ;;  %v2488_v44 = vunpack.i.l.bf16 %v2486_v19  ;;  %v2489_v38 = vunpack.i.h.bf16 %v2486_v19 }
 0x19d   : > { %v2430_v14 = vrot.slane %v2429_v62, 1  ;;  %v2466_v50 = vmax.f32 %v2464_v59, %v2465_v37  ;;  %v2478_v7 = vrot.slane %v2477_v36, 4  ;;  %v2455_v32 = vmax.f32 %v2453_v4, %v2454_v39 }
 0x19e   : > { %v2443_v35 = vrot.slane %v2442_v11, 1  ;;  %v2499_v12 = vsel %vm173_vm2, %v8692_v6, 4286644096  ;;  %v2490_v27 = vmax.f32 %v2488_v44, %v2489_v38  ;;  %v2512_v4 = vsel %vm173_vm2, %v8699_v15, 4286644096 }
 0x19f   : > { %v8873_v33 = vmax.f32 %v2429_v62, %v2430_v14  ;;  %v2467_v42 = vrot.slane %v2466_v50, 2  ;;  %v2479_v25 = vmax.f32 %v2477_v36, %v2478_v7  ;;  %v2501_v56 = vunpack.i.l.bf16 %v2499_v12 }
 0x1a0   : > { %v8879_v2 = vmax.f32 %v2442_v11, %v2443_v35  ;;  %v2456_v48 = vrot.slane %v2455_v32, 1  ;;  %v2502_v59 = vunpack.i.h.bf16 %v2499_v12  ;;  %v2491_v62 = vrot.slane %v2490_v27, 4 }
 0x1a1   : > { %v2468_v37 = vmax.f32 %v2466_v50, %v2467_v42  ;;  %v2480_v19 = vrot.slane %v2479_v25, 2  ;;  %v2514_v44 = vunpack.i.l.bf16 %v2512_v4  ;;  %v2515_v11 = vunpack.i.h.bf16 %v2512_v4 }
 0x1a2   : > { %v8885_v39 = vmax.f32 %v2455_v32, %v2456_v48  ;;  %v2503_v36 = vmax.f32 %v2501_v56, %v2502_v59  ;;  %v2492_v63 = vmax.f32 %v2490_v27, %v2491_v62  ;;  %v2525_v12 = vsel %vm173_vm2, %v1023_v1, 4286644096 }
 0x1a3   : > { %v2469_v7 = vrot.slane %v2468_v37, 1  ;;  %v2481_v38 = vmax.f32 %v2479_v25, %v2480_v19  ;;  %v10091_v42 = vcombine.high %v8699_v15, %v8699_v15  ;;  %v2516_v27 = vmax.f32 %v2514_v44, %v2515_v11 }
 0x1a4   : > { %v2504_v50 = vrot.slane %v2503_v36, 4  ;;  %v2493_v25 = vrot.slane %v2492_v63, 2  ;;  %v2527_v19 = vunpack.i.l.bf16 %v2525_v12  ;;  %v2528_v62 = vunpack.i.h.bf16 %v2525_v12 }
 0x1a5   : > { %v2538_v32 = vsel %vm173_vm2, %v10091_v42, 4286644096  ;;  %v8897_v56 = vmax.f32 %v2468_v37, %v2469_v7  ;;  %v2482_v48 = vrot.slane %v2481_v38, 1  ;;  %v2517_v14 = vrot.slane %v2516_v27, 4 }
 0x1a6   : > { %v2505_v59 = vmax.f32 %v2503_v36, %v2504_v50  ;;  %v2540_v4 = vunpack.i.l.bf16 %v2538_v32  ;;  %v2494_v1 = vmax.f32 %v2492_v63, %v2493_v25  ;;  %v2529_v17 = vmax.f32 %v2527_v19, %v2528_v62 }
 0x1a7   : > { %v2541_v42 = vunpack.i.h.bf16 %v2538_v32  ;;  %v2551_v37 = vsel %vm173_vm2, %v8710_v28, 4286644096  ;;  %v8905_v7 = vmax.f32 %v2481_v38, %v2482_v48  ;;  %v2518_v44 = vmax.f32 %v2516_v27, %v2517_v14 }
 0x1a8   : > { %v2506_v15 = vrot.slane %v2505_v59, 2  ;;  %v2495_v36 = vrot.slane %v2494_v1, 1  ;;  %v2553_v11 = vunpack.i.l.bf16 %v2551_v37  ;;  %v2530_v12 = vrot.slane %v2529_v17, 4 }
 0x1a9   : > { %v2542_v18 = vmax.f32 %v2540_v4, %v2541_v42  ;;  %v2554_v35 = vunpack.i.h.bf16 %v2551_v37  ;;  %v2519_v6 = vrot.slane %v2518_v44, 2  ;;  %v2564_v63 = vsel %vm173_vm2, %v8721_v43, 4286644096 }
 0x1aa   : > { %v2507_v50 = vmax.f32 %v2505_v59, %v2506_v15  ;;  %v8907_v60 = vmax.f32 %v2494_v1, %v2495_v36  ;;  %v10092_v32 = vcombine.high %v8710_v28, %v8710_v28  ;;  %v2531_v48 = vmax.f32 %v2529_v17, %v2530_v12 }
 0x1ab   : > { %v2543_v19 = vrot.slane %v2542_v18, 4  ;;  %v2555_v14 = vmax.f32 %v2553_v11, %v2554_v35  ;;  %v2484_v27 = vpack.i.bf16 %v8905_v7, %v8905_v7  ;;  %v2520_v59 = vmax.f32 %v2518_v44, %v2519_v6 }
 0x1ac   : > { %v2577_v25 = vsel %vm173_vm2, %v10092_v32, 4286644096  ;;  %v2508_v38 = vrot.slane %v2507_v50, 1  ;;  %v2566_v62 = vunpack.i.l.bf16 %v2564_v63  ;;  %v2567_v4 = vunpack.i.h.bf16 %v2564_v63 }
 0x1ad   : > { %v2532_v15 = vrot.slane %v2531_v48, 2  ;;  %v2544_v42 = vmax.f32 %v2542_v18, %v2543_v19  ;;  %v2556_v37 = vrot.slane %v2555_v14, 4  ;;  %v2521_v36 = vrot.slane %v2520_v59, 1 }
 0x1ae   : > { %v8917_v1 = vmax.f32 %v2507_v50, %v2508_v38  ;;  %v2568_v26 = vmax.f32 %v2566_v62, %v2567_v4  ;;  %v2579_v28 = vunpack.i.l.bf16 %v2577_v25  ;;  %v2580_v57 = vunpack.i.h.bf16 %v2577_v25 }
 0x1af   : > { %v2497_v17 = vpack.i.bf16 %v8907_v60, %v8907_v60  ;;  %v2533_v12 = vmax.f32 %v2531_v48, %v2532_v15  ;;  %v2545_v35 = vrot.slane %v2544_v42, 2  ;;  %v2557_v11 = vmax.f32 %v2555_v14, %v2556_v37 }
 0x1b0   : > { %v8921_v32 = vmax.f32 %v2520_v59, %v2521_v36  ;;  %v2569_v6 = vrot.slane %v2568_v26, 4  ;;  %v2581_v44 = vmax.f32 %v2579_v28, %v2580_v57  ;;  %v10093_v50 = vcombine.high %v8721_v43, %v8721_v43 }
 0x1b1   : > { %v2534_v63 = vrot.slane %v2533_v12, 1  ;;  %v2546_v38 = vmax.f32 %v2544_v42, %v2545_v35  ;;  %v2558_v19 = vrot.slane %v2557_v11, 2  ;;  %v2510_v25 = vpack.i.bf16 %v8917_v1, %v8917_v1 }
 0x1b2   : > { %v2590_v18 = vsel %vm173_vm2, %v10093_v50, 4286644096  ;;  %v2570_v4 = vmax.f32 %v2568_v26, %v2569_v6  ;;  %v2582_v48 = vrot.slane %v2581_v44, 4  ;;  %v10094_v57 = vpack.i.bf16 %v8755_v16, %v8755_v16 }
 0x1b3   : > { %v2592_v62 = vunpack.i.l.bf16 %v2590_v18  ;;  %v2593_v15 = vunpack.i.h.bf16 %v2590_v18  ;;  %v2535_v14 = vmax.f32 %v2533_v12, %v2534_v63  ;;  %v2547_v59 = vrot.slane %v2546_v38, 1 }
 0x1b4   : > { %v2559_v37 = vmax.f32 %v2557_v11, %v2558_v19  ;;  %v3092_v43 = vsel %vm2810_vm7, %v10094_v57, 4286644096  ;;  %v2571_v36 = vrot.slane %v2570_v4, 2  ;;  %v2583_v28 = vmax.f32 %v2581_v44, %v2582_v48 }
 0x1b5   : > { %v2594_v50 = vmax.f32 %v2592_v62, %v2593_v15  ;;  %v10095_v42 = vpack.i.bf16 %v8805_v41, %v8805_v41  ;;  %v2523_v26 = vpack.i.bf16 %v8921_v32, %v8921_v32  ;;  %v2536_v1 = vpack.i.bf16 %v2535_v14, %v2535_v14 }
 0x1b6   : > { %v2548_v12 = vmax.f32 %v2546_v38, %v2547_v59  ;;  %v2560_v6 = vrot.slane %v2559_v37, 1  ;;  %v2572_v11 = vmax.f32 %v2570_v4, %v2571_v36  ;;  %v2584_v18 = vrot.slane %v2583_v28, 2 }
 0x1b7   : > { %v3095_v35 = vsel %vm2810_vm7, %v10095_v42, 4286644096  ;;  %v2595_v63 = vrot.slane %v2594_v50, 4  ;;  %v10096_v16 = vpack.i.bf16 %v8757_v53, %v8757_v53  ;;  %v10097_v41 = vpack.i.bf16 %v8813_v13, %v8813_v13 }
 0x1b8   : > { %v2549_v19 = vpack.i.bf16 %v2548_v12, %v2548_v12  ;;  %v2561_v62 = vmax.f32 %v2559_v37, %v2560_v6  ;;  %v8943_v48 = vmax.bf16 %v3095_v35, %v3092_v43  ;;  %v2573_v15 = vrot.slane %v2572_v11, 1 }
 0x1b9   : > { %v3099_v44 = vsel %vm2810_vm7, %v10096_v16, 4286644096  ;;  %v3102_v32 = vsel %vm2810_vm7, %v10097_v41, 4286644096  ;;  %v2585_v38 = vmax.f32 %v2583_v28, %v2584_v18  ;;  %v2596_v14 = vmax.f32 %v2594_v50, %v2595_v63 }
 0x1ba   : > { %v10098_v4 = vpack.i.bf16 %v8761_v40, %v8761_v40  ;;  %v8953_v53 = vmax.bf16 %v3102_v32, %v3099_v44  ;;  %v10099_v37 = vpack.i.bf16 %v8817_v55, %v8817_v55  ;;  %v10100_v13 = vpack.i.bf16 %v8767_v31, %v8767_v31 }
 0x1bb   : > { %v10101_v36 = vpack.i.bf16 %v8823_v10, %v8823_v10  ;;  %v2562_v40 = vpack.i.bf16 %v2561_v62, %v2561_v62  ;;  %v2574_v50 = vmax.f32 %v2572_v11, %v2573_v15  ;;  %v2586_v42 = vrot.slane %v2585_v38, 1 }
 0x1bc   : > { %v3106_v59 = vsel %vm2810_vm7, %v10098_v4, 4286644096  ;;  %v3109_v57 = vsel %vm2810_vm7, %v10099_v37, 4286644096  ;;  %v3113_v43 = vsel %vm2810_vm7, %v10100_v13, 4286644096  ;;  %v10102_v55 = vpack.i.bf16 %v8773_v34, %v8773_v34 }
 0x1bd   : > { %v3116_v28 = vsel %vm2810_vm7, %v10101_v36, 4286644096  ;;  %v2597_v35 = vrot.slane %v2596_v14, 2  ;;  %v3111_v12 = vmax.bf16 %v3109_v57, %v3106_v59  ;;  %v10103_v31 = vpack.i.bf16 %v8829_v3, %v8829_v3 }
 0x1be   : > { %v3120_v6 = vsel %vm2810_vm7, %v10102_v55, 4286644096  ;;  %v10104_v10 = vpack.i.bf16 %v8785_v30, %v8785_v30  ;;  %v2575_v16 = vpack.i.bf16 %v2574_v50, %v2574_v50  ;;  %v2587_v11 = vmax.f32 %v2585_v38, %v2586_v42 }
 0x1bf   : > { %v3123_v18 = vsel %vm2810_vm7, %v10103_v31, 4286644096  ;;  %v2598_v44 = vmax.f32 %v2596_v14, %v2597_v35  ;;  %v3118_v62 = vmax.bf16 %v3116_v28, %v3113_v43  ;;  %v10105_v34 = vpack.i.bf16 %v8831_v24, %v8831_v24 }
 0x1c0   : > { %v3127_v63 = vsel %vm2810_vm7, %v10104_v10, 4286644096  ;;  %v3125_v41 = vmax.bf16 %v3123_v18, %v3120_v6  ;;  %v10106_v3 = vpack.i.bf16 %v8787_v46, %v8787_v46  ;;  %v10107_v30 = vpack.i.bf16 %v8849_v54, %v8849_v54 }
 0x1c1   : > { %v3130_v32 = vsel %vm2810_vm7, %v10105_v34, 4286644096  ;;  %v2588_v59 = vpack.i.bf16 %v2587_v11, %v2587_v11  ;;  %v2599_v38 = vrot.slane %v2598_v44, 1  ;;  %v6692_v37 = vcombine.low %v8943_v48, %v8943_v48 }
 0x1c2   : > { %v3134_v15 = vsel %vm2810_vm7, %v10106_v3, 4286644096  ;;  %v3137_v4 = vsel %vm2810_vm7, %v10107_v30, 4286644096  ;;  %v3132_v14 = vmax.bf16 %v3130_v32, %v3127_v63  ;;  %v10108_v24 = vpack.i.bf16 %v8799_v23, %v8799_v23 }
 0x1c3   : > { %v3139_v57 = vmax.bf16 %v3137_v4, %v3134_v15  ;;  %v10109_v46 = vpack.i.bf16 %v8851_v29, %v8851_v29  ;;  %v10110_v54 = vpack.i.bf16 %v8861_v58, %v8861_v58  ;;  %v2600_v28 = vmax.f32 %v2598_v44, %v2599_v38 }
 0x1c4   : > { %v3141_v13 = vsel %vm2810_vm7, %v10108_v24, 4286644096  ;;  %v3151_v50 = vsel %vm2810_vm7, %v2510_v25, 4286644096  ;;  %v10111_v48 = vpack.i.bf16 %v8865_v51, %v8865_v51  ;;  %v6693_v42 = vcombine.low %v8953_v53, %v8953_v53 }
 0x1c5   : > { %v3144_v43 = vsel %vm2810_vm7, %v10109_v46, 4286644096  ;;  %v3148_v36 = vsel %vm2810_vm7, %v10110_v54, 4286644096  ;;  %v3158_v29 = vsel %vm2810_vm7, %v2523_v26, 4286644096  ;;  %v10112_v55 = vpack.i.bf16 %v8873_v33, %v8873_v33 }
 0x1c6   : > { %v3155_v23 = vsel %vm2810_vm7, %v10111_v48, 4286644096  ;;  %v3153_v35 = vmax.bf16 %v3151_v50, %v3148_v36  ;;  %v3165_v6 = vsel %vm2810_vm7, %v2536_v1, 4286644096  ;;  %v2601_v31 = vpack.i.bf16 %v2600_v28, %v2600_v28 }
 0x1c7   : > { %v3162_v58 = vsel %vm2810_vm7, %v10112_v55, 4286644096  ;;  %v3160_v25 = vmax.bf16 %v3158_v29, %v3155_v23  ;;  %v10113_v51 = vpack.i.bf16 %v8879_v2, %v8879_v2  ;;  %v3172_v53 = vsel %vm2810_vm7, %v2549_v19, 4286644096 }
 0x1c8   : > { %v3167_v18 = vmax.bf16 %v3165_v6, %v3162_v58  ;;  %v10114_v26 = vpack.i.bf16 %v8885_v39, %v8885_v39  ;;  %v3179_v33 = vsel %vm2810_vm7, %v2562_v40, 4286644096  ;;  %v6694_v11 = vcombine.low %v3111_v12, %v3111_v12  ;;  %v3643_v58 = vld [vmem:[#allocation2 + $0x3c] sm:$0x1] }
 0x1c9   : > { %v3169_v10 = vsel %vm2810_vm7, %v10113_v51, 4286644096  ;;  %v10115_v34 = vpack.i.bf16 %v8897_v56, %v8897_v56  ;;  %v3186_v2 = vsel %vm2810_vm7, %v2575_v16, 4286644096  ;;  %v3190_v39 = vsel %vm2810_vm7, %v2484_v27, 4286644096 }
 0x1ca   : > { %v3176_v63 = vsel %vm2810_vm7, %v10114_v26, 4286644096  ;;  %v3174_v44 = vmax.bf16 %v3172_v53, %v3169_v10  ;;  %v3193_v19 = vsel %vm2810_vm7, %v2588_v59, 4286644096  ;;  %v3197_v40 = vsel %vm2810_vm7, %v2497_v17, 4286644096 }
 0x1cb   : > { %v3181_v1 = vmax.bf16 %v3179_v33, %v3176_v63  ;;  %v3183_v32 = vsel %vm2810_vm7, %v10115_v34, 4286644096  ;;  %v3195_v12 = vmax.bf16 %v3193_v19, %v3190_v39  ;;  %v3200_v56 = vsel %vm2810_vm7, %v2601_v31, 4286644096  ;;  %v9047_v10 = vld [vmem:[#allocation2] sm:$0xf] }
 0x1cc   : > { %v3188_v3 = vmax.bf16 %v3186_v2, %v3183_v32  ;;  %v6695_v15 = vcombine.low %v3118_v62, %v3118_v62  ;;  %v6696_v30 = vcombine.low %v3125_v41, %v3125_v41  ;;  %v3146_v4 = vmax.bf16 %v3144_v43, %v3141_v13  ;;  %v9049_v53 = vld [vmem:[#allocation2 + $0x8] sm:$0xf]  ;;  %v9061_v39 = vld [vmem:[#allocation2 + $0x10] sm:$0xf]  ;;  %v9063_v19 = vld [vmem:[#allocation2 + $0x18] sm:$0xf] }
 0x1cd   : > { %v6697_v16 = vcombine.low %v3132_v14, %v3132_v14  ;;  %v6698_v38 = vcombine.low %v3139_v57, %v3139_v57  ;;  %v6700_v24 = vcombine.low %v3153_v35, %v3153_v35  ;;  %v6701_v46 = vcombine.low %v3160_v25, %v3160_v25  ;;  %v3637_v35 = vld [vmem:[#allocation2 + $0x34] sm:$0x1]  ;;  %v3980_v34 = vld [vmem:[#allocation2 + $0x8] sm:$0xe] }
 0x1ce   : > { %v6702_v7 = vcombine.low %v3167_v18, %v3167_v18  ;;  %v6703_v54 = vcombine.low %v3174_v44, %v3174_v44  ;;  %v6704_v27 = vcombine.low %v3181_v1, %v3181_v1  ;;  %v3202_v36 = vmax.bf16 %v3200_v56, %v3197_v40  ;;  %v3979_v1 = vld [vmem:[#allocation2] sm:$0xe]  ;;  %v3981_v56 = vld [vmem:[#allocation2 + $0x10] sm:$0xe] }
 0x1cf   : > { %v6705_v59 = vcombine.low %v3188_v3, %v3188_v3  ;;  %v3491_v28 = vunpack.c.l.b16 %v6692_v37  ;;  %v3492_v50 = vunpack.c.l.b16 %v6693_v42  ;;  %v6706_v60 = vcombine.low %v3195_v12, %v3195_v12  ;;  %v3634_v3 = vld [vmem:[#allocation2 + $0x30] sm:$0xf] }
 0x1d0   : > { %v3493_v48 = vunpack.c.l.b16 %v6694_v11  ;;  %v3494_v17 = vunpack.c.l.b16 %v6695_v15  ;;  %v3495_v23 = vunpack.c.l.b16 %v6696_v30  ;;  %v3496_v29 = vunpack.c.l.b16 %v6697_v16  ;;  %v3982_v15 = vld [vmem:[#allocation2 + $0x18] sm:$0xe] }
 0x1d1   : > { %v3499_v55 = vunpack.c.l.b16 %v6700_v24  ;;  %v3500_v62 = vunpack.c.l.b16 %v6701_v46  ;;  %v3501_v41 = vunpack.c.l.b16 %v6702_v7  ;;  %v3497_v13 = vunpack.c.l.b16 %v6698_v38  ;;  %v3640_v16 = vld [vmem:[#allocation2 + $0x38] sm:$0xf]  ;;  %v3983_v38 = vld [vmem:[#allocation2 + $0x20] sm:$0xe] }
 0x1d2   : > { %v3502_v14 = vunpack.c.l.b16 %v6703_v54  ;;  %v3503_v57 = vunpack.c.l.b16 %v6704_v27  ;;  %v3504_v43 = vunpack.c.l.b16 %v6705_v59  ;;  %v3551_v6 = vsel %vm3515_vm8, %v3492_v50, %v3491_v28  ;;  %v6648_v27 = vld.sshfl [vmem:[%s7573_s5 + $0x70] sm:$0x33 pattern:$0x75316420] }
 0x1d3   : > { %v3557_v31 = vsel %vm3515_vm8, %v3500_v62, %v3499_v55  ;;  %v6923_v37 = vcombine.low %v3146_v4, %v3146_v4  ;;  %v6924_v42 = vcombine.low %v3202_v36, %v3202_v36  ;;  %v3505_v25 = vunpack.c.l.b16 %v6706_v60  ;;  %v3984_v60 = vld [vmem:[#allocation2 + $0x28] sm:$0xe]  ;;  %v9097_v62 = vld [vmem:[%s10035_s1 + $0x6] sm:$0x3] }
 0x1d4   : > { %v3552_v18 = vsel %vm3517_vm9, %v3493_v48, %v3551_v6  ;;  %v3558_v51 = vsel %vm3517_vm9, %v3501_v41, %v3557_v31  ;;  %v6733_v26 = vcombine.low %v9047_v10, %v9049_v53  ;;  %v6734_v40 = vcombine.low %v9061_v39, %v9063_v19  ;;  %v7397_v31 = vld [vmem:[#allocation2 + $0x24] sm:$0x1] }
 0x1d5   : > { %v3553_v63 = vsel %vm3519_vm10, %v3494_v17, %v3552_v18  ;;  %v3559_v33 = vsel %vm3519_vm10, %v3502_v14, %v3558_v51  ;;  %v3638_v11 = vsel %vm7551_vm4, %v6923_v37, %v3637_v35  ;;  %v3644_v44 = vsel %vm7551_vm4, %v6924_v42, %v3643_v58  ;;  %v6649_v35 = vld.sshfl [vmem:[%s7573_s5 + $0x74] sm:$0x33 pattern:$0x75316420] }
 0x1d6   : > { %v3554_v32 = vsel %vm3521_vm11, %v3495_v23, %v3553_v63  ;;  %v3560_v2 = vsel %vm3521_vm11, %v3503_v57, %v3559_v33  ;;  %3639 = vst [vmem:[#allocation2 + $0x34] sm:$0x1] %v3638_v11  ;;  %3645 = vst [vmem:[#allocation2 + $0x3c] sm:$0x1] %v3644_v44  ;;  %v9069_v12 = vsel %vm3810_vm0, %v8745_v47, 0  ;;  %v6741_v47 = vrot.slane %v3979_v1, 9 }
 0x1d7   : > { %v3555_v30 = vsel %vm3523_vm12, %v3496_v29, %v3554_v32  ;;  %v3561_v4 = vsel %vm3523_vm12, %v3504_v43, %v3560_v2  ;;  %v6742_v54 = vrot.slane %v3980_v34, 9  ;;  %v6743_v28 = vrot.slane %v3981_v56, 9 }
 0x1d8   : > { %v3556_v24 = vsel %vm3525_vm13, %v3497_v13, %v3555_v30  ;;  %v3562_v46 = vsel %vm3525_vm13, %v3505_v25, %v3561_v4  ;;  %v6744_v50 = vrot.slane %v3982_v15, 9  ;;  %v6735_v48 = vcombine.low %v8703_v9, %v8705_v61  ;;  %v205_v13 = vld [vmem:[#allocation2 + $0x40] sm:$0x1]  ;;  %v7398_v25 = vld [vmem:[#allocation2 + $0x2c] sm:$0x1] }
 0x1d9   : > { %v3579_v36 = vpack.c.b16 %v3556_v24, %v3556_v24  ;;  %v3581_v59 = vpack.c.b16 %v3562_v46, %v3562_v46  ;;  %v10118_v17 = vrot.slane %v7715_v45, 5  ;;  %v10119_v29 = vrot.slane %v7820_v52, 5  ;;  %v6651_v4 = vld.sshfl [vmem:[%s7573_s5 + $0x7c] sm:$0x33 pattern:$0x75316420] }
 0x1da   : > { %v6745_v41 = vrot.slane %v3983_v38, 9  ;;  %v10120_v57 = vrot.slane %v8629_v49, 5  ;;  %v10121_v58 = vrot.slane %v8636_v20, 5  ;;  %v4024_v37 = vrot.slane %v7397_v31, 5  ;;  %v9121_v49 = vld [vmem:[%s10035_s1 + $0x8] sm:$0x3] }
 0x1db   : > { %v9086_v23 = vsel %vm9075_vm5, %v6741_v47, %v10118_v17  ;;  %v9092_v55 = vsel %vm9075_vm5, %v6742_v54, %v10119_v29  ;;  %v3635_v45 = vsel %vm7732_vm3, %v3579_v36, %v3634_v3  ;;  %v3641_v14 = vsel %vm7732_vm3, %v3581_v59, %v3640_v16  ;;  %v6650_v3 = vld.sshfl [vmem:[%s7573_s5 + $0x78] sm:$0x33 pattern:$0x75316420]  ;;  %v9198_v20 = vld [vmem:[#allocation2 + $0x8] sm:$0xf] }
 0x1dc   : > { %v9109_v43 = vsel %vm9075_vm5, %v6743_v28, %v10120_v57  ;;  %3636 = vst [vmem:[#allocation2 + $0x30] sm:$0xf] %v3635_v45  ;;  %3642 = vst [vmem:[#allocation2 + $0x38] sm:$0xf] %v3641_v14  ;;  %v9116_v6 = vsel %vm9075_vm5, %v6744_v50, %v10121_v58  ;;  %v6746_v42 = vrot.slane %v3984_v60, 9  ;;  %v4028_v18 = vrot.slane %v7398_v25, 5 }
 0x1dd   : > { %v3667_v51 = vld [vmem:[#allocation2 + $0x34] sm:$0x1]  ;;  %v3668_v63 = vld [vmem:[#allocation2 + $0x3c] sm:$0x1]  ;;  %v9127_v33 = vsel %vm3810_vm0, %v9097_v62, 0  ;;  %v206_v11 = vsel %vm7551_vm4, 0, %v205_v13  ;;  %v1056_v44 = vcombine.high %v6648_v27, %v6648_v27  ;;  %v9133_v32 = vsel %vm9075_vm5, %v6745_v41, %v4024_v37 }
 0x1de   : > { %v3766_v1 = vshll.u32 %v3667_v51, 16  ;;  %v3780_v34 = vshll.u32 %v3668_v63, 16  ;;  %v9137_v2 = vsel %vm9075_vm5, %v6746_v42, %v4028_v18  ;;  %207 = vst [vmem:[#allocation2 + $0x40] sm:$0x1] %v206_v11  ;;  %v4032_v15 = vrot.slane %v3667_v51, 5  ;;  %s6617_s5 = sshll.u32 %s161_s4, 3 }
 0x1df   : > { %v9144_v30 = vsel %vm3810_vm0, %v9121_v49, 0  ;;  %v1063_v16 = vrot.slane %v6648_v27, %v7579_v21  ;;  %v4036_v24 = vrot.slane %v3668_v63, 5  ;;  %v1070_v46 = vrot.slane %v1056_v44, %v7579_v21  ;;  %s163_s7 = scalar_lea.vmem [#allocation4], %s6617_s5 }
 0x1e0   : > { %v3768_v38 = vrot.slane %v3766_v1, 5  ;;  %v1080_v47 = vcombine.high %v6649_v35, %v6649_v35  ;;  %v3782_v54 = vrot.slane %v3780_v34, 5  ;;  %v9150_v36 = vrot.slane %v6649_v35, %v7579_v21  ;;  %s6554_s8 = sshll.u32 %s163_s7, 4  ;;  %s9994_s8 = int_to_ptr.vmem [resolvable:$true] %s6554_s8 }
 0x1e1   : > { %v1104_v59 = vcombine.high %v6650_v3, %v6650_v3  ;;  %v9153_v28 = vrot.slane %v6650_v3, %v7579_v21  ;;  %v1071_v50 = vcombine.high %v1063_v16, %v1063_v16  ;;  %v1072_v60 = vcombine.high %v1070_v46, %v1070_v46  ;;  %s7399_s17 = scalar_lea.vmem %s9994_s8, 128  ;;  %p7406_p0 = scmp.lt.s32.totalorder %s9994_s8, %s7404_s20 }
 0x1e2   : > { %v9156_v17 = vrot.slane %v1080_v47, %v7579_v21  ;;  %v1128_v29 = vcombine.high %v6651_v4, %v6651_v4  ;;  %v1095_v45 = vcombine.high %v9150_v36, %v9150_v36  ;;  %v9170_v35 = vrot.slane %v6651_v4, %v7579_v21  ;;  %p7400_p11 = scmp.ne.s32.totalorder %s9994_s8, %s7399_s17  ;;  %p7407_p1 = scmp.lt.s32.totalorder %s7405_s24, %s7399_s17 }
 0x1e3   : > { %v9158_v27 = vld [vmem:[#allocation2 + $0x30] sm:$0xf]  ;;  %v9160_v41 = vld [vmem:[#allocation2 + $0x38] sm:$0xf]  ;;  %v9165_v14 = vrot.slane %v1104_v59, %v7579_v21  ;;  %v1119_v57 = vcombine.high %v9153_v28, %v9153_v28 }
 0x1e4   : > { %v3985_v13 = vld [vmem:[#allocation2 + $0x30] sm:$0xe]  ;;  %v3757_v58 = vshrl.u32 %v9158_v27, 16  ;;  %v3760_v31 = vshll.u32 %v9158_v27, 16  ;;  %v3771_v37 = vshrl.u32 %v9160_v41, 16  ;;  %v3774_v42 = vshll.u32 %v9160_v41, 16  ;;  %p7401_p12 = pnand %p7400_p11, %p7526_p5  ;;  %p7408_p2 = por %p7407_p1, %p7406_p0 }
 0x1e5   : > { %v3986_v25 = vld [vmem:[#allocation2 + $0x38] sm:$0xe]  ;;  %v6736_v18 = vcombine.low %v9158_v27, %v9160_v41  ;;  %v6747_v51 = vrot.slane %v3985_v13, 9  ;;  %v9189_v59 = vrot.slane %v1128_v29, %v7579_v21 }
 0x1e6   : > { %v6748_v63 = vrot.slane %v3986_v25, 9  ;;  %v3759_v44 = vrot.slane %v3757_v58, 4  ;;  %v3762_v1 = vrot.slane %v3760_v31, 5  ;;  %v3773_v34 = vrot.slane %v3771_v37, 4  ;;  %p7402_p13 = pneg %p7401_p12 }
 0x1e7   : > { %v3776_v3 = vrot.slane %v3774_v42, 5  ;;  %v9182_v4 = vsel %vm9075_vm5, %v6747_v51, %v4032_v15  ;;  %v2603_v31 = vsel %vm173_vm2, %v1063_v16, 4286644096  ;;  %v2616_v42 = vsel %vm173_vm2, %v1070_v46, 4286644096 }
 0x1e8   : > { %v9186_v47 = vsel %vm9075_vm5, %v6748_v63, %v4036_v24  ;;  %v3763_v25 = vor.u32 %v3762_v1, %v3759_v44  ;;  %v2605_v37 = vunpack.i.l.bf16 %v2603_v31  ;;  %v2606_v15 = vunpack.i.h.bf16 %v2603_v31  ;;  %p7409_p3 = pnand %p7408_p2, %p7402_p13 }
 0x1e9   : > { %v3777_v56 = vor.u32 %v3776_v3, %v3773_v34  ;;  %v2629_v24 = vsel %vm173_vm2, %v1071_v50, 4286644096  ;;  %v2618_v21 = vunpack.i.l.bf16 %v2616_v42  ;;  %v2619_v29 = vunpack.i.h.bf16 %v2616_v42 }
 0x1ea   : > { %v3764_v51 = vrot.slane %v3763_v25, 4  ;;  %v2607_v13 = vmax.f32 %v2605_v37, %v2606_v15  ;;  %v2631_v44 = vunpack.i.l.bf16 %v2629_v24  ;;  %v2632_v1 = vunpack.i.h.bf16 %v2629_v24 }
 0x1eb   : > { %v3778_v63 = vrot.slane %v3777_v56, 4  ;;  %v2642_v34 = vsel %vm173_vm2, %v1072_v60, 4286644096  ;;  %v2620_v46 = vmax.f32 %v2618_v21, %v2619_v29  ;;  %v2655_v37 = vsel %vm173_vm2, %v9150_v36, 4286644096 }
 0x1ec   : > { %v3769_v16 = vsel %vm7744_vm1, %v3764_v51, %v3768_v38  ;;  %v2644_v31 = vunpack.i.l.bf16 %v2642_v34  ;;  %v2608_v25 = vrot.slane %v2607_v13, 4  ;;  %v2633_v56 = vmax.f32 %v2631_v44, %v2632_v1 }
 0x1ed   : > { %v3783_v3 = vsel %vm7744_vm1, %v3778_v63, %v3782_v54  ;;  %v2645_v58 = vunpack.i.h.bf16 %v2642_v34  ;;  %v2621_v42 = vrot.slane %v2620_v46, 4  ;;  %v2668_v15 = vsel %vm173_vm2, %v9156_v17, 4286644096 }
 0x1ee   : > { %v6728_v50 = vcombine.low %v3769_v16, %v3783_v3  ;;  %v2609_v38 = vmax.f32 %v2607_v13, %v2608_v25  ;;  %v2634_v24 = vrot.slane %v2633_v56, 4  ;;  %v2657_v51 = vunpack.i.l.bf16 %v2655_v37 }
 0x1ef   : > { %v2646_v54 = vmax.f32 %v2644_v31, %v2645_v58  ;;  %v2622_v63 = vmax.f32 %v2620_v46, %v2621_v42  ;;  %v2658_v21 = vunpack.i.h.bf16 %v2655_v37  ;;  %v2670_v29 = vunpack.i.l.bf16 %v2668_v15 }
 0x1f0   : > { %7031 = vmatmul.mubr.msk.bf16.gmra.mrb[4].mxu0 %vm2810_vm7, %v6728_v50  ;;  %v2671_v44 = vunpack.i.h.bf16 %v2668_v15  ;;  %v2610_v1 = vrot.slane %v2609_v38, 2  ;;  %v2635_v34 = vmax.f32 %v2633_v56, %v2634_v24  ;;  %v2681_v13 = vsel %vm173_vm2, %v1095_v45, 4286644096 }
 0x1f1   : > { %7036 = vmatprep.mubr.msk.bf16.mxu0 %vm2810_vm7, %v6733_v26  ;;  %v2647_v16 = vrot.slane %v2646_v54, 4  ;;  %v2623_v3 = vrot.slane %v2622_v63, 2  ;;  %v2659_v58 = vmax.f32 %v2657_v51, %v2658_v21  ;;  %v2683_v50 = vunpack.i.l.bf16 %v2681_v13 }
 0x1f2   : > { %v2672_v31 = vmax.f32 %v2670_v29, %v2671_v44  ;;  %v2611_v25 = vmax.f32 %v2609_v38, %v2610_v1  ;;  %v2636_v10 = vrot.slane %v2635_v34, 2  ;;  %v2684_v26 = vunpack.i.h.bf16 %v2681_v13 }
 0x1f3   : > { %v2648_v53 = vmax.f32 %v2646_v54, %v2647_v16  ;;  %v2624_v46 = vmax.f32 %v2622_v63, %v2623_v3  ;;  %v2660_v42 = vrot.slane %v2659_v58, 4  ;;  %v2707_v56 = vsel %vm173_vm2, %v9153_v28, 4286644096 }
 0x1f4   : > { %v2673_v37 = vrot.slane %v2672_v31, 4  ;;  %v2612_v15 = vrot.slane %v2611_v25, 1  ;;  %v2637_v24 = vmax.f32 %v2635_v34, %v2636_v10  ;;  %v2685_v36 = vmax.f32 %v2683_v50, %v2684_v26 }
 0x1f5   : > { %v2649_v60 = vrot.slane %v2648_v53, 2  ;;  %v2625_v52 = vrot.slane %v2624_v46, 1  ;;  %v2661_v45 = vmax.f32 %v2659_v58, %v2660_v42  ;;  %v2709_v51 = vunpack.i.l.bf16 %v2707_v56 }
 0x1f6   : > { %v2674_v11 = vmax.f32 %v2672_v31, %v2673_v37  ;;  %v9225_v38 = vmax.f32 %v2611_v25, %v2612_v15  ;;  %v2638_v54 = vrot.slane %v2637_v24, 1  ;;  %v2686_v21 = vrot.slane %v2685_v36, 4 }
 0x1f7   : > { %v2650_v63 = vmax.f32 %v2648_v53, %v2649_v60  ;;  %v9232_v29 = vmax.f32 %v2624_v46, %v2625_v52  ;;  %v2662_v44 = vrot.slane %v2661_v45, 2  ;;  %v2710_v34 = vunpack.i.h.bf16 %v2707_v56 }
 0x1f8   : > { %7037 = vmatmul.mubr.msk.bf16.vlgmr.msra.gmra.mrb[0].mxu0 %vm2810_vm7, %v6734_v40  ;;  %v2675_v1 = vrot.slane %v2674_v11, 2  ;;  %v2614_v39 = vpack.i.bf16 %v9225_v38, %v9225_v38  ;;  %v9238_v19 = vmax.f32 %v2637_v24, %v2638_v54 }
 0x1f9   : > { %7045 = vmatpush3.bf16.msra.mxu0 %v9069_v12  ;;  %7040 = vmatprep.mubr.msk.bf16.mxu0 %vm2810_vm7, %v6735_v48  ;;  %v2651_v40 = vrot.slane %v2650_v63, 1  ;;  %v2687_v12 = vmax.f32 %v2685_v36, %v2686_v21  ;;  %v2627_v9 = vpack.i.bf16 %v9232_v29, %v9232_v29  ;;  %v2663_v61 = vmax.f32 %v2661_v45, %v2662_v44 }
 0x1fa   : > { %7318 = vmatprep.subr.msk.bf16.mxu0 %vm3810_vm0, %v9097_v62  ;;  %v2676_v48 = vmax.f32 %v2674_v11, %v2675_v1  ;;  %v2711_v52 = vmax.f32 %v2709_v51, %v2710_v34  ;;  %v2640_v60 = vpack.i.bf16 %v9238_v19, %v9238_v19  ;;  %v2720_v62 = vsel %vm173_vm2, %v9165_v14, 4286644096 }
 0x1fb   : > { %v9244_v16 = vmax.f32 %v2650_v63, %v2651_v40  ;;  %v2688_v13 = vrot.slane %v2687_v12, 2  ;;  %v2664_v3 = vrot.slane %v2663_v61, 1  ;;  %v2722_v50 = vunpack.i.l.bf16 %v2720_v62 }
 0x1fc   : > { %v2677_v58 = vrot.slane %v2676_v48, 1  ;;  %v2712_v31 = vrot.slane %v2711_v52, 4  ;;  %v2723_v53 = vunpack.i.h.bf16 %v2720_v62  ;;  %v2733_v11 = vsel %vm173_vm2, %v1119_v57, 4286644096 }
 0x1fd   : > { %v2653_v25 = vpack.i.bf16 %v9244_v16, %v9244_v16  ;;  %v2689_v10 = vmax.f32 %v2687_v12, %v2688_v13  ;;  %v9254_v26 = vmax.f32 %v2663_v61, %v2664_v3  ;;  %v2735_v37 = vunpack.i.l.bf16 %v2733_v11 }
 0x1fe   : > { %v9256_v46 = vmax.f32 %v2676_v48, %v2677_v58  ;;  %v2713_v42 = vmax.f32 %v2711_v52, %v2712_v31  ;;  %v2724_v15 = vmax.f32 %v2722_v50, %v2723_v53  ;;  %v2736_v24 = vunpack.i.h.bf16 %v2733_v11 }
 0x1ff   : > { %v2690_v56 = vrot.slane %v2689_v10, 1  ;;  %v10122_v36 = vcombine.high %v9165_v14, %v9165_v14  ;;  %v10123_v57 = vcombine.low %v9086_v23, %v9092_v55  ;;  %v2666_v45 = vpack.i.bf16 %v9254_v26, %v9254_v26 }
 0x200   : > { %7041 = vmatmul.mubr.msk.bf16.gmra.mrb[4].mxu0 %vm2810_vm7, %v6736_v18  ;;  %v2679_v27 = vpack.i.bf16 %v9256_v46, %v9256_v46  ;;  %v2714_v41 = vrot.slane %v2713_v42, 2  ;;  %v2725_v54 = vrot.slane %v2724_v15, 4  ;;  %v2737_v63 = vmax.f32 %v2735_v37, %v2736_v24 }
 0x201   : > { %v2746_v28 = vsel %vm173_vm2, %v10122_v36, 4286644096  ;;  %7046 = vmatprep.mubr.msk.bf16.mxu0 %vm2810_vm7, %v10123_v57  ;;  %v9274_v51 = vmax.f32 %v2689_v10, %v2690_v56  ;;  %v2759_v44 = vsel %vm173_vm2, %v9170_v35, 4286644096  ;;  %v2772_v23 = vsel %vm173_vm2, %v9189_v59, 4286644096 }
 0x202   : > { %v2748_v18 = vunpack.i.l.bf16 %v2746_v28  ;;  %v2749_v14 = vunpack.i.h.bf16 %v2746_v28  ;;  %v2715_v21 = vmax.f32 %v2713_v42, %v2714_v41  ;;  %v10124_v55 = vcombine.high %v9170_v35, %v9170_v35 }
 0x203   : > { %v2692_v34 = vpack.i.bf16 %v9274_v51, %v9274_v51  ;;  %v2726_v40 = vmax.f32 %v2724_v15, %v2725_v54  ;;  %v2738_v12 = vrot.slane %v2737_v63, 4  ;;  %v2761_v52 = vunpack.i.l.bf16 %v2759_v44 }
 0x204   : > { %v2785_v1 = vsel %vm173_vm2, %v10124_v55, 4286644096  ;;  %v2750_v61 = vmax.f32 %v2748_v18, %v2749_v14  ;;  %v2716_v48 = vrot.slane %v2715_v21, 1  ;;  %v2762_v13 = vunpack.i.h.bf16 %v2759_v44 }
 0x205   : > { %v2774_v62 = vunpack.i.l.bf16 %v2772_v23  ;;  %v2727_v3 = vrot.slane %v2726_v40, 2  ;;  %v2739_v58 = vmax.f32 %v2737_v63, %v2738_v12  ;;  %v2775_v50 = vunpack.i.h.bf16 %v2772_v23  ;;  %v7370_v23 = vld [vmem:[#allocation2 + $0x8] ss:$8 sps:$4 sm:$0xff]  }
 0x206   : > { %v2751_v31 = vrot.slane %v2750_v61, 4  ;;  %v2717_v10 = vmax.f32 %v2715_v21, %v2716_v48  ;;  %v2763_v53 = vmax.f32 %v2761_v52, %v2762_v13  ;;  %v2787_v11 = vunpack.i.l.bf16 %v2785_v1 }
 0x207   : > { %v2788_v35 = vunpack.i.h.bf16 %v2785_v1  ;;  %v10125_v42 = vcombine.low %v9109_v43, %v9116_v6  ;;  %v2728_v37 = vmax.f32 %v2726_v40, %v2727_v3  ;;  %v2740_v56 = vrot.slane %v2739_v58, 2 }
 0x208   : > { %v2752_v15 = vmax.f32 %v2750_v61, %v2751_v31  ;;  %v2776_v24 = vmax.f32 %v2774_v62, %v2775_v50  ;;  %v10126_v36 = vcombine.low %v9133_v32, %v9137_v2  ;;  %v2718_v28 = vpack.i.bf16 %v2717_v10, %v2717_v10 }
 0x209   : > { %7047 = vmatmul.mubr.msk.bf16.vlgmr.msra.gmra.mrb[0].mxu0 %vm2810_vm7, %v10125_v42  ;;  %v2764_v57 = vrot.slane %v2763_v53, 4  ;;  %v2789_v41 = vmax.f32 %v2787_v11, %v2788_v35  ;;  %v3204_v43 = vsel %vm2810_vm7, %v2614_v39, 4286644096  ;;  %v2729_v6 = vrot.slane %v2728_v37, 1 }
 0x20a   : > { %7055 = vmatpush3.bf16.msra.mxu0 %v9127_v33  ;;  %7050 = vmatprep.mubr.msk.bf16.mxu0 %vm2810_vm7, %v10126_v36  ;;  %v2741_v18 = vmax.f32 %v2739_v58, %v2740_v56  ;;  %v2753_v54 = vrot.slane %v2752_v15, 2  ;;  %v2777_v33 = vrot.slane %v2776_v24, 4  ;;  %v3207_v32 = vsel %vm2810_vm7, %v2718_v28, 4286644096  ;;  %v7372_v36 = vld [vmem:[#allocation2 + $0x28] ss:$8 sps:$4 sm:$0xff]  }
 0x20b   : > { %7319 = vmatprep.subr.msk.bf16.mxu0 %vm3810_vm0, %v9121_v49  ;;  %v2765_v63 = vmax.f32 %v2763_v53, %v2764_v57  ;;  %v2790_v14 = vrot.slane %v2789_v41, 4  ;;  %v3211_v2 = vsel %vm2810_vm7, %v2627_v9, 4286644096  ;;  %v2730_v21 = vmax.f32 %v2728_v37, %v2729_v6  ;;  %v7371_v37 = vld [vmem:[#allocation2 + $0x18] ss:$8 sps:$4 sm:$0xff]  }
 0x20c   : > { %v2742_v38 = vrot.slane %v2741_v18, 1  ;;  %v2754_v44 = vmax.f32 %v2752_v15, %v2753_v54  ;;  %v2778_v39 = vmax.f32 %v2776_v24, %v2777_v33  ;;  %v3209_v1 = vmax.bf16 %v3207_v32, %v3204_v43  ;;  %v9338_v32 = vld [vmem:[#allocation2 + $0xc] sm:$0x1] }
 0x20d   : > { %v2766_v55 = vrot.slane %v2765_v63, 2  ;;  %v2791_v49 = vmax.f32 %v2789_v41, %v2790_v14  ;;  %v3218_v40 = vsel %vm2810_vm7, %v2640_v60, 4286644096  ;;  %v2731_v12 = vpack.i.bf16 %v2730_v21, %v2730_v21 }
 0x20e   : > { %v2743_v61 = vmax.f32 %v2741_v18, %v2742_v38  ;;  %v2755_v48 = vrot.slane %v2754_v44, 1  ;;  %v2779_v52 = vrot.slane %v2778_v39, 2  ;;  %v3225_v9 = vsel %vm2810_vm7, %v2653_v25, 4286644096 }
 0x20f   : > { %v2767_v29 = vmax.f32 %v2765_v63, %v2766_v55  ;;  %v2792_v13 = vrot.slane %v2791_v49, 2  ;;  %v3232_v62 = vsel %vm2810_vm7, %v2666_v45, 4286644096  ;;  %v10127_v19 = vcombine.low %v9182_v4, %v9186_v47 }
 0x210   : > { %v2744_v60 = vpack.i.bf16 %v2743_v61, %v2743_v61  ;;  %v2756_v3 = vmax.f32 %v2754_v44, %v2755_v48  ;;  %v2780_v58 = vmax.f32 %v2778_v39, %v2779_v52  ;;  %v3214_v31 = vsel %vm2810_vm7, %v2731_v12, 4286644096  ;;  %v9352_v61 = vld [vmem:[#allocation2 + $0x14] sm:$0x1] }
 0x211   : > { %7051 = vmatmul.mubr.msk.bf16.gmra.mrb[4].mxu0 %vm2810_vm7, %v10127_v19  ;;  %v2768_v16 = vrot.slane %v2767_v29, 1  ;;  %v2793_v50 = vmax.f32 %v2791_v49, %v2792_v13  ;;  %v3216_v25 = vmax.bf16 %v3214_v31, %v3211_v2  ;;  %v3239_v26 = vsel %vm2810_vm7, %v2679_v27, 4286644096  ;;  %v9343_v2 = vld [vmem:[%s10035_s1 + $0xa] sm:$0x3] }
 0x212   : > { %7056 = vmatprep.mubr.msk.bf16.mxu0 %vm2810_vm7, %v7370_v23  ;;  %v2757_v45 = vpack.i.bf16 %v2756_v3, %v2756_v3  ;;  %v2781_v10 = vrot.slane %v2780_v58, 1  ;;  %v3221_v4 = vsel %vm2810_vm7, %v2744_v60, 4286644096  ;;  %v3246_v47 = vsel %vm2810_vm7, %v2692_v34, 4286644096 }
 0x213   : > { %v2769_v53 = vmax.f32 %v2767_v29, %v2768_v16  ;;  %v2794_v11 = vrot.slane %v2793_v50, 1  ;;  %v3223_v35 = vmax.bf16 %v3221_v4, %v3218_v40  ;;  %v6708_v42 = vcombine.low %v3209_v1, %v3209_v1 }
 0x214   : > { %v2782_v56 = vmax.f32 %v2780_v58, %v2781_v10  ;;  %v3228_v15 = vsel %vm2810_vm7, %v2757_v45, 4286644096  ;;  %v6709_v46 = vcombine.low %v3216_v25, %v3216_v25  ;;  %v10128_v27 = vshrl.u32 %v9198_v20, 16 }
 0x215   : > { %v2770_v28 = vpack.i.bf16 %v2769_v53, %v2769_v53  ;;  %v2795_v57 = vmax.f32 %v2793_v50, %v2794_v11  ;;  %v3230_v41 = vmax.bf16 %v3228_v15, %v3225_v9  ;;  %v6710_v43 = vcombine.low %v3223_v35, %v3223_v35  ;;  %v4264_v50 = vld [vmem:[#allocation2 + $0x20] sm:$0xf]  ;;  %v9361_v11 = vld [vmem:[#allocation2 + $0x1c] sm:$0x1]  ;;  %v9363_v35 = vld [vmem:[#allocation2 + $0x24] sm:$0x1] }
 0x216   : > { %v4277_v24 = vrot.slane %v10128_v27, 4  ;;  %v2783_v51 = vpack.i.bf16 %v2782_v56, %v2782_v56  ;;  %v3507_v6 = vunpack.c.l.b16 %v6708_v42  ;;  %v3508_v34 = vunpack.c.l.b16 %v6709_v46  ;;  %v3646_v56 = vld [vmem:[#allocation2 + $0x40] sm:$0xf] }
 0x217   : > { %v4278_v18 = vshll.u32 %v9198_v20, 16  ;;  %v2796_v54 = vpack.i.bf16 %v2795_v57, %v2795_v57  ;;  %v3235_v33 = vsel %vm2810_vm7, %v2770_v28, 4286644096  ;;  %v6711_v63 = vcombine.low %v3230_v41, %v3230_v41  ;;  %v4260_v20 = vld [vmem:[#allocation2 + $0x10] sm:$0xf] }
 0x218   : > { %v3509_v14 = vunpack.c.l.b16 %v6710_v43  ;;  %v3237_v21 = vmax.bf16 %v3235_v33, %v3232_v62  ;;  %v3242_v38 = vsel %vm2810_vm7, %v2783_v51, 4286644096  ;;  %v3563_v44 = vsel %vm3515_vm8, %v3508_v34, %v3507_v6  ;;  %v4262_v62 = vld [vmem:[#allocation2 + $0x18] sm:$0xf]  ;;  %v4266_v41 = vld [vmem:[#allocation2 + $0x28] sm:$0xf] }
 0x219   : > { %7057 = vmatmul.mubr.msk.bf16.vlgmr.msra.gmra.mrb[0].mxu0 %vm2810_vm7, %v7371_v37  ;;  %v4280_v39 = vrot.slane %v4278_v18, 5  ;;  %v3244_v23 = vmax.bf16 %v3242_v38, %v3239_v26  ;;  %v3249_v55 = vsel %vm2810_vm7, %v2796_v54, 4286644096  ;;  %v3510_v49 = vunpack.c.l.b16 %v6711_v63  ;;  %v9366_v51 = vld [vmem:[#allocation2 + $0x2c] sm:$0x1] }
 0x21a   : > { %7065 = vmatpush3.bf16.msra.mxu0 %v9144_v30  ;;  %7060 = vmatprep.mubr.msk.bf16.mxu0 %vm2810_vm7, %v7372_v36  ;;  %v3564_v1 = vsel %vm3517_vm9, %v3509_v14, %v3563_v44  ;;  %v3251_v40 = vmax.bf16 %v3249_v55, %v3246_v47  ;;  %v6712_v12 = vcombine.low %v3237_v21, %v3237_v21  ;;  %v4284_v52 = vshll.u32 %v9338_v32, 16  ;;  %v4268_v6 = vld [vmem:[#allocation2 + $0x30] sm:$0xf]  ;;  %v9373_v63 = vld [vmem:[#allocation2 + $0x34] sm:$0x1] }
 0x21b   : > { %v4281_v48 = vor.u32 %v4280_v39, %v4277_v24  ;;  %7320 = vmatprep.subr.msk.bf16.mxu0 %vm3810_vm0, %v9343_v2  ;;  %v6713_v29 = vcombine.low %v3244_v23, %v3244_v23  ;;  %v3565_v30 = vsel %vm3519_vm10, %v3510_v49, %v3564_v1  ;;  %v4289_v13 = vshrl.u32 %v4260_v20, 16  ;;  %v237_v55 = vld [vmem:[#allocation2 + $0x44] sm:$0x1] }
 0x21c   : > { %v4292_v9 = vshll.u32 %v4260_v20, 16  ;;  %v6714_v19 = vcombine.low %v3251_v40, %v3251_v40  ;;  %v3511_v60 = vunpack.c.l.b16 %v6712_v12  ;;  %v4298_v16 = vshll.u32 %v9352_v61, 16 }
 0x21d   : > { %v3512_v3 = vunpack.c.l.b16 %v6713_v29  ;;  %v4291_v58 = vrot.slane %v4289_v13, 4  ;;  %v4282_v45 = vrot.slane %v4281_v48, 4  ;;  %v4303_v10 = vshrl.u32 %v4262_v62, 16 }
 0x21e   : > { %v4294_v31 = vrot.slane %v4292_v9, 5  ;;  %v3513_v25 = vunpack.c.l.b16 %v6714_v19  ;;  %v3566_v26 = vsel %vm3521_vm11, %v3511_v60, %v3565_v30  ;;  %v4286_v47 = vrot.slane %v4284_v52, 5 }
 0x21f   : > { %v3567_v4 = vsel %vm3523_vm12, %v3512_v3, %v3566_v26  ;;  %v4306_v42 = vshll.u32 %v4262_v62, 16  ;;  %v4300_v15 = vrot.slane %v4298_v16, 5  ;;  %v4305_v46 = vrot.slane %v4303_v10, 4 }
 0x220   : > { %v4295_v53 = vor.u32 %v4294_v31, %v4291_v58  ;;  %v3568_v37 = vsel %vm3525_vm13, %v3513_v25, %v3567_v4  ;;  %v4317_v27 = vshrl.u32 %v4264_v50, 16  ;;  %v4320_v57 = vshll.u32 %v4264_v50, 16 }
 0x221   : > { %v3583_v24 = vpack.c.b16 %v3568_v37, %v3568_v37  ;;  %v4308_v28 = vrot.slane %v4306_v42, 5  ;;  %v4287_v18 = vsel %vm7744_vm1, %v4282_v45, %v4286_v47  ;;  %v4312_v54 = vshll.u32 %v9361_v11, 16 }
 0x222   : > { %v4296_v36 = vrot.slane %v4295_v53, 4  ;;  %v4319_v43 = vrot.slane %v4317_v27, 4  ;;  %v4322_v33 = vrot.slane %v4320_v57, 5  ;;  %v4326_v21 = vshll.u32 %v9363_v35, 16 }
 0x223   : > { %v3647_v34 = vsel %vm7732_vm3, %v3583_v24, %v3646_v56  ;;  %v4331_v38 = vshrl.u32 %v4266_v41, 16  ;;  %v4334_v44 = vshll.u32 %v4266_v41, 16  ;;  %v4309_v20 = vor.u32 %v4308_v28, %v4305_v46 }
 0x224   : > { %3648 = vst [vmem:[#allocation2 + $0x40] sm:$0xf] %v3647_v34  ;;  %v4301_v14 = vsel %vm7744_vm1, %v4296_v36, %v4300_v15  ;;  %v4323_v39 = vor.u32 %v4322_v33, %v4319_v43  ;;  %v4340_v0 = vshll.u32 %v9366_v51, 16  ;;  %v4345_v23 = vshrl.u32 %v4268_v6, 16 }
 0x225   : > { %v4333_v49 = vrot.slane %v4331_v38, 4  ;;  %v4336_v1 = vrot.slane %v4334_v44, 5  ;;  %v4348_v40 = vshll.u32 %v4268_v6, 16  ;;  %v4354_v12 = vshll.u32 %v9373_v63, 16 }
 0x226   : > { %v6768_v48 = vcombine.low %v4287_v18, %v4301_v14  ;;  %v4314_v52 = vrot.slane %v4312_v54, 5  ;;  %v4347_v29 = vrot.slane %v4345_v23, 4  ;;  %v4328_v30 = vrot.slane %v4326_v21, 5  ;;  %v9403_v18 = vld [vmem:[%s10035_s1 + $0xc] sm:$0x3] }
 0x227   : > { %v4337_v13 = vor.u32 %v4336_v1, %v4333_v49  ;;  %v4350_v9 = vrot.slane %v4348_v40, 5  ;;  %v238_v62 = vsel %vm7561_vm6, 0, %v237_v55  ;;  %v4310_v19 = vrot.slane %v4309_v20, 4  ;;  %v4270_v23 = vld [vmem:[#allocation2 + $0x38] sm:$0xf] }
 0x228   : > { %v4324_v60 = vrot.slane %v4323_v39, 4  ;;  %239 = vst [vmem:[#allocation2 + $0x44] sm:$0x1] %v238_v62  ;;  %v1096_v3 = vcombine.high %v9156_v17, %v9156_v17  ;;  %v1144_v58 = vcombine.high %v9189_v59, %v9189_v59  ;;  %v4342_v16 = vrot.slane %v4340_v0, 5 }
 0x229   : > { %v4338_v31 = vrot.slane %v4337_v13, 4  ;;  %v4351_v50 = vor.u32 %v4350_v9, %v4347_v29  ;;  %v4356_v25 = vrot.slane %v4354_v12, 5  ;;  %v4315_v53 = vsel %vm7744_vm1, %v4310_v19, %v4314_v52 }
 0x22a   : > { %v2694_v45 = vsel %vm173_vm2, %v1096_v3, 4286644096  ;;  %v2798_v17 = vsel %vm173_vm2, %v1144_v58, 4286644096  ;;  %v4329_v59 = vsel %vm7744_vm1, %v4324_v60, %v4328_v30  ;;  %v4571_v43 = vsel %vm3810_vm0, %v9343_v2, 0 }
 0x22b   : > { %v7373_v26 = vld [vmem:[#allocation2 + $0x38] ss:$8 sps:$4 sm:$0xff]   ;;  %v4352_v10 = vrot.slane %v4351_v50, 4  ;;  %v2696_v4 = vunpack.i.l.bf16 %v2694_v45  ;;  %v2697_v47 = vunpack.i.h.bf16 %v2694_v45  ;;  %v2800_v37 = vunpack.i.l.bf16 %v2798_v17  ;;  %v208_v2 = vld [vmem:[#allocation2 + $0x48] sm:$0x1] }
 0x22c   : > { %7061 = vmatmul.mubr.msk.bf16.gmra.mrb[4].mxu0 %vm2810_vm7, %v7373_v26  ;;  %v2801_v56 = vunpack.i.h.bf16 %v2798_v17  ;;  %v4343_v15 = vsel %vm7744_vm1, %v4338_v31, %v4342_v16  ;;  %v6769_v36 = vcombine.low %v4315_v53, %v4329_v59  ;;  %v209_v20 = vsel %vm7551_vm4, 0, %v208_v2  ;;  %v4272_v1 = vld [vmem:[#allocation2 + $0x40] sm:$0xf]  ;;  %v9415_v3 = vld [vmem:[#allocation2 + $0x3c] sm:$0x1] }
 0x22d   : > { %7066 = vmatprep.mubr.msk.bf16.mxu0 %vm2810_vm7, %v6768_v48  ;;  %v2698_v42 = vmax.f32 %v2696_v4, %v2697_v47  ;;  %v4357_v46 = vsel %vm7744_vm1, %v4352_v10, %v4356_v25  ;;  %210 = vst [vmem:[#allocation2 + $0x48] sm:$0x1] %v209_v20  ;;  %v4359_v12 = vshrl.u32 %v4270_v23, 16  ;;  %v4362_v48 = vshll.u32 %v4270_v23, 16  ;;  %v4488_v16 = vld [vmem:[#allocation2 + $0x8] sm:$0xe] }
 0x22e   : > { %v2802_v24 = vmax.f32 %v2800_v37, %v2801_v56  ;;  %v6770_v28 = vcombine.low %v4343_v15, %v4357_v46  ;;  %v4373_v30 = vshrl.u32 %v4272_v1, 16  ;;  %v4376_v13 = vshll.u32 %v4272_v1, 16  ;;  %v240_v50 = vld [vmem:[#allocation2 + $0x4c] sm:$0x1]  ;;  %v4489_v25 = vld [vmem:[#allocation2 + $0x10] sm:$0xe] }
 0x22f   : > { %v2699_v27 = vrot.slane %v2698_v42, 4  ;;  %v3649_v29 = vld [vmem:[#allocation2 + $0x44] sm:$0x1]  ;;  %v4361_v62 = vrot.slane %v4359_v12, 4  ;;  %v4364_v19 = vrot.slane %v4362_v48, 5  ;;  %v4368_v45 = vshll.u32 %v9415_v3, 16 }
 0x230   : > { %v2803_v41 = vrot.slane %v2802_v24, 4  ;;  %v4375_v58 = vrot.slane %v4373_v30, 4  ;;  %v4378_v31 = vrot.slane %v4376_v13, 5  ;;  %v6776_v10 = vrot.slane %v4488_v16, 9  ;;  %v4494_v20 = vld [vmem:[#allocation2 + $0x38] sm:$0xe] }
 0x231   : > { %v2700_v57 = vmax.f32 %v2698_v42, %v2699_v27  ;;  %v4365_v26 = vor.u32 %v4364_v19, %v4361_v62  ;;  %v241_v4 = vsel %vm7561_vm6, 0, %v240_v50  ;;  %v4514_v53 = vrot.slane %v9338_v32, 5  ;;  %v4490_v27 = vld [vmem:[#allocation2 + $0x18] sm:$0xe]  ;;  %v4492_v32 = vld [vmem:[#allocation2 + $0x28] sm:$0xe] }
 0x232   : > { %v2804_v34 = vmax.f32 %v2802_v24, %v2803_v41  ;;  %v4379_v47 = vor.u32 %v4378_v31, %v4375_v58  ;;  %v6777_v5 = vrot.slane %v4489_v25, 9  ;;  %v4518_v17 = vrot.slane %v9352_v61, 5  ;;  %242 = vst [vmem:[#allocation2 + $0x4c] sm:$0x1] %v241_v4  ;;  %v4491_v24 = vld [vmem:[#allocation2 + $0x20] sm:$0xe] }
 0x233   : > { %v2701_v6 = vrot.slane %v2700_v57, 2  ;;  %v4366_v59 = vrot.slane %v4365_v26, 4  ;;  %v4370_v42 = vrot.slane %v4368_v45, 5  ;;  %v4515_v46 = vsel %vm9075_vm5, %v6776_v10, %v4514_v53  ;;  %v261_v1 = vld [vmem:[#allocation3 + $0x18] sm:$0x1] }
 0x234   : > { %7067 = vmatmul.mubr.msk.bf16.vlgmr.msra.gmra.mrb[0].mxu0 %vm2810_vm7, %v6769_v36  ;;  %v2805_v33 = vrot.slane %v2804_v34, 2  ;;  %v4380_v56 = vrot.slane %v4379_v47, 4  ;;  %v4519_v8 = vsel %vm9075_vm5, %v6777_v5, %v4518_v17  ;;  %v6778_v41 = vrot.slane %v4490_v27, 9  ;;  %v4769_v25 = vld [vmem:[#allocation2 + $0x20] sm:$0xf] }
 0x235   : > { %7075 = vmatpush3.bf16.msra.mxu0 %v4571_v43  ;;  %7070 = vmatprep.mubr.msk.bf16.mxu0 %vm2810_vm7, %v6770_v28  ;;  %v2702_v54 = vmax.f32 %v2700_v57, %v2701_v6  ;;  %v4371_v61 = vsel %vm7744_vm1, %v4366_v59, %v4370_v42  ;;  %v4493_v28 = vld [vmem:[#allocation2 + $0x30] sm:$0xe]  ;;  %v6785_v57 = vcombine.low %v4515_v46, %v4519_v8  ;;  %v4522_v43 = vrot.slane %v9361_v11, 5  ;;  %v9481_v26 = vld [vmem:[#allocation2 + $0x14] sm:$0x1] }
 0x236   : > { %7321 = vmatprep.subr.msk.bf16.mxu0 %vm3810_vm0, %v9403_v18  ;;  %v2806_v21 = vmax.f32 %v2804_v34, %v2805_v33  ;;  %v6779_v34 = vrot.slane %v4491_v24, 9  ;;  %v6780_v33 = vrot.slane %v4492_v32, 9  ;;  %v6781_v2 = vrot.slane %v4493_v28, 9  ;;  %v9483_v45 = vld [vmem:[#allocation2 + $0x1c] sm:$0x1] }
 0x237   : > { %v2703_v14 = vrot.slane %v2702_v54, 1  ;;  %v4523_v11 = vsel %vm9075_vm5, %v6778_v41, %v4522_v43  ;;  %vm243_vm2 = vcmask 60416   ;;  %vm245_vm3 = vcmask 57344   ;;  %v7374_v42 = vld [vmem:[#allocation2 + $0x10] ss:$8 sps:$4 sm:$0xff]  }
 0x238   : > { %v2807_v44 = vrot.slane %v2806_v21, 1  ;;  %v4690_v30 = vsel %vm3810_vm0, %v9403_v18, 0  ;;  %vm10133_vm8 = vsmask.f32 7938  ;;  %v4773_v46 = vld [vmem:[#allocation2 + $0x30] sm:$0xf] }
 0x239   : > { %v2704_v38 = vmax.f32 %v2702_v54, %v2703_v14  ;;  %v4526_v54 = vrot.slane %v9363_v35, 5  ;;  %vm9468_vm9 = vmand %vm245_vm3, %vm10133_vm8  ;;  %v4791_v27 = vshll.u32 %v9481_v26, 16  ;;  %v4805_v24 = vshll.u32 %v9483_v45, 16  ;;  %v7375_v43 = vld [vmem:[#allocation2 + $0x20] ss:$8 sps:$4 sm:$0xff]  }
 0x23a   : > { %v2808_v0 = vmax.f32 %v2806_v21, %v2807_v44  ;;  %v4530_v21 = vrot.slane %v9366_v51, 5  ;;  %v4810_v32 = vshrl.u32 %v4769_v25, 16  ;;  %v4813_v28 = vshll.u32 %v4769_v25, 16 }
 0x23b   : > { %v2705_v39 = vpack.i.bf16 %v2704_v38, %v2704_v38  ;;  %v4534_v38 = vrot.slane %v9373_v63, 5  ;;  %v4527_v44 = vsel %vm9075_vm5, %v6779_v34, %v4526_v54  ;;  %v4767_v63 = vld [vmem:[#allocation2 + $0x18] sm:$0xf]  ;;  %v4841_v34 = vshll.u32 %v4773_v46, 16 }
 0x23c   : > { %v2809_v55 = vpack.i.bf16 %v2808_v0, %v2808_v0  ;;  %v4531_v35 = vsel %vm9075_vm5, %v6780_v33, %v4530_v21  ;;  %v4765_v0 = vld [vmem:[#allocation2 + $0x10] sm:$0xf]  ;;  %v6786_v23 = vcombine.low %v4523_v11, %v4527_v44  ;;  %v4799_v58 = vshll.u32 %v4767_v63, 16  ;;  %v9493_v11 = vld [vmem:[#allocation2 + $0x24] sm:$0x1] }
 0x23d   : > { %v3253_v49 = vsel %vm2810_vm7, %v2705_v39, 4286644096  ;;  %v4535_v51 = vsel %vm9075_vm5, %v6781_v2, %v4534_v38  ;;  %v4495_v39 = vld [vmem:[#allocation2 + $0x40] sm:$0xe]  ;;  %v4782_v62 = vshrl.u32 %v4765_v0, 16  ;;  %v4785_v19 = vshll.u32 %v4765_v0, 16 }
 0x23e   : > { %v3256_v40 = vsel %vm2810_vm7, %v2809_v55, 4286644096  ;;  %v6782_v55 = vrot.slane %v4494_v20, 9  ;;  %v6783_v12 = vrot.slane %v4495_v39, 9  ;;  %v4801_v5 = vrot.slane %v4799_v58, 5 }
 0x23f   : > { %v3258_v52 = vmax.bf16 %v3256_v40, %v3253_v49  ;;  %v4538_v49 = vrot.slane %v9415_v3, 5  ;;  %v6787_v40 = vcombine.low %v4531_v35, %v4535_v51  ;;  %v4796_v3 = vshrl.u32 %v4767_v63, 16  ;;  %v9495_v35 = vld [vmem:[#allocation2 + $0x2c] sm:$0x1] }
 0x240   : > { %v4784_v10 = vrot.slane %v4782_v62, 4  ;;  %v4787_v4 = vrot.slane %v4785_v19, 5  ;;  %v4793_v2 = vrot.slane %v4791_v27, 5  ;;  %v4807_v38 = vrot.slane %v4805_v24, 5  ;;  %v9506_v62 = vld [vmem:[#allocation2 + $0x3c] sm:$0x1] }
 0x241   : > { %v6925_v9 = vcombine.low %v3258_v52, %v3258_v52  ;;  %v10129_v52 = vmov 0   ;;  %v4539_v16 = vsel %vm9075_vm5, %v6782_v55, %v4538_v49  ;;  %v4798_v53 = vrot.slane %v4796_v3, 4  ;;  %v4777_v55 = vld [vmem:[#allocation2 + $0x40] sm:$0xf] }
 0x242   : > { %244 = vst.msk [vmem:[#allocation3] sm:$0xf] %vm243_vm2, %v10129_v52  ;;  %248 = vst.msk [vmem:[#allocation3 + $0x48] sm:$0xf] %vm243_vm2, %v10129_v52  ;;  %v4788_v8 = vor.u32 %v4787_v4, %v4784_v10  ;;  %v4812_v44 = vrot.slane %v4810_v32, 4  ;;  %v4815_v51 = vrot.slane %v4813_v28, 5 }
 0x243   : > { %v3650_v60 = vsel %vm7551_vm4, %v6925_v9, %v3649_v29  ;;  %v292_v29 = vld [vmem:[#allocation3 + $0x1c] sm:$0x1]  ;;  %vm10130_vm4 = vsmask.f32 256  ;;  %246 = vst.msk [vmem:[#allocation3 + $0x4] sm:$0x1] %vm245_vm3, %v10129_v52 }
 0x244   : > { %3651 = vst [vmem:[#allocation2 + $0x44] sm:$0x1] %v3650_v60  ;;  %vm9456_vm6 = vmand %vm245_vm3, %vm10130_vm4  ;;  %v6802_v9 = vld [vmem:[%s10035_s1 + $0xe] sm:$0x3]  ;;  %v293_v31 = vsel %vm9468_vm9, 0, %v292_v29  ;;  %v4789_v21 = vrot.slane %v4788_v8, 4  ;;  %v4816_v19 = vor.u32 %v4815_v51, %v4812_v44 }
 0x245   : > { %249 = vst.msk [vmem:[#allocation3 + $0x4c] sm:$0x1] %vm245_vm3, %v10129_v52  ;;  %v262_v60 = vsel %vm9456_vm6, 0, %v261_v1  ;;  %294 = vst [vmem:[#allocation3 + $0x1c] sm:$0x1] %v293_v31  ;;  %v4920_v63 = vsel %vm3810_vm0, %v6802_v9, 0 }
 0x246   : > { %263 = vst [vmem:[#allocation3 + $0x18] sm:$0x1] %v262_v60  ;;  %v4843_v1 = vrot.slane %v4841_v34, 5  ;;  %v4794_v52 = vsel %vm7744_vm1, %v4789_v21, %v4793_v2  ;;  %v4819_v29 = vshll.u32 %v9493_v11, 16  ;;  %v4833_v3 = vshll.u32 %v9495_v35, 16 }
 0x247   : > { %v4866_v58 = vshrl.u32 %v4777_v55, 16  ;;  %v4869_v31 = vshll.u32 %v4777_v55, 16  ;;  %v9518_v28 = vld [vmem:[#allocation2 + $0x4c] sm:$0x1]  ;;  %v4995_v21 = vld [vmem:[#allocation2 + $0x10] sm:$0xe] }
 0x248   : > { %v4996_v2 = vld [vmem:[#allocation2 + $0x18] sm:$0xe]  ;;  %v6811_v55 = vrot.slane %v4995_v21, 9  ;;  %v304_v21 = vld [vmem:[#allocation3 + $0x3c] sm:$0x1]  ;;  %vm5459_vm11 = vcmask 64512  }
 0x249   : > { %v252_v17 = vld [vmem:[#allocation3] sm:$0x1]  ;;  %v279_v59 = vld [vmem:[#allocation3 + $0x48] sm:$0x1] }
 0x24b   : > { %v9422_v37 = vld [vmem:[#allocation2 + $0x44] sm:$0x1] }
 0x24c   : > { %v4382_v15 = vshll.u32 %v9422_v37, 16  ;;  %v4542_v48 = vrot.slane %v9422_v37, 5  ;;  %v4771_v37 = vld [vmem:[#allocation2 + $0x28] sm:$0xf] }
 0x24d   : > { %v4827_v41 = vshll.u32 %v4771_v37, 16 }
 0x24e   : > { %v4384_v36 = vrot.slane %v4382_v15, 5  ;;  %v4543_v50 = vsel %vm9075_vm5, %v6783_v12, %v4542_v48  ;;  %v280_v15 = vsel %vm9456_vm6, 0, %v279_v59  ;;  %v4779_v48 = vld [vmem:[#allocation2 + $0x48] sm:$0xf]  ;;  %v4817_v59 = vrot.slane %v4816_v19, 4 }
 0x24f   : > { %v6788_v47 = vcombine.low %v4539_v16, %v4543_v50  ;;  %281 = vst [vmem:[#allocation3 + $0x48] sm:$0x1] %v280_v15  ;;  %v4829_v0 = vrot.slane %v4827_v41, 5  ;;  %v4880_v16 = vshrl.u32 %v4779_v48, 16  ;;  %v4883_v50 = vshll.u32 %v4779_v48, 16 }
 0x250   : > { %v4385_v6 = vsel %vm7744_vm1, %v4380_v56, %v4384_v36  ;;  %v253_v56 = vsel %vm9456_vm6, 0, %v252_v17  ;;  %v4802_v36 = vor.u32 %v4801_v5, %v4798_v53  ;;  %v4821_v53 = vrot.slane %v4819_v29, 5  ;;  %v7377_v5 = vld [vmem:[#allocation2 + $0x40] ss:$8 sps:$4 sm:$0xff]  }
 0x251   : > { %v6771_v14 = vcombine.low %v4371_v61, %v4385_v6  ;;  %254 = vst [vmem:[#allocation3] sm:$0x1] %v253_v56  ;;  %v4775_v61 = vld [vmem:[#allocation2 + $0x38] sm:$0xf]  ;;  %v4838_v6 = vshrl.u32 %v4773_v46, 16  ;;  %v4868_v15 = vrot.slane %v4866_v58, 4 }
 0x252   : > { %v4852_v54 = vshrl.u32 %v4775_v61, 16  ;;  %v4855_v33 = vshll.u32 %v4775_v61, 16  ;;  %v4803_v20 = vrot.slane %v4802_v36, 4  ;;  %v9516_v56 = vld [vmem:[#allocation2 + $0x44] sm:$0x1]  ;;  %v4871_v46 = vrot.slane %v4869_v31, 5 }
 0x253   : > { %7071 = vmatmul.mubr.msk.bf16.gmra.mrb[4].mxu0 %vm2810_vm7, %v6771_v14  ;;  %v7376_v14 = vld [vmem:[#allocation2 + $0x30] ss:$8 sps:$4 sm:$0xff]   ;;  %v4840_v49 = vrot.slane %v4838_v6, 4  ;;  %v4882_v8 = vrot.slane %v4880_v16, 4  ;;  %v4885_v27 = vrot.slane %v4883_v50, 5  ;;  %v4875_v41 = vshll.u32 %v9516_v56, 16 }
 0x254   : > { %7076 = vmatprep.mubr.msk.bf16.mxu0 %vm2810_vm7, %v6785_v57  ;;  %v4824_v57 = vshrl.u32 %v4771_v37, 16  ;;  %v4857_v12 = vrot.slane %v4855_v33, 5  ;;  %v4835_v37 = vrot.slane %v4833_v3, 5  ;;  %v4872_v6 = vor.u32 %v4871_v46, %v4868_v15  ;;  %v4997_v48 = vld [vmem:[#allocation2 + $0x20] sm:$0xe] }
 0x255   : > { %v4844_v25 = vor.u32 %v4843_v1, %v4840_v49  ;;  %v4886_v34 = vor.u32 %v4885_v27, %v4882_v8  ;;  %v5021_v49 = vrot.slane %v9481_v26, 5  ;;  %v6812_v1 = vrot.slane %v4996_v2, 9  ;;  %v4998_v29 = vld [vmem:[#allocation2 + $0x28] sm:$0xe] }
 0x256   : > { %v4826_v39 = vrot.slane %v4824_v57, 4  ;;  %v4822_v57 = vsel %vm7744_vm1, %v4817_v59, %v4821_v53  ;;  %v5029_v58 = vrot.slane %v9493_v11, 5  ;;  %v6814_v31 = vrot.slane %v4998_v29, 9  ;;  %v5001_v11 = vld [vmem:[#allocation2 + $0x40] sm:$0xe] }
 0x257   : > { %v4845_v24 = vrot.slane %v4844_v25, 4  ;;  %v5033_v16 = vrot.slane %v9495_v35, 5  ;;  %v5049_v15 = vrot.slane %v9518_v28, 5  ;;  %v305_v2 = vsel %vm9468_vm9, 0, %v304_v21 }
 0x258   : > { %v4830_v60 = vor.u32 %v4829_v0, %v4826_v39  ;;  %v4873_v39 = vrot.slane %v4872_v6, 4  ;;  %v4887_v0 = vrot.slane %v4886_v34, 4  ;;  %v289_v6 = vld [vmem:[#allocation3 + $0x14] sm:$0x1]  ;;  %306 = vst [vmem:[#allocation3 + $0x3c] sm:$0x1] %v305_v2 }
 0x259   : > { %v5034_v53 = vsel %vm9075_vm5, %v6814_v31, %v5033_v16 }
 0x25b   : > { %7077 = vmatmul.mubr.msk.bf16.vlgmr.msra.gmra.mrb[0].mxu0 %vm2810_vm7, %v6786_v23  ;;  %v6819_v23 = vld [vmem:[%s10035_s1 + $0x10] sm:$0x3] }
 0x25c   : > { %7085 = vmatpush3.bf16.msra.mxu0 %v4690_v30  ;;  %7080 = vmatprep.mubr.msk.bf16.mxu0 %vm2810_vm7, %v6787_v40  ;;  %v4854_v40 = vrot.slane %v4852_v54, 4  ;;  %v9504_v30 = vld [vmem:[#allocation2 + $0x34] sm:$0x1]  ;;  %v4889_v54 = vshll.u32 %v9518_v28, 16  ;;  %v5078_v44 = vsel %vm3810_vm0, %v6819_v23, 0 }
 0x25d   : > { %7322 = vmatprep.subr.msk.bf16.mxu0 %vm3810_vm0, %v6802_v9  ;;  %v4808_v9 = vsel %vm7744_vm1, %v4803_v20, %v4807_v38  ;;  %v4847_v10 = vshll.u32 %v9504_v30, 16  ;;  %v4877_v20 = vrot.slane %v4875_v41, 5  ;;  %v5037_v25 = vrot.slane %v9504_v30, 5  ;;  %v295_v28 = vld [vmem:[#allocation3 + $0x24] sm:$0x1] }
 0x25e   : > { %v4858_v4 = vor.u32 %v4857_v12, %v4854_v40  ;;  %v6803_v17 = vcombine.low %v4794_v52, %v4808_v9  ;;  %v5025_v40 = vrot.slane %v9483_v45, 5  ;;  %v5022_v52 = vsel %vm9075_vm5, %v6811_v55, %v5021_v49  ;;  %v4999_v45 = vld [vmem:[#allocation2 + $0x30] sm:$0xe]  ;;  %v5000_v9 = vld [vmem:[#allocation2 + $0x38] sm:$0xe] }
 0x25f   : > { %v4849_v32 = vrot.slane %v4847_v10, 5  ;;  %v4878_v12 = vsel %vm7744_vm1, %v4873_v39, %v4877_v20  ;;  %v6815_v50 = vrot.slane %v4999_v45, 9  ;;  %v6816_v10 = vrot.slane %v5000_v9, 9  ;;  %v298_v20 = vld [vmem:[#allocation3 + $0x2c] sm:$0x1] }
 0x260   : > { %v4859_v61 = vrot.slane %v4858_v4, 4  ;;  %v5026_v26 = vsel %vm9075_vm5, %v6812_v1, %v5025_v40  ;;  %v5041_v4 = vrot.slane %v9506_v62, 5  ;;  %v296_v41 = vsel %vm9468_vm9, 0, %v295_v28  ;;  %v307_v39 = vld [vmem:[#allocation3 + $0x44] sm:$0x1] }
 0x261   : > { %v4850_v33 = vsel %vm7744_vm1, %v4845_v24, %v4849_v32  ;;  %v6820_v3 = vcombine.low %v5022_v52, %v5026_v26  ;;  %v5038_v35 = vsel %vm9075_vm5, %v6815_v50, %v5037_v25  ;;  %v255_v24 = vld [vmem:[#allocation3 + $0x8] sm:$0x1]  ;;  %v286_v32 = vld [vmem:[#allocation3 + $0xc] sm:$0x1]  ;;  %297 = vst [vmem:[#allocation3 + $0x24] sm:$0x1] %v296_v41 }
 0x262   : > { %v5042_v30 = vsel %vm9075_vm5, %v6816_v10, %v5041_v4  ;;  %v308_v55 = vsel %vm9468_vm9, 0, %v307_v39  ;;  %v270_v49 = vld [vmem:[#allocation3 + $0x30] sm:$0x1]  ;;  %v301_v40 = vld [vmem:[#allocation3 + $0x34] sm:$0x1]  ;;  %v7465_v52 = vmov 0.0  }
 0x263   : > { %7081 = vmatmul.mubr.msk.bf16.gmra.mrb[4].mxu0 %vm2810_vm7, %v6788_v47  ;;  %v4861_v47 = vshll.u32 %v9506_v62, 16  ;;  %v6817_v62 = vrot.slane %v5001_v11, 9  ;;  %v6822_v59 = vcombine.low %v5038_v35, %v5042_v30  ;;  %309 = vst [vmem:[#allocation3 + $0x44] sm:$0x1] %v308_v55  ;;  %v271_v1 = vsel %vm9456_vm6, 0, %v270_v49  ;;  %7138 = vmatprep.subr.bf16.mxu1 %v7465_v52 }
 0x264   : > { %7086 = vmatprep.mubr.msk.bf16.mxu0 %vm2810_vm7, %v7374_v42  ;;  %v4831_v42 = vrot.slane %v4830_v60, 4  ;;  %v6813_v60 = vrot.slane %v4997_v48, 9  ;;  %272 = vst [vmem:[#allocation3 + $0x30] sm:$0x1] %v271_v1  ;;  %v310_v26 = vld [vmem:[#allocation3 + $0x4c] sm:$0x1] }
 0x265   : > { %v4863_v36 = vrot.slane %v4861_v47, 5  ;;  %v311_v29 = vsel %vm9468_vm9, 0, %v310_v26  ;;  %v9606_v45 = vld [vmem:[#allocation3] sm:$0xf]  ;;  %v5280_v30 = vld [vmem:[#allocation3 + $0x18] sm:$0xf] }
 0x266   : > { %v5030_v47 = vsel %vm9075_vm5, %v6813_v60, %v5029_v58  ;;  %312 = vst [vmem:[#allocation3 + $0x4c] sm:$0x1] %v311_v29  ;;  %v5334_v31 = vshrl.u32 %v9606_v45, 16  ;;  %v5337_v16 = vshll.u32 %v9606_v45, 16  ;;  %v5590_v26 = vld [vmem:[#allocation3] sm:$0xe] }
 0x268   : > { %v5289_v2 = vld [vmem:[#allocation3 + $0x24] sm:$0x1] }
 0x26b   : > { %7087 = vmatmul.mubr.msk.bf16.vlgmr.msra.gmra.mrb[0].mxu0 %vm2810_vm7, %v7375_v43  ;;  %v4836_v43 = vsel %vm7744_vm1, %v4831_v42, %v4835_v37  ;;  %v5045_v42 = vrot.slane %v9516_v56, 5  ;;  %v256_v56 = vsel %vm9456_vm6, 0, %v255_v24 }
 0x26c   : > { %7095 = vmatpush3.bf16.msra.mxu0 %v4920_v63  ;;  %7090 = vmatprep.mubr.msk.bf16.mxu0 %vm2810_vm7, %v7376_v14  ;;  %v4864_v14 = vsel %vm7744_vm1, %v4859_v61, %v4863_v36  ;;  %v6804_v38 = vcombine.low %v4822_v57, %v4836_v43  ;;  %v4891_v63 = vrot.slane %v4889_v54, 5  ;;  %v287_v61 = vsel %vm9468_vm9, 0, %v286_v32  ;;  %v264_v36 = vld [vmem:[#allocation3 + $0x20] sm:$0x1]  ;;  %257 = vst [vmem:[#allocation3 + $0x8] sm:$0x1] %v256_v56 }
 0x26d   : > { %7323 = vmatprep.subr.msk.bf16.mxu0 %vm3810_vm0, %v6819_v23  ;;  %v6805_v51 = vcombine.low %v4850_v33, %v4864_v14  ;;  %v5046_v46 = vsel %vm9075_vm5, %v6817_v62, %v5045_v42  ;;  %288 = vst [vmem:[#allocation3 + $0xc] sm:$0x1] %v287_v61  ;;  %v265_v57 = vsel %vm9456_vm6, 0, %v264_v36  ;;  %v258_v43 = vld [vmem:[#allocation3 + $0x10] sm:$0x1]  ;;  %v290_v54 = vsel %vm9468_vm9, 0, %v289_v6 }
 0x26e   : > { %v4892_v23 = vsel %vm7744_vm1, %v4887_v0, %v4891_v63  ;;  %266 = vst [vmem:[#allocation3 + $0x20] sm:$0x1] %v265_v57  ;;  %v259_v34 = vsel %vm9456_vm6, 0, %v258_v43  ;;  %291 = vst [vmem:[#allocation3 + $0x14] sm:$0x1] %v290_v54  ;;  %v299_v0 = vsel %vm9468_vm9, 0, %v298_v20 }
 0x26f   : > { %v6806_v19 = vcombine.low %v4878_v12, %v4892_v23  ;;  %260 = vst [vmem:[#allocation3 + $0x10] sm:$0x1] %v259_v34  ;;  %v273_v33 = vld [vmem:[#allocation3 + $0x38] sm:$0x1]  ;;  %300 = vst [vmem:[#allocation3 + $0x2c] sm:$0x1] %v299_v0 }
 0x270   : > { %v274_v14 = vsel %vm9456_vm6, 0, %v273_v33  ;;  %v283_v12 = vld [vmem:[#allocation3 + $0x4] sm:$0x1]  ;;  %v302_v23 = vsel %vm9468_vm9, 0, %v301_v40  ;;  %vm7466_vm0 = vmmov 0   ;;  %v9615_v42 = vrot.slane %v5337_v16, 5 }
 0x271   : > { %275 = vst [vmem:[#allocation3 + $0x38] sm:$0x1] %v274_v14  ;;  %v284_v48 = vsel %vm9468_vm9, 0, %v283_v12  ;;  %303 = vst [vmem:[#allocation3 + $0x34] sm:$0x1] %v302_v23  ;;  %7146 = vmatprep.mubr.msk.bf16.mxu1 %vm7466_vm0, %v7465_v52 }
 0x272   : > { %285 = vst [vmem:[#allocation3 + $0x4] sm:$0x1] %v284_v48 }
 0x273   : > { %7091 = vmatmul.mubr.msk.bf16.gmra.mrb[4].mxu0 %vm2810_vm7, %v7377_v5  ;;  %v5002_v5 = vld [vmem:[#allocation2 + $0x48] sm:$0xe] }
 0x274   : > { %7096 = vmatprep.mubr.msk.bf16.mxu0 %vm2810_vm7, %v6803_v17  ;;  %v6821_v17 = vcombine.low %v5030_v47, %v5034_v53  ;;  %v6818_v37 = vrot.slane %v5002_v5, 9  ;;  %v5283_v5 = vld [vmem:[#allocation3 + $0x1c] sm:$0x1] }
 0x275   : > { %v5286_v34 = vld [vmem:[#allocation3 + $0x20] sm:$0xf]  ;;  %v5277_v49 = vld [vmem:[#allocation3 + $0x14] sm:$0x1] }
 0x276   : > { %v5050_v8 = vsel %vm9075_vm5, %v6818_v37, %v5049_v15  ;;  %v5274_v55 = vld [vmem:[#allocation3 + $0x10] sm:$0xf] }
 0x277   : > { %v6823_v27 = vcombine.low %v5046_v46, %v5050_v8  ;;  %v5268_v8 = vld [vmem:[#allocation3 + $0x8] sm:$0xf] }
 0x279   : > { %v9610_v53 = vld [vmem:[#allocation3 + $0x4] sm:$0x1] }
 0x27a   : > { %v5343_v35 = vshll.u32 %v9610_v53, 16 }
 0x27b   : > { %7097 = vmatmul.mubr.msk.bf16.vlgmr.msra.gmra.mrb[0].mxu0 %vm2810_vm7, %v6804_v38  ;;  %v267_v38 = vld [vmem:[#allocation3 + $0x28] sm:$0x1] }
 0x27c   : > { %7105 = vmatpush3.bf16.msra.mxu0 %v5078_v44  ;;  %7100 = vmatprep.mubr.msk.bf16.mxu0 %vm2810_vm7, %v6805_v51  ;;  %v268_v44 = vsel %vm9456_vm6, 0, %v267_v38  ;;  %v276_v51 = vld [vmem:[#allocation3 + $0x40] sm:$0x1] }
 0x27d   : > { %269 = vst [vmem:[#allocation3 + $0x28] sm:$0x1] %v268_v44  ;;  %v277_v63 = vsel %vm9456_vm6, 0, %v276_v51  ;;  %7114 = vmatprep.subr.bf16.mxu0 %v7465_v52 }
 0x27e   : > { %278 = vst [vmem:[#allocation3 + $0x40] sm:$0x1] %v277_v63 }
 0x283   : > { %7101 = vmatmul.mubr.msk.bf16.gmra.mrb[4].mxu0 %vm2810_vm7, %v6806_v19 }
 0x284   : > { %7106 = vmatprep.mubr.msk.bf16.mxu0 %vm2810_vm7, %v6820_v3 }
 0x28b   : > { %7107 = vmatmul.mubr.msk.bf16.vlgmr.msra.gmra.mrb[0].mxu0 %vm2810_vm7, %v6821_v17 }
 0x28c   : > { %7110 = vmatprep.mubr.msk.bf16.mxu0 %vm2810_vm7, %v6822_v59  ;;  %v9613_v59 = vrot.slane %v5334_v31, 4 }
 0x293   : > { %7111 = vmatmul.mubr.msk.bf16.gmra.mrb[4].mxu0 %vm2810_vm7, %v6823_v27  ;;  %v5271_v27 = vld [vmem:[#allocation3 + $0xc] sm:$0x1]  ;;  %vm10136_vm7 = vmmov %vm10133_vm8 }
 0x294   : > { %7122 = vmatprep.mubr.msk.bf16.mxu0 %vm7466_vm0, %v7465_v52  ;;  %vm9619_vm10 = vmand %vm243_vm2, %vm10136_vm7 }
 0x35e   : > { %v7108_v9 = vpop.f32.mrb[0].mxu0 }
 0x35f   : > { %v5155_v19 = vmax.f32 %v7108_v9, 0.0  ;;  %v5114_v60 = vpop.f32.mrb[1].mxu0 }
 0x360   : > { %v5153_v3 = vmax.f32 %v5114_v60, 0.0  ;;  %v7109_v58 = vpop.f32.mrb[2].mxu0 }
 0x361   : > { %v6928_v50 = vpack.c.bf16 %v5155_v19, %v5155_v19  ;;  %v5156_v25 = vmax.f32 %v7109_v58, 0.0  ;;  %v5117_v10 = vpop.f32.mrb[3].mxu0 }
 0x362   : > { %v6926_v4 = vpack.c.bf16 %v5153_v3, %v5153_v3  ;;  %v5154_v47 = vmax.f32 %v5117_v10, 0.0  ;;  %v6847_v10 = vrot.slane %v5590_v26, 9 }
 0x363   : > { %v5202_v18 = vshrl.u32 %v6928_v50, 16  ;;  %v6929_v11 = vpack.c.bf16 %v5156_v25, %v5156_v25  ;;  %v5205_v15 = vshll.u32 %v6928_v50, 16 }
 0x364   : > { %v5186_v17 = vshrl.u32 %v6926_v4, 16  ;;  %v6927_v62 = vpack.c.bf16 %v5154_v47, %v5154_v47  ;;  %v5189_v46 = vshll.u32 %v6926_v4, 16  ;;  %v5616_v4 = vrot.slane %v9610_v53, 5  ;;  %v5304_v47 = vld [vmem:[#allocation3 + $0x38] sm:$0xf] }
 0x365   : > { %v5204_v37 = vrot.slane %v5202_v18, 7  ;;  %v5210_v24 = vshrl.u32 %v6929_v11, 16  ;;  %v5213_v61 = vshll.u32 %v6929_v11, 16  ;;  %v5307_v18 = vld [vmem:[#allocation3 + $0x3c] sm:$0x1] }
 0x366   : > { %v5188_v56 = vrot.slane %v5186_v17, 7  ;;  %v5194_v36 = vshrl.u32 %v6927_v62, 16  ;;  %v5197_v28 = vshll.u32 %v6927_v62, 16  ;;  %v7112_v57 = vpop.f32.mrb[4].mxu0  ;;  %v5340_v17 = vor.u32 %v9615_v42, %v9613_v59  ;;  %v5310_v53 = vld [vmem:[#allocation3 + $0x40] sm:$0xf] }
 0x367   : > { %v5207_v41 = vor.u32 %v5205_v15, %v5204_v37  ;;  %v5208_v43 = vrot.slane %v5204_v37, 4  ;;  %v5212_v6 = vrot.slane %v5210_v24, 7  ;;  %v5159_v54 = vmax.f32 %v7112_v57, 0.0  ;;  %v5130_v33 = vpop.f32.mrb[5].mxu0 }
 0x368   : > { %v5191_v14 = vor.u32 %v5189_v46, %v5188_v56  ;;  %v5192_v21 = vrot.slane %v5188_v56, 4  ;;  %v5196_v38 = vrot.slane %v5194_v36, 7  ;;  %v5157_v44 = vmax.f32 %v5130_v33, 0.0  ;;  %v7113_v20 = vpop.f32.mrb[6].mxu0 }
 0x369   : > { %v5281_v51 = vsel %vm9619_vm10, %v5207_v41, %v5280_v30  ;;  %v5284_v39 = vsel %vm9456_vm6, %v5208_v43, %v5283_v5  ;;  %v5215_v0 = vor.u32 %v5213_v61, %v5212_v6  ;;  %v5216_v63 = vrot.slane %v5212_v6, 4  ;;  %v5133_v1 = vpop.f32.mrb[7].mxu0 }
 0x36a   : > { %5282 = vst [vmem:[#allocation3 + $0x18] sm:$0xf] %v5281_v51  ;;  %5285 = vst [vmem:[#allocation3 + $0x1c] sm:$0x1] %v5284_v39  ;;  %v5269_v40 = vsel %vm9619_vm10, %v5191_v14, %v5268_v8  ;;  %v5272_v12 = vsel %vm9456_vm6, %v5192_v21, %v5271_v27  ;;  %v5199_v23 = vor.u32 %v5197_v28, %v5196_v38  ;;  %v5200_v48 = vrot.slane %v5196_v38, 4 }
 0x36b   : > { %5270 = vst [vmem:[#allocation3 + $0x8] sm:$0xf] %v5269_v40  ;;  %5273 = vst [vmem:[#allocation3 + $0xc] sm:$0x1] %v5272_v12  ;;  %v5287_v29 = vsel %vm9619_vm10, %v5215_v0, %v5286_v34  ;;  %v5290_v9 = vsel %vm9456_vm6, %v5216_v63, %v5289_v2  ;;  %v6932_v19 = vpack.c.bf16 %v5159_v54, %v5159_v54  ;;  %v5160_v31 = vmax.f32 %v7113_v20, 0.0 }
 0x36c   : > { %v6930_v60 = vpack.c.bf16 %v5157_v44, %v5157_v44  ;;  %5288 = vst [vmem:[#allocation3 + $0x20] sm:$0xf] %v5287_v29  ;;  %5291 = vst [vmem:[#allocation3 + $0x24] sm:$0x1] %v5290_v9  ;;  %v5275_v3 = vsel %vm9619_vm10, %v5199_v23, %v5274_v55  ;;  %v5278_v58 = vsel %vm9456_vm6, %v5200_v48, %v5277_v49  ;;  %v5158_v16 = vmax.f32 %v5133_v1, 0.0 }
 0x36d   : > { %5276 = vst [vmem:[#allocation3 + $0x10] sm:$0xf] %v5275_v3  ;;  %5279 = vst [vmem:[#allocation3 + $0x14] sm:$0x1] %v5278_v58  ;;  %v5234_v50 = vshrl.u32 %v6932_v19, 16  ;;  %v6933_v11 = vpack.c.bf16 %v5160_v31, %v5160_v31  ;;  %v9642_v5 = vrot.slane %v5343_v35, 5  ;;  %v5617_v54 = vsel %vm9075_vm5, %v6847_v10, %v5616_v4 }
 0x36e   : > { %v5218_v25 = vshrl.u32 %v6930_v60, 16  ;;  %v6931_v30 = vpack.c.bf16 %v5158_v16, %v5158_v16  ;;  %v5237_v37 = vshll.u32 %v6932_v19, 16  ;;  %v5221_v46 = vshll.u32 %v6930_v60, 16  ;;  %v5292_v8 = vld [vmem:[#allocation3 + $0x28] sm:$0xf] }
 0x36f   : > { %v5236_v62 = vrot.slane %v5234_v50, 7  ;;  %v5295_v27 = vld [vmem:[#allocation3 + $0x2c] sm:$0x1]  ;;  %v5242_v24 = vshrl.u32 %v6933_v11, 16  ;;  %v5245_v56 = vshll.u32 %v6933_v11, 16  ;;  %v5341_v40 = vrot.slane %v5340_v17, 4 }
 0x370   : > { %v5220_v15 = vrot.slane %v5218_v25, 7  ;;  %v5226_v61 = vshrl.u32 %v6931_v30, 16  ;;  %v5229_v36 = vshll.u32 %v6931_v30, 16  ;;  %v5313_v35 = vld [vmem:[#allocation3 + $0x44] sm:$0x1] }
 0x371   : > { %v5239_v28 = vor.u32 %v5237_v37, %v5236_v62  ;;  %v5240_v57 = vrot.slane %v5236_v62, 4  ;;  %v5244_v6 = vrot.slane %v5242_v24, 7  ;;  %v5298_v38 = vld [vmem:[#allocation3 + $0x30] sm:$0xf]  ;;  %v5301_v44 = vld [vmem:[#allocation3 + $0x34] sm:$0x1] }
 0x372   : > { %v5223_v41 = vor.u32 %v5221_v46, %v5220_v15  ;;  %v5224_v43 = vrot.slane %v5220_v15, 4  ;;  %v5228_v34 = vrot.slane %v5226_v61, 7  ;;  %v9646_v59 = vld [vmem:[#allocation3 + $0xc] sm:$0x1]  ;;  %v5591_v42 = vld [vmem:[#allocation3 + $0x8] sm:$0xe]  ;;  %v5346_v15 = vsel %vm7744_vm1, %v5341_v40, %v9642_v5 }
 0x373   : > { %v5305_v33 = vsel %vm9619_vm10, %v5239_v28, %v5304_v47  ;;  %v5308_v14 = vsel %vm9456_vm6, %v5240_v57, %v5307_v18  ;;  %v9658_v20 = vld [vmem:[#allocation3 + $0x8] sm:$0xf]  ;;  %v5247_v51 = vor.u32 %v5245_v56, %v5244_v6  ;;  %v5248_v39 = vrot.slane %v5244_v6, 4  ;;  %v5328_v19 = vld [vmem:[#allocation3 + $0x1c] sm:$0x1] }
 0x374   : > { %v5293_v21 = vsel %vm9619_vm10, %v5223_v41, %v5292_v8  ;;  %v5296_v2 = vsel %vm9456_vm6, %v5224_v43, %v5295_v27  ;;  %5306 = vst [vmem:[#allocation3 + $0x38] sm:$0xf] %v5305_v33  ;;  %5309 = vst [vmem:[#allocation3 + $0x3c] sm:$0x1] %v5308_v14  ;;  %v5231_v0 = vor.u32 %v5229_v36, %v5228_v34  ;;  %v5232_v63 = vrot.slane %v5228_v34, 4 }
 0x375   : > { %5294 = vst [vmem:[#allocation3 + $0x28] sm:$0xf] %v5293_v21  ;;  %5297 = vst [vmem:[#allocation3 + $0x2c] sm:$0x1] %v5296_v2  ;;  %v5327_v55 = vld [vmem:[#allocation3 + $0x14] sm:$0x1]  ;;  %v5311_v48 = vsel %vm9619_vm10, %v5247_v51, %v5310_v53  ;;  %v5314_v26 = vsel %vm9456_vm6, %v5248_v39, %v5313_v35 }
 0x376   : > { %v6848_v49 = vrot.slane %v5591_v42, 9  ;;  %v5620_v1 = vrot.slane %v9646_v59, 5  ;;  %v5348_v12 = vshrl.u32 %v9658_v20, 16  ;;  %v5592_v23 = vld [vmem:[#allocation3 + $0x10] sm:$0xe]  ;;  %v5299_v29 = vsel %vm9619_vm10, %v5231_v0, %v5298_v38 }
 0x377   : > { %v5302_v9 = vsel %vm9456_vm6, %v5232_v63, %v5301_v44  ;;  %v5593_v60 = vld [vmem:[#allocation3 + $0x18] sm:$0xe]  ;;  %5312 = vst [vmem:[#allocation3 + $0x40] sm:$0xf] %v5311_v48  ;;  %5315 = vst [vmem:[#allocation3 + $0x44] sm:$0x1] %v5314_v26 }
 0x378   : > { %5300 = vst [vmem:[#allocation3 + $0x30] sm:$0xf] %v5299_v29  ;;  %5303 = vst [vmem:[#allocation3 + $0x34] sm:$0x1] %v5302_v9  ;;  %v5621_v3 = vsel %vm9075_vm5, %v6848_v49, %v5620_v1  ;;  %v5350_v58 = vrot.slane %v5348_v12, 4  ;;  %v5351_v31 = vshll.u32 %v9658_v20, 16 }
 0x379   : > { %v9673_v16 = vld [vmem:[#allocation3 + $0x10] sm:$0xf]  ;;  %v5357_v32 = vshll.u32 %v9646_v59, 16  ;;  %v6856_v50 = vcombine.low %v5617_v54, %v5621_v3  ;;  %v5371_v25 = vshll.u32 %v5327_v55, 16  ;;  %v6849_v13 = vrot.slane %v5592_v23, 9 }
 0x37a   : > { %v9676_v10 = vld [vmem:[#allocation3 + $0x18] sm:$0xf]  ;;  %v5353_v4 = vrot.slane %v5351_v31, 5  ;;  %v5624_v47 = vrot.slane %v5327_v55, 5  ;;  %v6850_v18 = vrot.slane %v5593_v60, 9  ;;  %v5628_v11 = vrot.slane %v5328_v19, 5 }
 0x37b   : > { %v5664_v30 = vsel %vm5459_vm11, %v6856_v50, 0  ;;  %v5385_v17 = vshll.u32 %v5328_v19, 16  ;;  %v5362_v62 = vshrl.u32 %v9673_v16, 16  ;;  %v5365_v37 = vshll.u32 %v9673_v16, 16  ;;  %v9687_v24 = vld [vmem:[#allocation3 + $0x24] sm:$0x1] }
 0x37c   : > { %7139 = vmatpush3.bf16.xpose.msra.mxu1 %v5664_v30  ;;  %v5354_v46 = vor.u32 %v5353_v4, %v5350_v58  ;;  %v5625_v8 = vsel %vm9075_vm5, %v6849_v13, %v5624_v47  ;;  %v5376_v27 = vshrl.u32 %v9676_v10, 16  ;;  %v5594_v56 = vld [vmem:[#allocation3 + $0x20] sm:$0xe]  ;;  %v5629_v61 = vsel %vm9075_vm5, %v6850_v18, %v5628_v11  ;;  %v5595_v41 = vld [vmem:[#allocation3 + $0x28] sm:$0xe] }
 0x37d   : > { %7140 = vmatprep.subr.bf16.mxu1 %v7465_v52  ;;  %v5364_v36 = vrot.slane %v5362_v62, 4  ;;  %v5367_v28 = vrot.slane %v5365_v37, 5  ;;  %v5379_v57 = vshll.u32 %v9676_v10, 16  ;;  %v5359_v5 = vrot.slane %v5357_v32, 5  ;;  %v5330_v6 = vld [vmem:[#allocation3 + $0x2c] sm:$0x1] }
 0x37e   : > { %v5355_v43 = vrot.slane %v5354_v46, 4  ;;  %v6857_v53 = vcombine.low %v5625_v8, %v5629_v61  ;;  %v5378_v35 = vrot.slane %v5376_v27, 4  ;;  %v5373_v59 = vrot.slane %v5371_v25, 5  ;;  %v9693_v33 = vld [vmem:[#allocation3 + $0x20] sm:$0xf] }
 0x37f   : > { %v5368_v34 = vor.u32 %v5367_v28, %v5364_v36  ;;  %v5381_v42 = vrot.slane %v5379_v57, 5  ;;  %v5387_v54 = vrot.slane %v5385_v17, 5  ;;  %v6851_v21 = vrot.slane %v5594_v56, 9  ;;  %v9698_v63 = vld [vmem:[#allocation3 + $0x28] sm:$0xf] }
 0x380   : > { %v5360_v14 = vsel %vm7744_vm1, %v5355_v43, %v5359_v5  ;;  %v5632_v2 = vrot.slane %v9687_v24, 5  ;;  %v6852_v38 = vrot.slane %v5595_v41, 9  ;;  %v5636_v0 = vrot.slane %v5330_v6, 5  ;;  %v5331_v29 = vld [vmem:[#allocation3 + $0x34] sm:$0x1] }
 0x381   : > { %v6837_v44 = vcombine.low %v5346_v15, %v5360_v14  ;;  %v5369_v51 = vrot.slane %v5368_v34, 4  ;;  %v5382_v39 = vor.u32 %v5381_v42, %v5378_v35  ;;  %v5667_v55 = vsel %vm5459_vm11, %v6857_v53, 0  ;;  %v5332_v32 = vld [vmem:[#allocation3 + $0x3c] sm:$0x1]  ;;  %v5596_v50 = vld [vmem:[#allocation3 + $0x30] sm:$0xe] }
 0x382   : > { %v5413_v49 = vshll.u32 %v5330_v6, 16  ;;  %v5390_v1 = vshrl.u32 %v9693_v33, 16  ;;  %v5393_v40 = vshll.u32 %v9693_v33, 16  ;;  %v5633_v48 = vsel %vm9075_vm5, %v6851_v21, %v5632_v2  ;;  %v9714_v25 = vld [vmem:[#allocation3 + $0x30] sm:$0xf] }
 0x383   : > { %v5464_v12 = vsel %vm5459_vm11, %v6837_v44, 0  ;;  %v5383_v23 = vrot.slane %v5382_v39, 4  ;;  %v5637_v26 = vsel %vm9075_vm5, %v6852_v38, %v5636_v0  ;;  %v5374_v9 = vsel %vm7744_vm1, %v5369_v51, %v5373_v59  ;;  %v5597_v30 = vld [vmem:[#allocation3 + $0x38] sm:$0xe]  ;;  %v6414_v22 = vld [vmem:[#allocation3 + $0x28] sm:$0xe] }
 0x384   : > { %7115 = vmatpush3.bf16.xpose.msra.mxu0 %v5464_v12  ;;  %7141 = vmatpush3.bf16.xpose.msra.mxu1 %v5667_v55  ;;  %v5392_v19 = vrot.slane %v5390_v1, 4  ;;  %v5395_v60 = vrot.slane %v5393_v40, 5  ;;  %v5404_v3 = vshrl.u32 %v9698_v63, 16  ;;  %v6858_v58 = vcombine.low %v5633_v48, %v5637_v26  ;;  %v9718_v17 = vld [vmem:[#allocation3 + $0x38] sm:$0xf] }
 0x385   : > { %7116 = vmatprep.subr.bf16.mxu0 %v7465_v52  ;;  %7142 = vmatprep.subr.bf16.mxu1 %v7465_v52  ;;  %v5407_v31 = vshll.u32 %v9698_v63, 16  ;;  %v5388_v13 = vsel %vm7744_vm1, %v5383_v23, %v5387_v54  ;;  %v5399_v62 = vshll.u32 %v9687_v24, 16  ;;  %v5415_v37 = vrot.slane %v5413_v49, 5 }
 0x386   : > { %v5396_v4 = vor.u32 %v5395_v60, %v5392_v19  ;;  %v5406_v47 = vrot.slane %v5404_v3, 4  ;;  %v6838_v18 = vcombine.low %v5374_v9, %v5388_v13  ;;  %v6853_v15 = vrot.slane %v5596_v50, 9  ;;  %v7378_v9 = vld [vmem:[#allocation3 + $0x8] ss:$8 sps:$4 sm:$0xff]   ;;  %v6855_v19 = vld [vmem:[%s10036_s2 + $0x8] sm:$0xf] }
 0x387   : > { %v5409_v11 = vrot.slane %v5407_v31, 5  ;;  %v5640_v46 = vrot.slane %v5331_v29, 5  ;;  %v5670_v8 = vsel %vm5459_vm11, %v6858_v58, 0  ;;  %v5418_v56 = vshrl.u32 %v9714_v25, 16  ;;  %v7380_v31 = vld [vmem:[#allocation3 + $0x18] ss:$8 sps:$4 sm:$0xff]  }
 0x388   : > { %v5421_v61 = vshll.u32 %v9714_v25, 16  ;;  %v5397_v36 = vrot.slane %v5396_v4, 4  ;;  %v6854_v28 = vrot.slane %v5597_v30, 9  ;;  %v5644_v57 = vrot.slane %v5332_v32, 5  ;;  %v5804_v50 = vld [vmem:[#allocation3 + $0x10] sm:$0xf] }
 0x389   : > { %v5410_v27 = vor.u32 %v5409_v11, %v5406_v47  ;;  %v5432_v41 = vshrl.u32 %v9718_v17, 16  ;;  %v5467_v5 = vsel %vm5459_vm11, %v6838_v18, 0  ;;  %v5420_v53 = vrot.slane %v5418_v56, 4  ;;  %v5802_v47 = vld [vmem:[#allocation3 + $0x8] sm:$0xf] }
 0x38a   : > { %v5423_v24 = vrot.slane %v5421_v61, 5  ;;  %v5401_v35 = vrot.slane %v5399_v62, 5  ;;  %v5641_v6 = vsel %vm9075_vm5, %v6853_v15, %v5640_v46  ;;  %v5435_v59 = vshll.u32 %v9718_v17, 16  ;;  %v7382_v62 = vld [vmem:[#allocation3 + $0x28] ss:$8 sps:$4 sm:$0xff]  }
 0x38b   : > { %v5411_v43 = vrot.slane %v5410_v27, 4  ;;  %v5434_v34 = vrot.slane %v5432_v41, 4  ;;  %v5427_v21 = vshll.u32 %v5331_v29, 16  ;;  %v5645_v2 = vsel %vm9075_vm5, %v6854_v28, %v5644_v57  ;;  %v5808_v46 = vld [vmem:[#allocation3 + $0x20] sm:$0xf] }
 0x38c   : > { %7117 = vmatpush3.bf16.xpose.msra.mxu0 %v5467_v5  ;;  %7143 = vmatpush3.bf16.xpose.msra.mxu1 %v5670_v8  ;;  %v5424_v54 = vor.u32 %v5423_v24, %v5420_v53  ;;  %v5402_v14 = vsel %vm7744_vm1, %v5397_v36, %v5401_v35  ;;  %v5437_v38 = vrot.slane %v5435_v59, 5  ;;  %v6859_v51 = vcombine.low %v5641_v6, %v5645_v2  ;;  %v9771_v36 = vld [vmem:[#allocation3 + $0x14] sm:$0x1]  ;;  %v5806_v28 = vld [vmem:[#allocation3 + $0x18] sm:$0xf] }
 0x38d   : > { %7118 = vmatprep.subr.bf16.mxu0 %v7465_v52  ;;  %v5416_v42 = vsel %vm7744_vm1, %v5411_v43, %v5415_v37  ;;  %7144 = vmatprep.subr.bf16.mxu1 %v7465_v52  ;;  %v5441_v39 = vshll.u32 %v5332_v32, 16  ;;  %v5429_v49 = vrot.slane %v5427_v21, 5  ;;  %v5750_v3 = vsel %vm5459_vm11, %v7378_v9, 0  ;;  %v6836_v32 = vld [vmem:[%s10036_s2 + $0x4] sm:$0xf] }
 0x38e   : > { %v6839_v44 = vcombine.low %v5402_v14, %v5416_v42  ;;  %v5425_v0 = vrot.slane %v5424_v54, 4  ;;  %v5438_v55 = vor.u32 %v5437_v38, %v5434_v34  ;;  %v5673_v12 = vsel %vm5459_vm11, %v6859_v51, 0  ;;  %v9773_v57 = vld [vmem:[#allocation3 + $0xc] sm:$0x1]  ;;  %v7384_v6 = vld [vmem:[#allocation3 + $0x38] ss:$8 sps:$4 sm:$0xff]  }
 0x38f   : > { %v5443_v48 = vrot.slane %v5441_v39, 5  ;;  %v6842_v58 = vcombine.low %v9606_v45, %v9658_v20  ;;  %v5753_v4 = vsel %vm5459_vm11, %v7380_v31, 0  ;;  %v5833_v18 = vshrl.u32 %v5804_v50, 16  ;;  %v5812_v14 = vld [vmem:[#allocation3 + $0x30] sm:$0xf] }
 0x390   : > { %v5439_v1 = vrot.slane %v5438_v55, 4  ;;  %v5470_v40 = vsel %vm5459_vm11, %v6839_v44, 0  ;;  %v5430_v23 = vsel %vm7744_vm1, %v5425_v0, %v5429_v49  ;;  %v5836_v11 = vshll.u32 %v5804_v50, 16  ;;  %v9781_v38 = vld [vmem:[#allocation3 + $0x24] sm:$0x1] }
 0x391   : > { %v5539_v13 = vsel %vm5459_vm11, %v6842_v58, 0  ;;  %v5819_v45 = vshrl.u32 %v5802_v47, 16  ;;  %v5822_v20 = vshll.u32 %v5802_v47, 16  ;;  %v6843_v30 = vcombine.low %v9673_v16, %v9676_v10  ;;  %v5810_v49 = vld [vmem:[#allocation3 + $0x28] sm:$0xf] }
 0x392   : > { %v5444_v26 = vsel %vm7744_vm1, %v5439_v1, %v5443_v48  ;;  %v5835_v37 = vrot.slane %v5833_v18, 4  ;;  %v5838_v15 = vrot.slane %v5836_v11, 5  ;;  %v5756_v61 = vsel %vm5459_vm11, %v7382_v62, 0  ;;  %v6861_v58 = vld [vmem:[%s10036_s2 + $0xc] sm:$0xf] }
 0x393   : > { %v6840_v29 = vcombine.low %v5430_v23, %v5444_v26  ;;  %v5821_v8 = vrot.slane %v5819_v45, 4  ;;  %v5824_v27 = vrot.slane %v5822_v20, 5  ;;  %v5542_v56 = vsel %vm5459_vm11, %v6843_v30, 0  ;;  %v9800_v18 = vld [vmem:[#allocation3 + $0x34] sm:$0x1] }
 0x394   : > { %7119 = vmatpush3.bf16.xpose.msra.mxu0 %v5470_v40  ;;  %7145 = vmatpush3.bf16.xpose.msra.mxu1 %v5673_v12  ;;  %v5839_v41 = vor.u32 %v5838_v15, %v5835_v37  ;;  %v5861_v5 = vshrl.u32 %v5808_v46, 16  ;;  %v5864_v16 = vshll.u32 %v5808_v46, 16  ;;  %v5842_v43 = vshll.u32 %v9771_v36, 16  ;;  %v5814_v30 = vld [vmem:[#allocation3 + $0x38] sm:$0xf] }
 0x395   : > { %7120 = vmatprep.subr.bf16.mxu0 %v7465_v52  ;;  %7150 = vmatprep.subr.bf16.mxu1 %v7465_v52  ;;  %v5473_v60 = vsel %vm5459_vm11, %v6840_v29, 0  ;;  %v5825_v10 = vor.u32 %v5824_v27, %v5821_v8  ;;  %v5847_v53 = vshrl.u32 %v5806_v28, 16  ;;  %v5850_v24 = vshll.u32 %v5806_v28, 16  ;;  %v9808_v8 = vld [vmem:[#allocation3 + $0x2c] sm:$0x1] }
 0x396   : > { %v6844_v35 = vcombine.low %v9693_v33, %v9698_v63  ;;  %v5828_v34 = vshll.u32 %v9773_v57, 16  ;;  %v5840_v59 = vrot.slane %v5839_v41, 4  ;;  %v5863_v42 = vrot.slane %v5861_v5, 4  ;;  %v9787_v63 = vld [vmem:[#allocation3 + $0x1c] sm:$0x1] }
 0x397   : > { %v5866_v54 = vrot.slane %v5864_v16, 5  ;;  %v5826_v21 = vrot.slane %v5825_v10, 4  ;;  %v5844_v2 = vrot.slane %v5842_v43, 5  ;;  %v5849_v44 = vrot.slane %v5847_v53, 4 }
 0x398   : > { %v5852_v51 = vrot.slane %v5850_v24, 5  ;;  %v5545_v39 = vsel %vm5459_vm11, %v6844_v35, 0  ;;  %v5759_v0 = vsel %vm5459_vm11, %v7384_v6, 0  ;;  %v5830_v55 = vrot.slane %v5828_v34, 5  ;;  %v5324_v24 = vld [vmem:[%s10036_s2] sm:$0xf] }
 0x399   : > { %v5845_v33 = vsel %vm7744_vm1, %v5840_v59, %v5844_v2  ;;  %v5867_v1 = vor.u32 %v5866_v54, %v5863_v42  ;;  %v5889_v40 = vshrl.u32 %v5812_v14, 16  ;;  %v5892_v12 = vshll.u32 %v5812_v14, 16  ;;  %v9820_v54 = vld [vmem:[#allocation3 + $0x44] sm:$0x1] }
 0x39a   : > { %v5870_v23 = vshll.u32 %v9781_v38, 16  ;;  %v5831_v48 = vsel %vm7744_vm1, %v5826_v21, %v5830_v55  ;;  %v5853_v26 = vor.u32 %v5852_v51, %v5849_v44  ;;  %v5875_v29 = vshrl.u32 %v5810_v49, 16  ;;  %v9826_v44 = vld [vmem:[#allocation3 + $0x3c] sm:$0x1] }
 0x39b   : > { %7147 = vmatmul.mubr.msk.bf16.vlgmr.msra.gmra.mrb[0].mxu1 %vm5459_vm11, %v6855_v19  ;;  %v5878_v9 = vshll.u32 %v5810_v49, 16  ;;  %v6845_v19 = vcombine.low %v9714_v25, %v9718_v17  ;;  %v5868_v31 = vrot.slane %v5867_v1, 4  ;;  %v5894_v50 = vrot.slane %v5892_v12, 5 }
 0x39c   : > { %7121 = vmatpush3.bf16.xpose.msra.mxu0 %v5473_v60  ;;  %7151 = vmatpush3.bf16.xpose.msra.mxu1 %v5750_v3  ;;  %v6868_v60 = vcombine.low %v5831_v48, %v5845_v33  ;;  %v5856_v3 = vshll.u32 %v9787_v63, 16  ;;  %v5872_v47 = vrot.slane %v5870_v23, 5  ;;  %v5877_v11 = vrot.slane %v5875_v29, 4 }
 0x39d   : > { %7126 = vmatprep.subr.bf16.mxu0 %v7465_v52  ;;  %7152 = vmatprep.subr.bf16.mxu1 %v7465_v52  ;;  %v5880_v45 = vrot.slane %v5878_v9, 5  ;;  %v5548_v20 = vsel %vm5459_vm11, %v6845_v19, 0  ;;  %v5898_v27 = vshll.u32 %v9800_v18, 16  ;;  %v5903_v28 = vshrl.u32 %v5814_v30, 16  ;;  %v6000_v19 = vld [vmem:[#allocation3 + $0x8] sm:$0xe] }
 0x39e   : > { %7158 = vmatprep.mubr.msk.bf16.mxu1 %vm7466_vm0, %v7465_v52  ;;  %v5948_v25 = vsel %vm5459_vm11, %v6868_v60, 0  ;;  %v5858_v17 = vrot.slane %v5856_v3, 5  ;;  %v5873_v62 = vsel %vm7744_vm1, %v5868_v31, %v5872_v47  ;;  %v5906_v41 = vshll.u32 %v5814_v30, 16 }
 0x39f   : > { %v5884_v16 = vshll.u32 %v9808_v8, 16  ;;  %v5900_v6 = vrot.slane %v5898_v27, 5  ;;  %v5905_v34 = vrot.slane %v5903_v28, 4  ;;  %v5912_v49 = vshll.u32 %v9826_v44, 16 }
 0x3a0   : > { %v5908_v59 = vrot.slane %v5906_v41, 5  ;;  %v6030_v3 = vrot.slane %v9771_v36, 5  ;;  %v6026_v31 = vrot.slane %v9773_v57, 5  ;;  %v6867_v36 = vld [vmem:[%s10036_s2 + $0x10] sm:$0xf]  ;;  %v6038_v57 = vrot.slane %v9781_v38, 5 }
 0x3a1   : > { %v5886_v14 = vrot.slane %v5884_v16, 5  ;;  %v5914_v23 = vrot.slane %v5912_v49, 5  ;;  %v6007_v41 = vld [vmem:[#allocation3 + $0x40] sm:$0xe] }
 0x3a3   : > { %7123 = vmatmul.mubr.msk.bf16.vlgmr.msra.gmra.mrb[8].mxu0 %vm5459_vm11, %v6836_v32  ;;  %v5891_v32 = vrot.slane %v5889_v40, 4 }
 0x3a4   : > { %7127 = vmatpush3.bf16.xpose.msra.mxu0 %v5539_v13  ;;  %7153 = vmatpush3.bf16.xpose.msra.mxu1 %v5753_v4  ;;  %v5816_v13 = vld [vmem:[#allocation3 + $0x40] sm:$0xf]  ;;  %v5854_v4 = vrot.slane %v5853_v26, 4  ;;  %v6001_v26 = vld [vmem:[#allocation3 + $0x10] sm:$0xe] }
 0x3a5   : > { %7128 = vmatprep.subr.bf16.mxu0 %v7465_v52  ;;  %7154 = vmatprep.subr.bf16.mxu1 %v7465_v52  ;;  %v5895_v37 = vor.u32 %v5894_v50, %v5891_v32  ;;  %v5917_v15 = vshrl.u32 %v5816_v13, 16  ;;  %v5920_v46 = vshll.u32 %v5816_v13, 16  ;;  %v6874_v60 = vrot.slane %v6001_v26, 9  ;;  %v6003_v13 = vld [vmem:[#allocation3 + $0x20] sm:$0xe] }
 0x3a6   : > { %7134 = vmatprep.mubr.msk.bf16.mxu0 %vm7466_vm0, %v7465_v52 }
 0x3a7   : > { %v5896_v10 = vrot.slane %v5895_v37, 4  ;;  %v5919_v43 = vrot.slane %v5917_v15, 4  ;;  %v5922_v53 = vrot.slane %v5920_v46, 5  ;;  %v6031_v50 = vsel %vm9075_vm5, %v6874_v60, %v6030_v3  ;;  %v6004_v15 = vld [vmem:[#allocation3 + $0x28] sm:$0xe] }
 0x3a8   : > { %v6046_v46 = vrot.slane %v9800_v18, 5  ;;  %v6877_v27 = vrot.slane %v6004_v15, 9  ;;  %v6054_v18 = vrot.slane %v9820_v54, 5  ;;  %v6223_v15 = vld [vmem:[#allocation3 + $0x38] sm:$0xf] }
 0x3a9   : > { %v5901_v21 = vsel %vm7744_vm1, %v5896_v10, %v5900_v6  ;;  %v5923_v2 = vor.u32 %v5922_v53, %v5919_v43  ;;  %v6006_v10 = vld [vmem:[#allocation3 + $0x38] sm:$0xe]  ;;  %v6880_v43 = vrot.slane %v6007_v41, 9 }
 0x3aa   : > { %v6879_v53 = vrot.slane %v6006_v10, 9  ;;  %v6303_v10 = vshll.u32 %v6223_v15, 16 }
 0x3ab   : > { %v5924_v33 = vrot.slane %v5923_v2, 4  ;;  %v6213_v2 = vld [vmem:[#allocation3 + $0x10] sm:$0xf] }
 0x3ac   : > { %7129 = vmatpush3.bf16.xpose.msra.mxu0 %v5542_v56  ;;  %7155 = vmatpush3.bf16.xpose.msra.mxu1 %v5756_v61  ;;  %v5859_v56 = vsel %vm7744_vm1, %v5854_v4, %v5858_v17  ;;  %v5881_v61 = vor.u32 %v5880_v45, %v5877_v11  ;;  %v6002_v11 = vld [vmem:[#allocation3 + $0x18] sm:$0xe]  ;;  %v6876_v45 = vrot.slane %v6003_v13, 9 }
 0x3ad   : > { %7130 = vmatprep.subr.bf16.mxu0 %v7465_v52  ;;  %7156 = vmatprep.subr.bf16.mxu1 %v7465_v52  ;;  %v6869_v5 = vcombine.low %v5859_v56, %v5873_v62  ;;  %v6005_v62 = vld [vmem:[#allocation3 + $0x30] sm:$0xe]  ;;  %v6042_v56 = vrot.slane %v9808_v8, 5  ;;  %v6050_v8 = vrot.slane %v9826_v44, 5 }
 0x3ae   : > { %v5882_v35 = vrot.slane %v5881_v61, 4  ;;  %v6039_v30 = vsel %vm9075_vm5, %v6876_v45, %v6038_v57  ;;  %v6221_v57 = vld [vmem:[#allocation3 + $0x30] sm:$0xf] }
 0x3af   : > { %v5951_v42 = vsel %vm5459_vm11, %v6869_v5, 0  ;;  %v6043_v5 = vsel %vm9075_vm5, %v6877_v27, %v6042_v56  ;;  %v6051_v6 = vsel %vm9075_vm5, %v6879_v53, %v6050_v8  ;;  %v6286_v56 = vshrl.u32 %v6221_v57, 16  ;;  %v6227_v53 = vld [vmem:[#allocation3 + $0x48] sm:$0xf] }
 0x3b0   : > { %v5887_v51 = vsel %vm7744_vm1, %v5882_v35, %v5886_v14  ;;  %v6055_v35 = vsel %vm9075_vm5, %v6880_v43, %v6054_v18  ;;  %v6887_v8 = vld [vmem:[%s10036_s2 + $0x18] sm:$0xf] }
 0x3b1   : > { %v6870_v55 = vcombine.low %v5887_v51, %v5901_v21  ;;  %v7387_v21 = vld [vmem:[#allocation3 + $0x20] ss:$8 sps:$4 sm:$0xff]   ;;  %v6215_v51 = vld [vmem:[#allocation3 + $0x18] sm:$0xf] }
 0x3b2   : > { %v6164_v44 = vsel %vm5459_vm11, %v7387_v21, 0  ;;  %v6247_v49 = vshll.u32 %v6215_v51, 16 }
 0x3b3   : > { %v5954_v12 = vsel %vm5459_vm11, %v6870_v55, 0  ;;  %v6244_v55 = vshrl.u32 %v6215_v51, 16  ;;  %v6328_v51 = vshrl.u32 %v6227_v53, 16 }
 0x3b4   : > { %7131 = vmatpush3.bf16.xpose.msra.mxu0 %v5545_v39  ;;  %7157 = vmatpush3.bf16.xpose.msra.mxu1 %v5759_v0  ;;  %v5909_v39 = vor.u32 %v5908_v59, %v5905_v34  ;;  %v5926_v0 = vshll.u32 %v9820_v54, 16  ;;  %v6885_v34 = vcombine.low %v6051_v6, %v6055_v35  ;;  %v6881_v54 = vld [vmem:[%s10036_s2 + $0x14] sm:$0xf]  ;;  %v6288_v35 = vrot.slane %v6286_v56, 4 }
 0x3b5   : > { %7132 = vmatprep.subr.bf16.mxu0 %v7465_v52  ;;  %7162 = vmatprep.subr.bf16.mxu1 %v7465_v52 }
 0x3b6   : > { %v5910_v1 = vrot.slane %v5909_v39, 4  ;;  %v5928_v40 = vrot.slane %v5926_v0, 5  ;;  %v6083_v59 = vsel %vm5459_vm11, %v6885_v34, 0  ;;  %v6230_v39 = vshrl.u32 %v6213_v2, 16  ;;  %v6225_v34 = vld [vmem:[#allocation3 + $0x40] sm:$0xf] }
 0x3b7   : > { %v6233_v0 = vshll.u32 %v6213_v2, 16 }
 0x3b8   : > { %v5929_v48 = vsel %vm7744_vm1, %v5924_v33, %v5928_v40  ;;  %v5915_v29 = vsel %vm7744_vm1, %v5910_v1, %v5914_v23  ;;  %v7388_v33 = vld [vmem:[#allocation3 + $0x30] ss:$8 sps:$4 sm:$0xff]   ;;  %v6232_v1 = vrot.slane %v6230_v39, 4  ;;  %v6246_v23 = vrot.slane %v6244_v55, 4 }
 0x3b9   : > { %v6871_v9 = vcombine.low %v5915_v29, %v5929_v48  ;;  %v6235_v40 = vrot.slane %v6233_v0, 5  ;;  %v6249_v48 = vrot.slane %v6247_v49, 5  ;;  %v6167_v26 = vsel %vm5459_vm11, %v7388_v33, 0  ;;  %v9889_v29 = vld [vmem:[#allocation3 + $0x14] sm:$0x1] }
 0x3ba   : > { %v6331_v39 = vshll.u32 %v6227_v53, 16  ;;  %v6314_v49 = vshrl.u32 %v6225_v34, 16  ;;  %v6317_v33 = vshll.u32 %v6225_v34, 16  ;;  %v6902_v34 = vrot.slane %v6414_v22, 9 }
 0x3bb   : > { %7159 = vmatmul.mubr.msk.bf16.vlgmr.msra.gmra.mrb[0].mxu1 %vm5459_vm11, %v6861_v58  ;;  %v6873_v58 = vrot.slane %v6000_v19, 9  ;;  %v5957_v32 = vsel %vm5459_vm11, %v6871_v9, 0  ;;  %v6217_v9 = vld [vmem:[#allocation3 + $0x20] sm:$0xf]  ;;  %v9891_v19 = vld [vmem:[#allocation3 + $0x1c] sm:$0x1]  ;;  %v6236_v60 = vor.u32 %v6235_v40, %v6232_v1 }
 0x3bc   : > { %7133 = vmatpush3.bf16.xpose.msra.mxu0 %v5548_v20  ;;  %7163 = vmatpush3.bf16.xpose.msra.mxu1 %v5948_v25  ;;  %v6875_v20 = vrot.slane %v6002_v11, 9  ;;  %v6034_v25 = vrot.slane %v9787_v63, 5  ;;  %v6878_v63 = vrot.slane %v6005_v62, 9  ;;  %v6261_v13 = vshll.u32 %v6217_v9, 16  ;;  %v9920_v1 = vld [vmem:[#allocation3 + $0x3c] sm:$0x1] }
 0x3bd   : > { %7164 = vmatprep.subr.bf16.mxu1 %v7465_v52  ;;  %7170 = vmatprep.mubr.msk.bf16.mxu1 %vm7466_vm0, %v7465_v52  ;;  %v6027_v4 = vsel %vm9075_vm5, %v6873_v58, %v6026_v31  ;;  %v6239_v31 = vshll.u32 %v9889_v29, 16  ;;  %v6237_v11 = vrot.slane %v6236_v60, 4 }
 0x3be   : > { %v6882_v47 = vcombine.low %v6027_v4, %v6031_v50  ;;  %v6035_v38 = vsel %vm9075_vm5, %v6875_v20, %v6034_v25  ;;  %v6047_v28 = vsel %vm9075_vm5, %v6878_v63, %v6046_v46  ;;  %v6258_v50 = vshrl.u32 %v6217_v9, 16  ;;  %v7389_v4 = vld [vmem:[#allocation3 + $0x40] ss:$8 sps:$4 sm:$0xff]   ;;  %v9901_v46 = vld [vmem:[#allocation3 + $0x24] sm:$0x1] }
 0x3bf   : > { %v6883_v37 = vcombine.low %v6035_v38, %v6039_v30  ;;  %v6884_v16 = vcombine.low %v6043_v5, %v6047_v28  ;;  %v6241_v20 = vrot.slane %v6239_v31, 5  ;;  %v6263_v62 = vrot.slane %v6261_v13, 5 }
 0x3c0   : > { %v6074_v17 = vsel %vm5459_vm11, %v6882_v47, 0  ;;  %v6253_v47 = vshll.u32 %v9891_v19, 16  ;;  %v6260_v30 = vrot.slane %v6258_v50, 4  ;;  %v6170_v38 = vsel %vm5459_vm11, %v7389_v4, 0  ;;  %v9927_v4 = vld [vmem:[#allocation3 + $0x44] sm:$0x1] }
 0x3c1   : > { %v6077_v61 = vsel %vm5459_vm11, %v6883_v37, 0  ;;  %v6242_v63 = vsel %vm7744_vm1, %v6237_v11, %v6241_v20  ;;  %v6267_v18 = vshll.u32 %v9901_v46, 16  ;;  %v6333_v9 = vrot.slane %v6331_v39, 5 }
 0x3c2   : > { %v6255_v37 = vrot.slane %v6253_v47, 5  ;;  %v6264_v5 = vor.u32 %v6263_v62, %v6260_v30  ;;  %v6319_v31 = vrot.slane %v6317_v33, 5  ;;  %v9929_v47 = vld [vmem:[#allocation3 + $0x4c] sm:$0x1]  ;;  %v6323_v30 = vshll.u32 %v9927_v4, 16 }
 0x3c3   : > { %7135 = vmatmul.mubr.msk.bf16.vlgmr.msra.gmra.mrb[8].mxu0 %vm5459_vm11, %v5324_v24  ;;  %v6080_v24 = vsel %vm5459_vm11, %v6884_v16, 0  ;;  %v6300_v16 = vshrl.u32 %v6223_v15, 16  ;;  %v6269_v2 = vrot.slane %v6267_v18, 5  ;;  %v6337_v20 = vshll.u32 %v9929_v47, 16 }
 0x3c4   : > { %7165 = vmatpush3.bf16.xpose.msra.mxu1 %v5951_v42  ;;  %v7386_v42 = vld [vmem:[#allocation3 + $0x10] ss:$8 sps:$4 sm:$0xff]   ;;  %v6441_v18 = vrot.slane %v9891_v19, 5 }
 0x3c5   : > { %7166 = vmatprep.subr.bf16.mxu1 %v7465_v52  ;;  %v6161_v14 = vsel %vm5459_vm11, %v7386_v42, 0  ;;  %v6339_v15 = vrot.slane %v6337_v20, 5 }
 0x3cc   : > { %7167 = vmatpush3.bf16.xpose.msra.mxu1 %v5954_v12  ;;  %v6219_v12 = vld [vmem:[#allocation3 + $0x28] sm:$0xf] }
 0x3cd   : > { %7168 = vmatprep.subr.bf16.mxu1 %v7465_v52  ;;  %v6272_v3 = vshrl.u32 %v6219_v12, 16  ;;  %v6275_v58 = vshll.u32 %v6219_v12, 16 }
 0x3cf   : > { %v6277_v45 = vrot.slane %v6275_v58, 5  ;;  %v6316_v58 = vrot.slane %v6314_v49, 4 }
 0x3d4   : > { %7169 = vmatpush3.bf16.xpose.msra.mxu1 %v5957_v32  ;;  %v6250_v32 = vor.u32 %v6249_v48, %v6246_v23 }
 0x3d5   : > { %7174 = vmatprep.subr.bf16.mxu1 %v7465_v52 }
 0x3d6   : > { %v6251_v25 = vrot.slane %v6250_v32, 4 }
 0x3d8   : > { %v6256_v41 = vsel %vm7744_vm1, %v6251_v25, %v6255_v37 }
 0x3d9   : > { %v6894_v43 = vcombine.low %v6242_v63, %v6256_v41  ;;  %v6325_v63 = vrot.slane %v6323_v30, 5 }
 0x3db   : > { %7171 = vmatmul.mubr.msk.bf16.vlgmr.msra.gmra.mrb[0].mxu1 %vm5459_vm11, %v6867_v36  ;;  %v6274_v36 = vrot.slane %v6272_v3, 4  ;;  %v6359_v21 = vsel %vm5459_vm11, %v6894_v43, 0  ;;  %v6309_v3 = vshll.u32 %v9920_v1, 16 }
 0x3dc   : > { %7175 = vmatpush3.bf16.xpose.msra.mxu1 %v6074_v17  ;;  %7182 = vmatprep.mubr.msk.bf16.mxu1 %vm7466_vm0, %v7465_v52  ;;  %v9896_v17 = vld [vmem:[#allocation3 + $0x2c] sm:$0x1] }
 0x3dd   : > { %7176 = vmatprep.subr.bf16.mxu1 %v7465_v52  ;;  %v6278_v27 = vor.u32 %v6277_v45, %v6274_v36  ;;  %v6281_v28 = vshll.u32 %v9896_v17, 16  ;;  %v6311_v45 = vrot.slane %v6309_v3, 5  ;;  %v6449_v19 = vrot.slane %v9896_v17, 5 }
 0x3df   : > { %v6283_v42 = vrot.slane %v6281_v28, 5  ;;  %v6411_v28 = vld [vmem:[#allocation3 + $0x10] sm:$0xe] }
 0x3e4   : > { %7177 = vmatpush3.bf16.xpose.msra.mxu1 %v6077_v61  ;;  %v6289_v61 = vshll.u32 %v6221_v57, 16  ;;  %v6320_v57 = vor.u32 %v6319_v31, %v6316_v58 }
 0x3e5   : > { %7178 = vmatprep.subr.bf16.mxu1 %v7465_v52 }
 0x3e6   : > { %v6291_v6 = vrot.slane %v6289_v61, 5 }
 0x3e8   : > { %v6292_v55 = vor.u32 %v6291_v6, %v6288_v35  ;;  %v6413_v6 = vld [vmem:[#allocation3 + $0x20] sm:$0xe] }
 0x3ea   : > { %v6293_v60 = vrot.slane %v6292_v55, 4  ;;  %v6457_v55 = vrot.slane %v9920_v1, 5  ;;  %v6465_v1 = vrot.slane %v9929_v47, 5 }
 0x3ec   : > { %7179 = vmatpush3.bf16.xpose.msra.mxu1 %v6080_v24  ;;  %v6279_v24 = vrot.slane %v6278_v27, 4 }
 0x3ed   : > { %7180 = vmatprep.subr.bf16.mxu1 %v7465_v52 }
 0x3ee   : > { %v6284_v0 = vsel %vm7744_vm1, %v6279_v24, %v6283_v42  ;;  %v6445_v42 = vrot.slane %v9901_v46, 5 }
 0x3f4   : > { %7181 = vmatpush3.bf16.xpose.msra.mxu1 %v6083_v59  ;;  %v6265_v59 = vrot.slane %v6264_v5, 4  ;;  %v6412_v5 = vld [vmem:[#allocation3 + $0x18] sm:$0xe] }
 0x3f5   : > { %7186 = vmatprep.subr.bf16.mxu1 %v7465_v52  ;;  %v6900_v43 = vrot.slane %v6412_v5, 9 }
 0x3f6   : > { %v6270_v40 = vsel %vm7744_vm1, %v6265_v59, %v6269_v2  ;;  %v6901_v59 = vrot.slane %v6413_v6, 9 }
 0x3f7   : > { %v6895_v48 = vcombine.low %v6270_v40, %v6284_v0  ;;  %v6442_v24 = vsel %vm9075_vm5, %v6900_v43, %v6441_v18  ;;  %v6417_v40 = vld [vmem:[#allocation3 + $0x40] sm:$0xe] }
 0x3f8   : > { %v6446_v17 = vsel %vm9075_vm5, %v6901_v59, %v6445_v42 }
 0x3f9   : > { %v6362_v13 = vsel %vm5459_vm11, %v6895_v48, 0 }
 0x3fb   : > { %7183 = vmatmul.mubr.msk.bf16.vlgmr.msra.gmra.mrb[0].mxu1 %vm5459_vm11, %v6881_v54  ;;  %v6302_v54 = vrot.slane %v6300_v16, 4  ;;  %v6899_v16 = vrot.slane %v6411_v28, 9 }
 0x3fc   : > { %7187 = vmatpush3.bf16.xpose.msra.mxu1 %v6161_v14  ;;  %7194 = vmatprep.mubr.msk.bf16.mxu1 %vm7466_vm0, %v7465_v52  ;;  %v6305_v14 = vrot.slane %v6303_v10, 5  ;;  %v6437_v10 = vrot.slane %v9889_v29, 5  ;;  %v6893_v29 = vld [vmem:[%s10036_s2 + $0x1c] sm:$0xf] }
 0x3fd   : > { %7188 = vmatprep.subr.bf16.mxu1 %v7465_v52 }
 0x3fe   : > { %v6306_v23 = vor.u32 %v6305_v14, %v6302_v54  ;;  %v6450_v14 = vsel %vm9075_vm5, %v6902_v34, %v6449_v19 }
 0x3ff   : > { %v6909_v2 = vcombine.low %v6446_v17, %v6450_v14 }
 0x400   : > { %v6307_v50 = vrot.slane %v6306_v23, 4 }
 0x401   : > { %v6488_v49 = vsel %vm5459_vm11, %v6909_v2, 0 }
 0x402   : > { %v6312_v25 = vsel %vm7744_vm1, %v6307_v50, %v6311_v45  ;;  %v6907_v50 = vld [vmem:[%s10036_s2 + $0x20] sm:$0xf] }
 0x404   : > { %7189 = vmatpush3.bf16.xpose.msra.mxu1 %v6164_v44  ;;  %v9913_v44 = vld [vmem:[#allocation3 + $0x34] sm:$0x1] }
 0x405   : > { %7190 = vmatprep.subr.bf16.mxu1 %v7465_v52  ;;  %v6295_v12 = vshll.u32 %v9913_v44, 16  ;;  %v6453_v39 = vrot.slane %v9913_v44, 5  ;;  %v6461_v44 = vrot.slane %v9927_v4, 5 }
 0x407   : > { %v6297_v32 = vrot.slane %v6295_v12, 5  ;;  %v6418_v12 = vld [vmem:[#allocation3 + $0x48] sm:$0xe] }
 0x409   : > { %v6298_v36 = vsel %vm7744_vm1, %v6293_v60, %v6297_v32 }
 0x40a   : > { %v6896_v62 = vcombine.low %v6298_v36, %v6312_v25 }
 0x40c   : > { %7191 = vmatpush3.bf16.xpose.msra.mxu1 %v6167_v26  ;;  %v6330_v26 = vrot.slane %v6328_v51, 4  ;;  %v6365_v27 = vsel %vm5459_vm11, %v6896_v62, 0  ;;  %v6416_v51 = vld [vmem:[#allocation3 + $0x38] sm:$0xe] }
 0x40d   : > { %7192 = vmatprep.subr.bf16.mxu1 %v7465_v52  ;;  %v6904_v0 = vrot.slane %v6416_v51, 9 }
 0x40e   : > { %v6334_v11 = vor.u32 %v6333_v9, %v6330_v26  ;;  %v6905_v26 = vrot.slane %v6417_v40, 9  ;;  %v6906_v9 = vrot.slane %v6418_v12, 9 }
 0x40f   : > { %v6458_v23 = vsel %vm9075_vm5, %v6904_v0, %v6457_v55 }
 0x410   : > { %v6335_v37 = vrot.slane %v6334_v11, 4  ;;  %v6462_v3 = vsel %vm9075_vm5, %v6905_v26, %v6461_v44  ;;  %v6466_v58 = vsel %vm9075_vm5, %v6906_v9, %v6465_v1 }
 0x411   : > { %v6911_v31 = vcombine.low %v6462_v3, %v6466_v58 }
 0x412   : > { %v6340_v61 = vsel %vm7744_vm1, %v6335_v37, %v6339_v15 }
 0x413   : > { %v6494_v32 = vsel %vm5459_vm11, %v6911_v31, 0 }
 0x414   : > { %7193 = vmatpush3.bf16.xpose.msra.mxu1 %v6170_v38  ;;  %v6321_v38 = vrot.slane %v6320_v57, 4 }
 0x415   : > { %7198 = vmatprep.subr.bf16.mxu1 %v7465_v52 }
 0x416   : > { %v6326_v56 = vsel %vm7744_vm1, %v6321_v38, %v6325_v63 }
 0x417   : > { %v6897_v41 = vcombine.low %v6326_v56, %v6340_v61 }
 0x419   : > { %v6368_v53 = vsel %vm5459_vm11, %v6897_v41, 0 }
 0x41b   : > { %7195 = vmatmul.mubr.msk.bf16.vlgmr.msra.gmra.mrb[0].mxu1 %vm5459_vm11, %v6887_v8  ;;  %v6438_v8 = vsel %vm9075_vm5, %v6899_v16, %v6437_v10 }
 0x41c   : > { %7199 = vmatpush3.bf16.xpose.msra.mxu1 %v6359_v21  ;;  %7206 = vmatprep.mubr.msk.bf16.mxu1 %vm7466_vm0, %v7465_v52  ;;  %v6908_v35 = vcombine.low %v6438_v8, %v6442_v24  ;;  %v6415_v21 = vld [vmem:[#allocation3 + $0x30] sm:$0xe] }
 0x41d   : > { %7200 = vmatprep.subr.bf16.mxu1 %v7465_v52  ;;  %v6903_v46 = vrot.slane %v6415_v21, 9 }
 0x41e   : > { %v6485_v54 = vsel %vm5459_vm11, %v6908_v35, 0 }
 0x41f   : > { %v6454_v33 = vsel %vm9075_vm5, %v6903_v46, %v6453_v39  ;;  %vm6538_vm5 = vcmask 523264  }
 0x420   : > { %v6910_v48 = vcombine.low %v6454_v33, %v6458_v23 }
 0x422   : > { %v6491_v60 = vsel %vm5459_vm11, %v6910_v48, 0 }
 0x424   : > { %7201 = vmatpush3.bf16.xpose.msra.mxu1 %v6362_v13 }
 0x425   : > { %7202 = vmatprep.subr.bf16.mxu1 %v7465_v52 }
 0x42c   : > { %7203 = vmatpush3.bf16.xpose.msra.mxu1 %v6365_v27 }
 0x42d   : > { %7204 = vmatprep.subr.bf16.mxu1 %v7465_v52 }
 0x434   : > { %7205 = vmatpush3.bf16.xpose.msra.mxu1 %v6368_v53 }
 0x435   : > { %7210 = vmatprep.subr.bf16.mxu1 %v7465_v52 }
 0x43b   : > { %7207 = vmatmul.mubr.msk.bf16.vlgmr.msra.gmra.mrb[0].mxu1 %vm5459_vm11, %v6893_v29 }
 0x43c   : > { %7211 = vmatpush3.bf16.xpose.msra.mxu1 %v6485_v54  ;;  %7218 = vmatprep.mubr.msk.bf16.mxu1 %vm7466_vm0, %v7465_v52 }
 0x43d   : > { %7212 = vmatprep.subr.bf16.mxu1 %v7465_v52 }
 0x444   : > { %7213 = vmatpush3.bf16.xpose.msra.mxu1 %v6488_v49 }
 0x445   : > { %7214 = vmatprep.subr.bf16.mxu1 %v7465_v52 }
 0x44c   : > { %7215 = vmatpush3.bf16.xpose.msra.mxu1 %v6491_v60 }
 0x44d   : > { %7216 = vmatprep.subr.bf16.mxu1 %v7465_v52 }
 0x454   : > { %7217 = vmatpush3.bf16.xpose.msra.mxu1 %v6494_v32 }
 0x45b   : > { %7219 = vmatmul.mubr.msk.bf16.vlgmr.msra.gmra.mrb[0].mxu1 %vm5459_vm11, %v6907_v50 }
 0x496   : > { %v5584_v13 = vpop.f32.mrb[8].mxu0 }
 0x497   : > { %v7136_v4 = vpop.f32.mrb[9].mxu0 }
 0x498   : > { %v5587_v47 = vpop.f32.mrb[10].mxu0 }
 0x499   : > { %v7137_v11 = vpop.f32.mrb[11].mxu0 }
 0x52e   : > { %v6530_v7 = vpop.f32.mrb[0].mxu1 }
 0x52f   : > { %v7222_v52 = vadd.f32 %v6530_v7, %v5584_v13  ;;  %v7220_v36 = vpop.f32.mrb[1].mxu1 }
 0x530   : > { %v6533_v45 = vpop.f32.mrb[2].mxu1 }
 0x531   : > { %v6537_v57 = vmax.f32 %v7222_v52, 0.0  ;;  %v7221_v20 = vpop.f32.mrb[3].mxu1 }
 0x533   : > { %6539 = vst.msk [vmem:[%s163_s7] sm:$0xff] %vm6538_vm5, %v6537_v57 }
 0x534   : > { %7412 = shalt.err (!%p7409_p3)
}
 0x535   : > { %s7413_s25 = scalar_lea.hbm %s9992_s11, 128  ;;  %s7417_s28 = scalar_lea.hbm %s10037_s3, 256 }
 0x536   : > { %p7414_p4 = scmp.ne.s32.totalorder %s9992_s11, %s7413_s25  ;;  %p7418_p9 = scmp.lt.u32.totalorder %s9992_s11, %s10037_s3 }
 0x537   : > { %p7419_p10 = scmp.lt.u32.totalorder %s7417_s28, %s7413_s25  ;;  %p7421_p12 = scmp.lt.u32.totalorder %s7413_s25, %s9992_s11 }
 0x538   : > { %p7415_p7 = pnand %p7414_p4, %p7526_p5 }
 0x539   : > { %p7420_p11 = por %p7419_p10, %p7418_p9 }
 0x53a   : > { %p7416_p8 = pneg %p7415_p7 }
 0x53b   : > { %p7422_p13 = por %p7421_p12, %p7420_p11 }
 0x53d   : > { %p7423_p0 = pnand %p7422_p13, %p7416_p8 }
 0x53f   : > { %7426 = shalt.err (!%p7423_p0)
}
 0x540   : > { %7324 = dma.vmem_to_hbm [thread:$0]  (%p7526_p5), %s9994_s8, 128, %s9992_s11, %s6541_s16  }
 0x541 PF: > { %p7330_p1 = scmp.ge.s32.totalorder %s7461_s15, 2  ;;  %s6566_s4 = sand.u32 1, %s7449_s12  }
 0x542   : > { %s6567_s5 = scalar_lea.sflag [#allocation5], %s6566_s4 }
 0x543   : > { %p7327_p2 = pnand %p7330_p1, %p7530_p6 }
 0x545   : > { %7444 = dma.done.wait (!%p7327_p2), %s6567_s5, 128  }
 0x546   : > { %7446 = vsyncadd (!%p7327_p2), %s6567_s5, 4294967168  ;;  %p13_p3 = scmp.ge.s32.totalorder %s7513_s18, 4   ;;  %s10139_s12 = smov %s7453_s13 }
 0x547   : > { %s10140_s13 = smov %s7457_s14  ;;  %s10141_s14 = smov %s7524_s21 }
 0x548   : > { %s10142_s15 = smov %s7513_s18  ;;  %15 = sbr.rel (!%p13_p3) target bundleno = 3 (0x3), region = 89 }
 0x54f   :  { %6572 = vsyncpa [#allocation5], 1 }
 0x550   :  { %6574 = vsyncpa [#allocation5 + $0x1], 1 }

</bundles_post_ra>
